<compile_context>
chip_gen: v7x
topology: tpu7x:2x2x1
jax: 0.10.0
libtpu: 0.0.40
codegen_flags: <defaults>
</compile_context>

<pallas_src>
import math

import jax
import jax.numpy as jnp
from jax import lax
from jax.experimental import pallas as pl
from jax.experimental.pallas import tpu as pltpu

# ------------------------- model configuration -------------------------------
WIDTH = 32          # transformer_width (= input channels C)
LAYERS = 2          # transformer_layers
HEADS = 4           # transformer_heads
OUT_DIM = 16        # output_dim
HEAD_DIM = WIDTH // HEADS
MAX_LEN = 600
OUT_PAD = 128       # lane-dense padded output width (>= OUT_DIM, multiple of 128)


# ----------------------------- kernel helpers --------------------------------
def _layernorm(x, w, b, eps):
    mu = jnp.mean(x, axis=-1, keepdims=True)
    d = x - mu
    var = jnp.mean(d * d, axis=-1, keepdims=True)
    return d * lax.rsqrt(var + eps) * w + b


_SQRT_2_OVER_PI = math.sqrt(2.0 / math.pi)


def _gelu_tanh(x):
    # tanh-approximation GELU: 0.5*x*(1+tanh(sqrt(2/pi)*(x+0.044715*x^3))).
    # tanh lowers to the EUP (its own VLIW slot); max abs error vs exact
    # erf-GELU ~3e-4, well inside the 5e-3 test tolerance.
    return 0.5 * x * (1.0 + jnp.tanh(_SQRT_2_OVER_PI * (x + 0.044715 * x * x * x)))


# --------------------------------- kernel ------------------------------------
def transformer_head_kernel(
    x_ref, pe_ref, ln0_w, ln0_b,
    q_wT, q_b, k_wT, k_b, v_wT, v_b,
    out_wT, out_b, n1_w, n1_b,
    ff1_wT, ff1_b, ff2_wT, ff2_b, n2_w, n2_b,
    lnf_w, lnf_b, vq_wT, vq_b,
    o_ref,
):
    TB, S, C = x_ref.shape
    TBS = TB * S

    # PositionEncode: x + pe[:S]  (dropout = identity in eval mode)
    # TODO(synk): nn.Dropout layers are identity (eval-mode semantics), no RNG in-kernel.
    x = x_ref[...].astype(jnp.float32) + pe_ref[...]        # (TB, S, C)
    x = x.reshape(TBS, C)                                   # flatten batches into rows

    # self.layer_norm (eps = 1e-8)
    x = _layernorm(x, ln0_w[...], ln0_b[...], 1e-8)

    for l in range(LAYERS):
        # ---------------- self-attention (post-norm encoder layer) ------------
        # q weights/bias already carry the 1/sqrt(HEAD_DIM) scale (folded in wrapper)
        q = jnp.dot(x, q_wT[l], preferred_element_type=jnp.float32) + q_b[l]
        k = jnp.dot(x, k_wT[l], preferred_element_type=jnp.float32) + k_b[l]
        v = jnp.dot(x, v_wT[l], preferred_element_type=jnp.float32) + v_b[l]
        q3 = q.reshape(TB, S, C)
        k3 = k.reshape(TB, S, C)
        v3 = v.reshape(TB, S, C)

        ow = out_wT[l]                                       # (C, C), resident weight
        acc = jnp.zeros((TBS, C), jnp.float32)
        for h in range(HEADS):
            lo, hi = h * HEAD_DIM, (h + 1) * HEAD_DIM
            qh = q3[:, :, lo:hi]                             # (TB, S, hd)
            kh = k3[:, :, lo:hi]
            vh = v3[:, :, lo:hi]
            s = jnp.einsum('bqd,bkd->bqk', qh, kh,
                           preferred_element_type=jnp.float32)   # (TB, S, S)
            s = s - jnp.max(s, axis=-1, keepdims=True)
            p = jnp.exp(s)
            p = p * pl.reciprocal(jnp.sum(p, axis=-1, keepdims=True), approx=True)
            ho = jnp.einsum('bqk,bkd->bqd', p, vh,
                            preferred_element_type=jnp.float32)  # (TB, S, hd)
            # per-head out_proj accumulation: slice the weight rows, not the acts
            acc = acc + jnp.dot(ho.reshape(TBS, HEAD_DIM), ow[lo:hi, :],
                                preferred_element_type=jnp.float32)
        attn = acc + out_b[l]
        x = _layernorm(x + attn, n1_w[l], n1_b[l], 1e-5)

        # ---------------- feed-forward ----------------------------------------
        hdn = jnp.dot(x, ff1_wT[l], preferred_element_type=jnp.float32) + ff1_b[l]
        hdn = _gelu_tanh(hdn)
        ff = jnp.dot(hdn, ff2_wT[l], preferred_element_type=jnp.float32) + ff2_b[l]
        x = _layernorm(x + ff, n2_w[l], n2_b[l], 1e-5)

    # ln_vq_final + vq_projection (lane-dense: weight zero-padded to 128 cols)
    x = _layernorm(x, lnf_w[...], lnf_b[...], 1e-5)
    y = jnp.dot(x, vq_wT[...], preferred_element_type=jnp.float32) + vq_b[...]
    o_ref[...] = y.reshape(TB, S, OUT_PAD).astype(o_ref.dtype)


# ------------------------------- wrapper --------------------------------------
def transformer_first_image_vq_head(x_nchw, params, tb=8):
    B, C, H, W = x_nchw.shape
    assert C == WIDTH
    S = H * W
    assert S <= MAX_LEN, "sequence length exceeds positional-encoding table"

    # NCHW -> (B, S, C)  (glue in plain JAX)
    x = jnp.transpose(x_nchw, (0, 2, 3, 1)).reshape(B, S, C)
    pe = params["pe"][:S]                                   # (S, C)

    # Batch blocking: TB batch elements per grid step (pad B up to a multiple of TB).
    TB = max(1, min(tb, B))
    B_pad = pl.cdiv(B, TB) * TB
    if B_pad != B:
        x = jnp.concatenate([x, jnp.zeros((B_pad - B, S, C), x.dtype)], axis=0)

    # Pre-split QKV weights (lane-aligned q/k/v) and fold attention scale into q.
    scale = 1.0 / math.sqrt(HEAD_DIM)
    in_wT, in_b = params["in_wT"], params["in_b"]           # (L, C, 3C), (L, 1, 3C)
    q_wT = in_wT[:, :, 0:C] * scale
    k_wT = in_wT[:, :, C:2 * C]
    v_wT = in_wT[:, :, 2 * C:3 * C]
    q_b = in_b[:, :, 0:C] * scale
    k_b = in_b[:, :, C:2 * C]
    v_b = in_b[:, :, 2 * C:3 * C]

    # Lane-dense VQ projection: zero-pad the output dim to 128 lanes.
    vq_wT_pad = jnp.zeros((C, OUT_PAD), jnp.float32).at[:, :OUT_DIM].set(params["vq_wT"])
    vq_b_pad = jnp.zeros((1, OUT_PAD), jnp.float32).at[:, :OUT_DIM].set(params["vq_b"])

    inputs = (
        x, pe, params["ln0_w"], params["ln0_b"],
        q_wT, q_b, k_wT, k_b, v_wT, v_b,
        params["out_wT"], params["out_b"], params["n1_w"], params["n1_b"],
        params["ff1_wT"], params["ff1_b"], params["ff2_wT"], params["ff2_b"],
        params["n2_w"], params["n2_b"],
        params["lnf_w"], params["lnf_b"], vq_wT_pad, vq_b_pad,
    )

    def full_spec(a):
        nd = a.ndim
        return pl.BlockSpec(a.shape, lambda b, _nd=nd: (0,) * _nd)

    in_specs = [pl.BlockSpec((TB, S, C), lambda b: (b, 0, 0))] + \
               [full_spec(a) for a in inputs[1:]]

    out = pl.pallas_call(
        transformer_head_kernel,
        out_shape=jax.ShapeDtypeStruct((B_pad, S, OUT_PAD), jnp.float32),
        grid_spec=pltpu.PrefetchScalarGridSpec(
            num_scalar_prefetch=0,
            grid=(B_pad // TB,),
            in_specs=in_specs,
            out_specs=pl.BlockSpec((TB, S, OUT_PAD), lambda b: (b, 0, 0)),
        ),
        compiler_params=pltpu.CompilerParams(dimension_semantics=("parallel",)),
    )(*inputs)

    return out[:B, :, :OUT_DIM]


# ---------------------------- parameter init ----------------------------------
def init_params(key):
    def nrm(k, shape):
        return 0.02 * jax.random.normal(k, shape, jnp.float32)   # _init_weights: N(0, 0.02)

    p = {}
    # PositionEncode buffer (sin on even dims, cos on odd dims)
    pos = jnp.arange(MAX_LEN, dtype=jnp.float32)[:, None]
    div = jnp.exp(jnp.arange(0, WIDTH, 2, dtype=jnp.float32) * (-math.log(10000.0) / WIDTH))
    ang = pos * div
    p["pe"] = jnp.stack([jnp.sin(ang), jnp.cos(ang)], axis=-1).reshape(MAX_LEN, WIDTH)

    keys = iter(jax.random.split(key, LAYERS * 4 + 1))
    in_wT, out_wT, ff1_wT, ff2_wT = [], [], [], []
    for _ in range(LAYERS):
        in_wT.append(nrm(next(keys), (3 * WIDTH, WIDTH)).T)       # MHA in_proj_weight
        out_wT.append(nrm(next(keys), (WIDTH, WIDTH)).T)          # MHA out_proj.weight
        ff1_wT.append(nrm(next(keys), (4 * WIDTH, WIDTH)).T)      # linear1.weight
        ff2_wT.append(nrm(next(keys), (WIDTH, 4 * WIDTH)).T)      # linear2.weight
    p["in_wT"] = jnp.stack(in_wT);  p["in_b"] = jnp.zeros((LAYERS, 1, 3 * WIDTH), jnp.float32)
    p["out_wT"] = jnp.stack(out_wT); p["out_b"] = jnp.zeros((LAYERS, 1, WIDTH), jnp.float32)
    p["ff1_wT"] = jnp.stack(ff1_wT); p["ff1_b"] = jnp.zeros((LAYERS, 1, 4 * WIDTH), jnp.float32)
    p["ff2_wT"] = jnp.stack(ff2_wT); p["ff2_b"] = jnp.zeros((LAYERS, 1, WIDTH), jnp.float32)
    p["n1_w"] = jnp.ones((LAYERS, 1, WIDTH), jnp.float32)
    p["n1_b"] = jnp.zeros((LAYERS, 1, WIDTH), jnp.float32)
    p["n2_w"] = jnp.ones((LAYERS, 1, WIDTH), jnp.float32)
    p["n2_b"] = jnp.zeros((LAYERS, 1, WIDTH), jnp.float32)
    p["ln0_w"] = jnp.ones((1, WIDTH), jnp.float32); p["ln0_b"] = jnp.zeros((1, WIDTH), jnp.float32)
    p["lnf_w"] = jnp.ones((1, WIDTH), jnp.float32); p["lnf_b"] = jnp.zeros((1, WIDTH), jnp.float32)
    p["vq_wT"] = nrm(next(keys), (OUT_DIM, WIDTH)).T              # vq_projection.weight
    p["vq_b"] = jnp.zeros((1, OUT_DIM), jnp.float32)
    return p


# ---------------------------- pure-JAX reference ------------------------------
def reference_forward(x_nchw, p):
    B, C, H, W = x_nchw.shape
    S = H * W

    def ln(x, w, b, eps):
        mu = jnp.mean(x, axis=-1, keepdims=True)
        d = x - mu
        var = jnp.mean(d * d, axis=-1, keepdims=True)
        return d * lax.rsqrt(var + eps) * w + b

    x = jnp.transpose(x_nchw, (0, 2, 3, 1)).reshape(B, S, C)
    x = x + p["pe"][:S][None]
    x = ln(x, p["ln0_w"][0], p["ln0_b"][0], 1e-8)
    for l in range(LAYERS):
        qkv = x @ p["in_wT"][l] + p["in_b"][l]
        q, k, v = jnp.split(qkv, 3, axis=-1)
        qh = q.reshape(B, S, HEADS, HEAD_DIM)
        kh = k.reshape(B, S, HEADS, HEAD_DIM)
        vh = v.reshape(B, S, HEADS, HEAD_DIM)
        s = jnp.einsum('bqhd,bkhd->bhqk', qh, kh) / math.sqrt(HEAD_DIM)
        a = jax.nn.softmax(s, axis=-1)
        o = jnp.einsum('bhqk,bkhd->bqhd', a, vh).reshape(B, S, C)
        o = o @ p["out_wT"][l] + p["out_b"][l]
        x = ln(x + o, p["n1_w"][l, 0], p["n1_b"][l, 0], 1e-5)
        h1 = jax.nn.gelu(x @ p["ff1_wT"][l] + p["ff1_b"][l], approximate=False)
        f = h1 @ p["ff2_wT"][l] + p["ff2_b"][l]
        x = ln(x + f, p["n2_w"][l, 0], p["n2_b"][l, 0], 1e-5)
    x = ln(x, p["lnf_w"][0], p["lnf_b"][0], 1e-5)
    return x @ p["vq_wT"] + p["vq_b"]


# ----------------------------------- main --------------------------------------
if __name__ == "__main__":
    key = jax.random.PRNGKey(0)
    k_x, k_p = jax.random.split(key)

    B, H, W = 3, 4, 4                      # input: (B, C=WIDTH, H, W) -> seq len 16
    x = jax.random.normal(k_x, (B, WIDTH, H, W), jnp.float32)
    params = init_params(k_p)

    # tb=2 -> B padded to 4, grid of 2 steps, 2 batch elements flattened per step.
    out = transformer_first_image_vq_head(x, params, tb=2)
    out = jax.block_until_ready(out)

    assert out.shape == (B, H * W, OUT_DIM)
    assert bool(jnp.all(jnp.isfinite(out)))

    ref = reference_forward(x, params)
    assert bool(jnp.allclose(out, ref, atol=5e-3, rtol=5e-3)), "mismatch vs reference"

    print("KERNEL_OK")
</pallas_src>

<mosaic_0001>
module attributes {stable_mosaic.version = 11 : i64} {
  func.func @transformer_head_kernel(%arg0: i32, %arg1: memref<2x16x32xf32, #tpu.memory_space<vmem>>, %arg2: memref<16x32xf32, #tpu.memory_space<vmem>>, %arg3: memref<1x32xf32, #tpu.memory_space<vmem>>, %arg4: memref<1x32xf32, #tpu.memory_space<vmem>>, %arg5: memref<2x32x32xf32, #tpu.memory_space<vmem>>, %arg6: memref<2x1x32xf32, #tpu.memory_space<vmem>>, %arg7: memref<2x32x32xf32, #tpu.memory_space<vmem>>, %arg8: memref<2x1x32xf32, #tpu.memory_space<vmem>>, %arg9: memref<2x32x32xf32, #tpu.memory_space<vmem>>, %arg10: memref<2x1x32xf32, #tpu.memory_space<vmem>>, %arg11: memref<2x32x32xf32, #tpu.memory_space<vmem>>, %arg12: memref<2x1x32xf32, #tpu.memory_space<vmem>>, %arg13: memref<2x1x32xf32, #tpu.memory_space<vmem>>, %arg14: memref<2x1x32xf32, #tpu.memory_space<vmem>>, %arg15: memref<2x32x128xf32, #tpu.memory_space<vmem>>, %arg16: memref<2x1x128xf32, #tpu.memory_space<vmem>>, %arg17: memref<2x128x32xf32, #tpu.memory_space<vmem>>, %arg18: memref<2x1x32xf32, #tpu.memory_space<vmem>>, %arg19: memref<2x1x32xf32, #tpu.memory_space<vmem>>, %arg20: memref<2x1x32xf32, #tpu.memory_space<vmem>>, %arg21: memref<1x32xf32, #tpu.memory_space<vmem>>, %arg22: memref<1x32xf32, #tpu.memory_space<vmem>>, %arg23: memref<32x128xf32, #tpu.memory_space<vmem>>, %arg24: memref<1x128xf32, #tpu.memory_space<vmem>>, %arg25: memref<2x16x128xf32, #tpu.memory_space<vmem>>) attributes {dimension_semantics = [#tpu.dimension_semantics<parallel>], iteration_bounds = array<i64: 2>, scalar_prefetch = 0 : i64, scratch_operands = 0 : i64, tpu.core_type = #tpu.core_type<tc>, window_params = [{transform_indices = @transform_0, window_bounds = array<i64: 2, 16, 32>}, {pipeline_mode = #tpu.pipeline_mode<synchronous>, transform_indices = @transform_1, window_bounds = array<i64: 16, 32>}, {pipeline_mode = #tpu.pipeline_mode<synchronous>, transform_indices = @transform_2, window_bounds = array<i64: 1, 32>}, {pipeline_mode = #tpu.pipeline_mode<synchronous>, transform_indices = @transform_3, window_bounds = array<i64: 1, 32>}, {pipeline_mode = #tpu.pipeline_mode<synchronous>, transform_indices = @transform_4, window_bounds = array<i64: 2, 32, 32>}, {pipeline_mode = #tpu.pipeline_mode<synchronous>, transform_indices = @transform_5, window_bounds = array<i64: 2, 1, 32>}, {pipeline_mode = #tpu.pipeline_mode<synchronous>, transform_indices = @transform_6, window_bounds = array<i64: 2, 32, 32>}, {pipeline_mode = #tpu.pipeline_mode<synchronous>, transform_indices = @transform_7, window_bounds = array<i64: 2, 1, 32>}, {pipeline_mode = #tpu.pipeline_mode<synchronous>, transform_indices = @transform_8, window_bounds = array<i64: 2, 32, 32>}, {pipeline_mode = #tpu.pipeline_mode<synchronous>, transform_indices = @transform_9, window_bounds = array<i64: 2, 1, 32>}, {pipeline_mode = #tpu.pipeline_mode<synchronous>, transform_indices = @transform_10, window_bounds = array<i64: 2, 32, 32>}, {pipeline_mode = #tpu.pipeline_mode<synchronous>, transform_indices = @transform_11, window_bounds = array<i64: 2, 1, 32>}, {pipeline_mode = #tpu.pipeline_mode<synchronous>, transform_indices = @transform_12, window_bounds = array<i64: 2, 1, 32>}, {pipeline_mode = #tpu.pipeline_mode<synchronous>, transform_indices = @transform_13, window_bounds = array<i64: 2, 1, 32>}, {pipeline_mode = #tpu.pipeline_mode<synchronous>, transform_indices = @transform_14, window_bounds = array<i64: 2, 32, 128>}, {pipeline_mode = #tpu.pipeline_mode<synchronous>, transform_indices = @transform_15, window_bounds = array<i64: 2, 1, 128>}, {pipeline_mode = #tpu.pipeline_mode<synchronous>, transform_indices = @transform_16, window_bounds = array<i64: 2, 128, 32>}, {pipeline_mode = #tpu.pipeline_mode<synchronous>, transform_indices = @transform_17, window_bounds = array<i64: 2, 1, 32>}, {pipeline_mode = #tpu.pipeline_mode<synchronous>, transform_indices = @transform_18, window_bounds = array<i64: 2, 1, 32>}, {pipeline_mode = #tpu.pipeline_mode<synchronous>, transform_indices = @transform_19, window_bounds = array<i64: 2, 1, 32>}, {pipeline_mode = #tpu.pipeline_mode<synchronous>, transform_indices = @transform_20, window_bounds = array<i64: 1, 32>}, {pipeline_mode = #tpu.pipeline_mode<synchronous>, transform_indices = @transform_21, window_bounds = array<i64: 1, 32>}, {pipeline_mode = #tpu.pipeline_mode<synchronous>, transform_indices = @transform_22, window_bounds = array<i64: 32, 128>}, {pipeline_mode = #tpu.pipeline_mode<synchronous>, transform_indices = @transform_23, window_bounds = array<i64: 1, 128>}, {transform_indices = @transform_24, window_bounds = array<i64: 2, 16, 128>}]} {
    %c0 = arith.constant 0 : index
    %c0_0 = arith.constant 0 : index
    %c0_1 = arith.constant 0 : index
    %0 = vector.load %arg1[%c0, %c0_0, %c0_1] : memref<2x16x32xf32, #tpu.memory_space<vmem>>, vector<2x16x32xf32>
    %c0_2 = arith.constant 0 : index
    %c0_3 = arith.constant 0 : index
    %1 = vector.load %arg2[%c0_2, %c0_3] : memref<16x32xf32, #tpu.memory_space<vmem>>, vector<16x32xf32>
    %2 = vector.shape_cast %1 : vector<16x32xf32> to vector<1x16x32xf32>
    %3 = vector.broadcast %2 : vector<1x16x32xf32> to vector<2x16x32xf32>
    %4 = arith.addf %0, %3 : vector<2x16x32xf32>
    %5 = vector.shape_cast %4 : vector<2x16x32xf32> to vector<32x32xf32>
    %c0_4 = arith.constant 0 : index
    %c0_5 = arith.constant 0 : index
    %6 = vector.load %arg3[%c0_4, %c0_5] : memref<1x32xf32, #tpu.memory_space<vmem>>, vector<1x32xf32>
    %c0_6 = arith.constant 0 : index
    %c0_7 = arith.constant 0 : index
    %7 = vector.load %arg4[%c0_6, %c0_7] : memref<1x32xf32, #tpu.memory_space<vmem>>, vector<1x32xf32>
    %cst = arith.constant dense<0.000000e+00> : vector<32xf32>
    %8 = vector.multi_reduction <add>, %5, %cst [1] : vector<32x32xf32> to vector<32xf32>
    %9 = vector.shape_cast %8 : vector<32xf32> to vector<32x1xf32>
    %cst_8 = arith.constant 3.200000e+01 : f32
    %10 = vector.broadcast %cst_8 : f32 to vector<32x1xf32>
    %11 = arith.divf %9, %10 : vector<32x1xf32>
    %12 = vector.broadcast %11 : vector<32x1xf32> to vector<32x32xf32>
    %13 = arith.subf %5, %12 : vector<32x32xf32>
    %14 = arith.mulf %13, %13 : vector<32x32xf32>
    %cst_9 = arith.constant dense<0.000000e+00> : vector<32xf32>
    %15 = vector.multi_reduction <add>, %14, %cst_9 [1] : vector<32x32xf32> to vector<32xf32>
    %16 = vector.shape_cast %15 : vector<32xf32> to vector<32x1xf32>
    %cst_10 = arith.constant 3.200000e+01 : f32
    %17 = vector.broadcast %cst_10 : f32 to vector<32x1xf32>
    %18 = arith.divf %16, %17 : vector<32x1xf32>
    %cst_11 = arith.constant 9.99999993E-9 : f32
    %19 = vector.broadcast %cst_11 : f32 to vector<32x1xf32>
    %20 = arith.addf %18, %19 : vector<32x1xf32>
    %21 = math.rsqrt %20 : vector<32x1xf32>
    %22 = vector.broadcast %21 : vector<32x1xf32> to vector<32x32xf32>
    %23 = arith.mulf %13, %22 : vector<32x32xf32>
    %24 = vector.broadcast %6 : vector<1x32xf32> to vector<32x32xf32>
    %25 = arith.mulf %23, %24 : vector<32x32xf32>
    %26 = vector.broadcast %7 : vector<1x32xf32> to vector<32x32xf32>
    %27 = arith.addf %25, %26 : vector<32x32xf32>
    %c0_12 = arith.constant 0 : index
    %c0_13 = arith.constant 0 : index
    %c0_14 = arith.constant 0 : index
    %28 = vector.load %arg5[%c0_12, %c0_13, %c0_14] : memref<2x32x32xf32, #tpu.memory_space<vmem>>, vector<1x32x32xf32>
    %29 = vector.shape_cast %28 : vector<1x32x32xf32> to vector<32x32xf32>
    %cst_15 = arith.constant dense<0.000000e+00> : vector<32x32xf32>
    %30 = tpu.matmul %27, %29, %cst_15 {dimension_numbers = #tpu.dot_dimension_numbers<[1], [0], [0], [1], [0, 0, 1, 1], [], []>} : vector<32x32xf32>, vector<32x32xf32>, vector<32x32xf32> -> vector<32x32xf32>
    %c0_16 = arith.constant 0 : index
    %c0_17 = arith.constant 0 : index
    %c0_18 = arith.constant 0 : index
    %31 = vector.load %arg6[%c0_16, %c0_17, %c0_18] : memref<2x1x32xf32, #tpu.memory_space<vmem>>, vector<1x1x32xf32>
    %32 = vector.shape_cast %31 : vector<1x1x32xf32> to vector<1x32xf32>
    %33 = vector.broadcast %32 : vector<1x32xf32> to vector<32x32xf32>
    %34 = arith.addf %30, %33 : vector<32x32xf32>
    %c0_19 = arith.constant 0 : index
    %c0_20 = arith.constant 0 : index
    %c0_21 = arith.constant 0 : index
    %35 = vector.load %arg7[%c0_19, %c0_20, %c0_21] : memref<2x32x32xf32, #tpu.memory_space<vmem>>, vector<1x32x32xf32>
    %36 = vector.shape_cast %35 : vector<1x32x32xf32> to vector<32x32xf32>
    %cst_22 = arith.constant dense<0.000000e+00> : vector<32x32xf32>
    %37 = tpu.matmul %27, %36, %cst_22 {dimension_numbers = #tpu.dot_dimension_numbers<[1], [0], [0], [1], [0, 0, 1, 1], [], []>} : vector<32x32xf32>, vector<32x32xf32>, vector<32x32xf32> -> vector<32x32xf32>
    %c0_23 = arith.constant 0 : index
    %c0_24 = arith.constant 0 : index
    %c0_25 = arith.constant 0 : index
    %38 = vector.load %arg8[%c0_23, %c0_24, %c0_25] : memref<2x1x32xf32, #tpu.memory_space<vmem>>, vector<1x1x32xf32>
    %39 = vector.shape_cast %38 : vector<1x1x32xf32> to vector<1x32xf32>
    %40 = vector.broadcast %39 : vector<1x32xf32> to vector<32x32xf32>
    %41 = arith.addf %37, %40 : vector<32x32xf32>
    %c0_26 = arith.constant 0 : index
    %c0_27 = arith.constant 0 : index
    %c0_28 = arith.constant 0 : index
    %42 = vector.load %arg9[%c0_26, %c0_27, %c0_28] : memref<2x32x32xf32, #tpu.memory_space<vmem>>, vector<1x32x32xf32>
    %43 = vector.shape_cast %42 : vector<1x32x32xf32> to vector<32x32xf32>
    %cst_29 = arith.constant dense<0.000000e+00> : vector<32x32xf32>
    %44 = tpu.matmul %27, %43, %cst_29 {dimension_numbers = #tpu.dot_dimension_numbers<[1], [0], [0], [1], [0, 0, 1, 1], [], []>} : vector<32x32xf32>, vector<32x32xf32>, vector<32x32xf32> -> vector<32x32xf32>
    %c0_30 = arith.constant 0 : index
    %c0_31 = arith.constant 0 : index
    %c0_32 = arith.constant 0 : index
    %45 = vector.load %arg10[%c0_30, %c0_31, %c0_32] : memref<2x1x32xf32, #tpu.memory_space<vmem>>, vector<1x1x32xf32>
    %46 = vector.shape_cast %45 : vector<1x1x32xf32> to vector<1x32xf32>
    %47 = vector.broadcast %46 : vector<1x32xf32> to vector<32x32xf32>
    %48 = arith.addf %44, %47 : vector<32x32xf32>
    %49 = vector.shape_cast %34 : vector<32x32xf32> to vector<2x16x32xf32>
    %50 = vector.shape_cast %41 : vector<32x32xf32> to vector<2x16x32xf32>
    %51 = vector.shape_cast %48 : vector<32x32xf32> to vector<2x16x32xf32>
    %c0_33 = arith.constant 0 : index
    %c0_34 = arith.constant 0 : index
    %c0_35 = arith.constant 0 : index
    %52 = vector.load %arg11[%c0_33, %c0_34, %c0_35] : memref<2x32x32xf32, #tpu.memory_space<vmem>>, vector<1x32x32xf32>
    %53 = vector.shape_cast %52 : vector<1x32x32xf32> to vector<32x32xf32>
    %cst_36 = arith.constant 0.000000e+00 : f32
    %54 = vector.broadcast %cst_36 : f32 to vector<32x32xf32>
    %55 = vector.extract_strided_slice %49 {offsets = [0, 0, 0], sizes = [2, 16, 8], strides = [1, 1, 1]} : vector<2x16x32xf32> to vector<2x16x8xf32>
    %56 = vector.extract_strided_slice %50 {offsets = [0, 0, 0], sizes = [2, 16, 8], strides = [1, 1, 1]} : vector<2x16x32xf32> to vector<2x16x8xf32>
    %57 = vector.extract_strided_slice %51 {offsets = [0, 0, 0], sizes = [2, 16, 8], strides = [1, 1, 1]} : vector<2x16x32xf32> to vector<2x16x8xf32>
    "tpu.trace_start"() <{level = 10 : i32, message = "bqd,bkd->bqk"}> : () -> ()
    %cst_37 = arith.constant dense<0.000000e+00> : vector<2x16x16xf32>
    %58 = tpu.matmul %55, %56, %cst_37 {dimension_numbers = #tpu.dot_dimension_numbers<[2], [2], [1], [1], [0, 0, 0, 1, 1, 1], [0], [0]>} : vector<2x16x8xf32>, vector<2x16x8xf32>, vector<2x16x16xf32> -> vector<2x16x16xf32>
    "tpu.trace_stop"() : () -> ()
    %cst_38 = arith.constant dense<0xFF800000> : vector<2x16xf32>
    %59 = vector.multi_reduction <maximumf>, %58, %cst_38 [2] : vector<2x16x16xf32> to vector<2x16xf32>
    %60 = vector.shape_cast %59 : vector<2x16xf32> to vector<2x16x1xf32>
    %61 = vector.broadcast %60 : vector<2x16x1xf32> to vector<2x16x16xf32>
    %62 = arith.subf %58, %61 : vector<2x16x16xf32>
    %63 = math.exp %62 : vector<2x16x16xf32>
    %cst_39 = arith.constant dense<0.000000e+00> : vector<2x16xf32>
    %64 = vector.multi_reduction <add>, %63, %cst_39 [2] : vector<2x16x16xf32> to vector<2x16xf32>
    %65 = vector.shape_cast %64 : vector<2x16xf32> to vector<2x16x1xf32>
    %66 = tpu.reciprocal %65 {approx = true} : vector<2x16x1xf32> -> vector<2x16x1xf32>
    %67 = vector.broadcast %66 : vector<2x16x1xf32> to vector<2x16x16xf32>
    %68 = arith.mulf %63, %67 : vector<2x16x16xf32>
    "tpu.trace_start"() <{level = 10 : i32, message = "bqk,bkd->bqd"}> : () -> ()
    %cst_40 = arith.constant dense<0.000000e+00> : vector<2x16x8xf32>
    %69 = tpu.matmul %68, %57, %cst_40 {dimension_numbers = #tpu.dot_dimension_numbers<[2], [1], [1], [2], [0, 0, 0, 1, 1, 2], [0], [0]>} : vector<2x16x16xf32>, vector<2x16x8xf32>, vector<2x16x8xf32> -> vector<2x16x8xf32>
    "tpu.trace_stop"() : () -> ()
    %70 = vector.shape_cast %69 : vector<2x16x8xf32> to vector<32x8xf32>
    %71 = vector.extract_strided_slice %53 {offsets = [0, 0], sizes = [8, 32], strides = [1, 1]} : vector<32x32xf32> to vector<8x32xf32>
    %cst_41 = arith.constant dense<0.000000e+00> : vector<32x32xf32>
    %72 = tpu.matmul %70, %71, %cst_41 {dimension_numbers = #tpu.dot_dimension_numbers<[1], [0], [0], [1], [0, 0, 1, 1], [], []>} : vector<32x8xf32>, vector<8x32xf32>, vector<32x32xf32> -> vector<32x32xf32>
    %73 = arith.addf %54, %72 : vector<32x32xf32>
    %74 = vector.extract_strided_slice %49 {offsets = [0, 0, 8], sizes = [2, 16, 8], strides = [1, 1, 1]} : vector<2x16x32xf32> to vector<2x16x8xf32>
    %75 = vector.extract_strided_slice %50 {offsets = [0, 0, 8], sizes = [2, 16, 8], strides = [1, 1, 1]} : vector<2x16x32xf32> to vector<2x16x8xf32>
    %76 = vector.extract_strided_slice %51 {offsets = [0, 0, 8], sizes = [2, 16, 8], strides = [1, 1, 1]} : vector<2x16x32xf32> to vector<2x16x8xf32>
    "tpu.trace_start"() <{level = 10 : i32, message = "bqd,bkd->bqk"}> : () -> ()
    %cst_42 = arith.constant dense<0.000000e+00> : vector<2x16x16xf32>
    %77 = tpu.matmul %74, %75, %cst_42 {dimension_numbers = #tpu.dot_dimension_numbers<[2], [2], [1], [1], [0, 0, 0, 1, 1, 1], [0], [0]>} : vector<2x16x8xf32>, vector<2x16x8xf32>, vector<2x16x16xf32> -> vector<2x16x16xf32>
    "tpu.trace_stop"() : () -> ()
    %cst_43 = arith.constant dense<0xFF800000> : vector<2x16xf32>
    %78 = vector.multi_reduction <maximumf>, %77, %cst_43 [2] : vector<2x16x16xf32> to vector<2x16xf32>
    %79 = vector.shape_cast %78 : vector<2x16xf32> to vector<2x16x1xf32>
    %80 = vector.broadcast %79 : vector<2x16x1xf32> to vector<2x16x16xf32>
    %81 = arith.subf %77, %80 : vector<2x16x16xf32>
    %82 = math.exp %81 : vector<2x16x16xf32>
    %cst_44 = arith.constant dense<0.000000e+00> : vector<2x16xf32>
    %83 = vector.multi_reduction <add>, %82, %cst_44 [2] : vector<2x16x16xf32> to vector<2x16xf32>
    %84 = vector.shape_cast %83 : vector<2x16xf32> to vector<2x16x1xf32>
    %85 = tpu.reciprocal %84 {approx = true} : vector<2x16x1xf32> -> vector<2x16x1xf32>
    %86 = vector.broadcast %85 : vector<2x16x1xf32> to vector<2x16x16xf32>
    %87 = arith.mulf %82, %86 : vector<2x16x16xf32>
    "tpu.trace_start"() <{level = 10 : i32, message = "bqk,bkd->bqd"}> : () -> ()
    %cst_45 = arith.constant dense<0.000000e+00> : vector<2x16x8xf32>
    %88 = tpu.matmul %87, %76, %cst_45 {dimension_numbers = #tpu.dot_dimension_numbers<[2], [1], [1], [2], [0, 0, 0, 1, 1, 2], [0], [0]>} : vector<2x16x16xf32>, vector<2x16x8xf32>, vector<2x16x8xf32> -> vector<2x16x8xf32>
    "tpu.trace_stop"() : () -> ()
    %89 = vector.shape_cast %88 : vector<2x16x8xf32> to vector<32x8xf32>
    %90 = vector.extract_strided_slice %53 {offsets = [8, 0], sizes = [8, 32], strides = [1, 1]} : vector<32x32xf32> to vector<8x32xf32>
    %cst_46 = arith.constant dense<0.000000e+00> : vector<32x32xf32>
    %91 = tpu.matmul %89, %90, %cst_46 {dimension_numbers = #tpu.dot_dimension_numbers<[1], [0], [0], [1], [0, 0, 1, 1], [], []>} : vector<32x8xf32>, vector<8x32xf32>, vector<32x32xf32> -> vector<32x32xf32>
    %92 = arith.addf %73, %91 : vector<32x32xf32>
    %93 = vector.extract_strided_slice %49 {offsets = [0, 0, 16], sizes = [2, 16, 8], strides = [1, 1, 1]} : vector<2x16x32xf32> to vector<2x16x8xf32>
    %94 = vector.extract_strided_slice %50 {offsets = [0, 0, 16], sizes = [2, 16, 8], strides = [1, 1, 1]} : vector<2x16x32xf32> to vector<2x16x8xf32>
    %95 = vector.extract_strided_slice %51 {offsets = [0, 0, 16], sizes = [2, 16, 8], strides = [1, 1, 1]} : vector<2x16x32xf32> to vector<2x16x8xf32>
    "tpu.trace_start"() <{level = 10 : i32, message = "bqd,bkd->bqk"}> : () -> ()
    %cst_47 = arith.constant dense<0.000000e+00> : vector<2x16x16xf32>
    %96 = tpu.matmul %93, %94, %cst_47 {dimension_numbers = #tpu.dot_dimension_numbers<[2], [2], [1], [1], [0, 0, 0, 1, 1, 1], [0], [0]>} : vector<2x16x8xf32>, vector<2x16x8xf32>, vector<2x16x16xf32> -> vector<2x16x16xf32>
    "tpu.trace_stop"() : () -> ()
    %cst_48 = arith.constant dense<0xFF800000> : vector<2x16xf32>
    %97 = vector.multi_reduction <maximumf>, %96, %cst_48 [2] : vector<2x16x16xf32> to vector<2x16xf32>
    %98 = vector.shape_cast %97 : vector<2x16xf32> to vector<2x16x1xf32>
    %99 = vector.broadcast %98 : vector<2x16x1xf32> to vector<2x16x16xf32>
    %100 = arith.subf %96, %99 : vector<2x16x16xf32>
    %101 = math.exp %100 : vector<2x16x16xf32>
    %cst_49 = arith.constant dense<0.000000e+00> : vector<2x16xf32>
    %102 = vector.multi_reduction <add>, %101, %cst_49 [2] : vector<2x16x16xf32> to vector<2x16xf32>
    %103 = vector.shape_cast %102 : vector<2x16xf32> to vector<2x16x1xf32>
    %104 = tpu.reciprocal %103 {approx = true} : vector<2x16x1xf32> -> vector<2x16x1xf32>
    %105 = vector.broadcast %104 : vector<2x16x1xf32> to vector<2x16x16xf32>
    %106 = arith.mulf %101, %105 : vector<2x16x16xf32>
    "tpu.trace_start"() <{level = 10 : i32, message = "bqk,bkd->bqd"}> : () -> ()
    %cst_50 = arith.constant dense<0.000000e+00> : vector<2x16x8xf32>
    %107 = tpu.matmul %106, %95, %cst_50 {dimension_numbers = #tpu.dot_dimension_numbers<[2], [1], [1], [2], [0, 0, 0, 1, 1, 2], [0], [0]>} : vector<2x16x16xf32>, vector<2x16x8xf32>, vector<2x16x8xf32> -> vector<2x16x8xf32>
    "tpu.trace_stop"() : () -> ()
    %108 = vector.shape_cast %107 : vector<2x16x8xf32> to vector<32x8xf32>
    %109 = vector.extract_strided_slice %53 {offsets = [16, 0], sizes = [8, 32], strides = [1, 1]} : vector<32x32xf32> to vector<8x32xf32>
    %cst_51 = arith.constant dense<0.000000e+00> : vector<32x32xf32>
    %110 = tpu.matmul %108, %109, %cst_51 {dimension_numbers = #tpu.dot_dimension_numbers<[1], [0], [0], [1], [0, 0, 1, 1], [], []>} : vector<32x8xf32>, vector<8x32xf32>, vector<32x32xf32> -> vector<32x32xf32>
    %111 = arith.addf %92, %110 : vector<32x32xf32>
    %112 = vector.extract_strided_slice %49 {offsets = [0, 0, 24], sizes = [2, 16, 8], strides = [1, 1, 1]} : vector<2x16x32xf32> to vector<2x16x8xf32>
    %113 = vector.extract_strided_slice %50 {offsets = [0, 0, 24], sizes = [2, 16, 8], strides = [1, 1, 1]} : vector<2x16x32xf32> to vector<2x16x8xf32>
    %114 = vector.extract_strided_slice %51 {offsets = [0, 0, 24], sizes = [2, 16, 8], strides = [1, 1, 1]} : vector<2x16x32xf32> to vector<2x16x8xf32>
    "tpu.trace_start"() <{level = 10 : i32, message = "bqd,bkd->bqk"}> : () -> ()
    %cst_52 = arith.constant dense<0.000000e+00> : vector<2x16x16xf32>
    %115 = tpu.matmul %112, %113, %cst_52 {dimension_numbers = #tpu.dot_dimension_numbers<[2], [2], [1], [1], [0, 0, 0, 1, 1, 1], [0], [0]>} : vector<2x16x8xf32>, vector<2x16x8xf32>, vector<2x16x16xf32> -> vector<2x16x16xf32>
    "tpu.trace_stop"() : () -> ()
    %cst_53 = arith.constant dense<0xFF800000> : vector<2x16xf32>
    %116 = vector.multi_reduction <maximumf>, %115, %cst_53 [2] : vector<2x16x16xf32> to vector<2x16xf32>
    %117 = vector.shape_cast %116 : vector<2x16xf32> to vector<2x16x1xf32>
    %118 = vector.broadcast %117 : vector<2x16x1xf32> to vector<2x16x16xf32>
    %119 = arith.subf %115, %118 : vector<2x16x16xf32>
    %120 = math.exp %119 : vector<2x16x16xf32>
    %cst_54 = arith.constant dense<0.000000e+00> : vector<2x16xf32>
    %121 = vector.multi_reduction <add>, %120, %cst_54 [2] : vector<2x16x16xf32> to vector<2x16xf32>
    %122 = vector.shape_cast %121 : vector<2x16xf32> to vector<2x16x1xf32>
    %123 = tpu.reciprocal %122 {approx = true} : vector<2x16x1xf32> -> vector<2x16x1xf32>
    %124 = vector.broadcast %123 : vector<2x16x1xf32> to vector<2x16x16xf32>
    %125 = arith.mulf %120, %124 : vector<2x16x16xf32>
    "tpu.trace_start"() <{level = 10 : i32, message = "bqk,bkd->bqd"}> : () -> ()
    %cst_55 = arith.constant dense<0.000000e+00> : vector<2x16x8xf32>
    %126 = tpu.matmul %125, %114, %cst_55 {dimension_numbers = #tpu.dot_dimension_numbers<[2], [1], [1], [2], [0, 0, 0, 1, 1, 2], [0], [0]>} : vector<2x16x16xf32>, vector<2x16x8xf32>, vector<2x16x8xf32> -> vector<2x16x8xf32>
    "tpu.trace_stop"() : () -> ()
    %127 = vector.shape_cast %126 : vector<2x16x8xf32> to vector<32x8xf32>
    %128 = vector.extract_strided_slice %53 {offsets = [24, 0], sizes = [8, 32], strides = [1, 1]} : vector<32x32xf32> to vector<8x32xf32>
    %cst_56 = arith.constant dense<0.000000e+00> : vector<32x32xf32>
    %129 = tpu.matmul %127, %128, %cst_56 {dimension_numbers = #tpu.dot_dimension_numbers<[1], [0], [0], [1], [0, 0, 1, 1], [], []>} : vector<32x8xf32>, vector<8x32xf32>, vector<32x32xf32> -> vector<32x32xf32>
    %130 = arith.addf %111, %129 : vector<32x32xf32>
    %c0_57 = arith.constant 0 : index
    %c0_58 = arith.constant 0 : index
    %c0_59 = arith.constant 0 : index
    %131 = vector.load %arg12[%c0_57, %c0_58, %c0_59] : memref<2x1x32xf32, #tpu.memory_space<vmem>>, vector<1x1x32xf32>
    %132 = vector.shape_cast %131 : vector<1x1x32xf32> to vector<1x32xf32>
    %133 = vector.broadcast %132 : vector<1x32xf32> to vector<32x32xf32>
    %134 = arith.addf %130, %133 : vector<32x32xf32>
    %135 = arith.addf %27, %134 : vector<32x32xf32>
    %c0_60 = arith.constant 0 : index
    %c0_61 = arith.constant 0 : index
    %c0_62 = arith.constant 0 : index
    %136 = vector.load %arg13[%c0_60, %c0_61, %c0_62] : memref<2x1x32xf32, #tpu.memory_space<vmem>>, vector<1x1x32xf32>
    %137 = vector.shape_cast %136 : vector<1x1x32xf32> to vector<1x32xf32>
    %c0_63 = arith.constant 0 : index
    %c0_64 = arith.constant 0 : index
    %c0_65 = arith.constant 0 : index
    %138 = vector.load %arg14[%c0_63, %c0_64, %c0_65] : memref<2x1x32xf32, #tpu.memory_space<vmem>>, vector<1x1x32xf32>
    %139 = vector.shape_cast %138 : vector<1x1x32xf32> to vector<1x32xf32>
    %cst_66 = arith.constant dense<0.000000e+00> : vector<32xf32>
    %140 = vector.multi_reduction <add>, %135, %cst_66 [1] : vector<32x32xf32> to vector<32xf32>
    %141 = vector.shape_cast %140 : vector<32xf32> to vector<32x1xf32>
    %cst_67 = arith.constant 3.200000e+01 : f32
    %142 = vector.broadcast %cst_67 : f32 to vector<32x1xf32>
    %143 = arith.divf %141, %142 : vector<32x1xf32>
    %144 = vector.broadcast %143 : vector<32x1xf32> to vector<32x32xf32>
    %145 = arith.subf %135, %144 : vector<32x32xf32>
    %146 = arith.mulf %145, %145 : vector<32x32xf32>
    %cst_68 = arith.constant dense<0.000000e+00> : vector<32xf32>
    %147 = vector.multi_reduction <add>, %146, %cst_68 [1] : vector<32x32xf32> to vector<32xf32>
    %148 = vector.shape_cast %147 : vector<32xf32> to vector<32x1xf32>
    %cst_69 = arith.constant 3.200000e+01 : f32
    %149 = vector.broadcast %cst_69 : f32 to vector<32x1xf32>
    %150 = arith.divf %148, %149 : vector<32x1xf32>
    %cst_70 = arith.constant 9.99999974E-6 : f32
    %151 = vector.broadcast %cst_70 : f32 to vector<32x1xf32>
    %152 = arith.addf %150, %151 : vector<32x1xf32>
    %153 = math.rsqrt %152 : vector<32x1xf32>
    %154 = vector.broadcast %153 : vector<32x1xf32> to vector<32x32xf32>
    %155 = arith.mulf %145, %154 : vector<32x32xf32>
    %156 = vector.broadcast %137 : vector<1x32xf32> to vector<32x32xf32>
    %157 = arith.mulf %155, %156 : vector<32x32xf32>
    %158 = vector.broadcast %139 : vector<1x32xf32> to vector<32x32xf32>
    %159 = arith.addf %157, %158 : vector<32x32xf32>
    %c0_71 = arith.constant 0 : index
    %c0_72 = arith.constant 0 : index
    %c0_73 = arith.constant 0 : index
    %160 = vector.load %arg15[%c0_71, %c0_72, %c0_73] : memref<2x32x128xf32, #tpu.memory_space<vmem>>, vector<1x32x128xf32>
    %161 = vector.shape_cast %160 : vector<1x32x128xf32> to vector<32x128xf32>
    %cst_74 = arith.constant dense<0.000000e+00> : vector<32x128xf32>
    %162 = tpu.matmul %159, %161, %cst_74 {dimension_numbers = #tpu.dot_dimension_numbers<[1], [0], [0], [1], [0, 0, 1, 1], [], []>} : vector<32x32xf32>, vector<32x128xf32>, vector<32x128xf32> -> vector<32x128xf32>
    %c0_75 = arith.constant 0 : index
    %c0_76 = arith.constant 0 : index
    %c0_77 = arith.constant 0 : index
    %163 = vector.load %arg16[%c0_75, %c0_76, %c0_77] : memref<2x1x128xf32, #tpu.memory_space<vmem>>, vector<1x1x128xf32>
    %164 = vector.shape_cast %163 : vector<1x1x128xf32> to vector<1x128xf32>
    %165 = vector.broadcast %164 : vector<1x128xf32> to vector<32x128xf32>
    %166 = arith.addf %162, %165 : vector<32x128xf32>
    %cst_78 = arith.constant 5.000000e-01 : f32
    %167 = vector.broadcast %cst_78 : f32 to vector<32x128xf32>
    %168 = arith.mulf %167, %166 : vector<32x128xf32>
    %cst_79 = arith.constant 4.471500e-02 : f32
    %169 = vector.broadcast %cst_79 : f32 to vector<32x128xf32>
    %170 = arith.mulf %169, %166 : vector<32x128xf32>
    %171 = arith.mulf %170, %166 : vector<32x128xf32>
    %172 = arith.mulf %171, %166 : vector<32x128xf32>
    %173 = arith.addf %166, %172 : vector<32x128xf32>
    %cst_80 = arith.constant 0.797884583 : f32
    %174 = vector.broadcast %cst_80 : f32 to vector<32x128xf32>
    %175 = arith.mulf %174, %173 : vector<32x128xf32>
    %176 = math.tanh %175 : vector<32x128xf32>
    %cst_81 = arith.constant 1.000000e+00 : f32
    %177 = vector.broadcast %cst_81 : f32 to vector<32x128xf32>
    %178 = arith.addf %177, %176 : vector<32x128xf32>
    %179 = arith.mulf %168, %178 : vector<32x128xf32>
    %c0_82 = arith.constant 0 : index
    %c0_83 = arith.constant 0 : index
    %c0_84 = arith.constant 0 : index
    %180 = vector.load %arg17[%c0_82, %c0_83, %c0_84] : memref<2x128x32xf32, #tpu.memory_space<vmem>>, vector<1x128x32xf32>
    %181 = vector.shape_cast %180 : vector<1x128x32xf32> to vector<128x32xf32>
    %cst_85 = arith.constant dense<0.000000e+00> : vector<32x32xf32>
    %182 = tpu.matmul %179, %181, %cst_85 {dimension_numbers = #tpu.dot_dimension_numbers<[1], [0], [0], [1], [0, 0, 1, 1], [], []>} : vector<32x128xf32>, vector<128x32xf32>, vector<32x32xf32> -> vector<32x32xf32>
    %c0_86 = arith.constant 0 : index
    %c0_87 = arith.constant 0 : index
    %c0_88 = arith.constant 0 : index
    %183 = vector.load %arg18[%c0_86, %c0_87, %c0_88] : memref<2x1x32xf32, #tpu.memory_space<vmem>>, vector<1x1x32xf32>
    %184 = vector.shape_cast %183 : vector<1x1x32xf32> to vector<1x32xf32>
    %185 = vector.broadcast %184 : vector<1x32xf32> to vector<32x32xf32>
    %186 = arith.addf %182, %185 : vector<32x32xf32>
    %187 = arith.addf %159, %186 : vector<32x32xf32>
    %c0_89 = arith.constant 0 : index
    %c0_90 = arith.constant 0 : index
    %c0_91 = arith.constant 0 : index
    %188 = vector.load %arg19[%c0_89, %c0_90, %c0_91] : memref<2x1x32xf32, #tpu.memory_space<vmem>>, vector<1x1x32xf32>
    %189 = vector.shape_cast %188 : vector<1x1x32xf32> to vector<1x32xf32>
    %c0_92 = arith.constant 0 : index
    %c0_93 = arith.constant 0 : index
    %c0_94 = arith.constant 0 : index
    %190 = vector.load %arg20[%c0_92, %c0_93, %c0_94] : memref<2x1x32xf32, #tpu.memory_space<vmem>>, vector<1x1x32xf32>
    %191 = vector.shape_cast %190 : vector<1x1x32xf32> to vector<1x32xf32>
    %cst_95 = arith.constant dense<0.000000e+00> : vector<32xf32>
    %192 = vector.multi_reduction <add>, %187, %cst_95 [1] : vector<32x32xf32> to vector<32xf32>
    %193 = vector.shape_cast %192 : vector<32xf32> to vector<32x1xf32>
    %cst_96 = arith.constant 3.200000e+01 : f32
    %194 = vector.broadcast %cst_96 : f32 to vector<32x1xf32>
    %195 = arith.divf %193, %194 : vector<32x1xf32>
    %196 = vector.broadcast %195 : vector<32x1xf32> to vector<32x32xf32>
    %197 = arith.subf %187, %196 : vector<32x32xf32>
    %198 = arith.mulf %197, %197 : vector<32x32xf32>
    %cst_97 = arith.constant dense<0.000000e+00> : vector<32xf32>
    %199 = vector.multi_reduction <add>, %198, %cst_97 [1] : vector<32x32xf32> to vector<32xf32>
    %200 = vector.shape_cast %199 : vector<32xf32> to vector<32x1xf32>
    %cst_98 = arith.constant 3.200000e+01 : f32
    %201 = vector.broadcast %cst_98 : f32 to vector<32x1xf32>
    %202 = arith.divf %200, %201 : vector<32x1xf32>
    %cst_99 = arith.constant 9.99999974E-6 : f32
    %203 = vector.broadcast %cst_99 : f32 to vector<32x1xf32>
    %204 = arith.addf %202, %203 : vector<32x1xf32>
    %205 = math.rsqrt %204 : vector<32x1xf32>
    %206 = vector.broadcast %205 : vector<32x1xf32> to vector<32x32xf32>
    %207 = arith.mulf %197, %206 : vector<32x32xf32>
    %208 = vector.broadcast %189 : vector<1x32xf32> to vector<32x32xf32>
    %209 = arith.mulf %207, %208 : vector<32x32xf32>
    %210 = vector.broadcast %191 : vector<1x32xf32> to vector<32x32xf32>
    %211 = arith.addf %209, %210 : vector<32x32xf32>
    %c1 = arith.constant 1 : index
    %c0_100 = arith.constant 0 : index
    %c0_101 = arith.constant 0 : index
    %212 = vector.load %arg5[%c1, %c0_100, %c0_101] : memref<2x32x32xf32, #tpu.memory_space<vmem>>, vector<1x32x32xf32>
    %213 = vector.shape_cast %212 : vector<1x32x32xf32> to vector<32x32xf32>
    %cst_102 = arith.constant dense<0.000000e+00> : vector<32x32xf32>
    %214 = tpu.matmul %211, %213, %cst_102 {dimension_numbers = #tpu.dot_dimension_numbers<[1], [0], [0], [1], [0, 0, 1, 1], [], []>} : vector<32x32xf32>, vector<32x32xf32>, vector<32x32xf32> -> vector<32x32xf32>
    %c1_103 = arith.constant 1 : index
    %c0_104 = arith.constant 0 : index
    %c0_105 = arith.constant 0 : index
    %215 = vector.load %arg6[%c1_103, %c0_104, %c0_105] : memref<2x1x32xf32, #tpu.memory_space<vmem>>, vector<1x1x32xf32>
    %216 = vector.shape_cast %215 : vector<1x1x32xf32> to vector<1x32xf32>
    %217 = vector.broadcast %216 : vector<1x32xf32> to vector<32x32xf32>
    %218 = arith.addf %214, %217 : vector<32x32xf32>
    %c1_106 = arith.constant 1 : index
    %c0_107 = arith.constant 0 : index
    %c0_108 = arith.constant 0 : index
    %219 = vector.load %arg7[%c1_106, %c0_107, %c0_108] : memref<2x32x32xf32, #tpu.memory_space<vmem>>, vector<1x32x32xf32>
    %220 = vector.shape_cast %219 : vector<1x32x32xf32> to vector<32x32xf32>
    %cst_109 = arith.constant dense<0.000000e+00> : vector<32x32xf32>
    %221 = tpu.matmul %211, %220, %cst_109 {dimension_numbers = #tpu.dot_dimension_numbers<[1], [0], [0], [1], [0, 0, 1, 1], [], []>} : vector<32x32xf32>, vector<32x32xf32>, vector<32x32xf32> -> vector<32x32xf32>
    %c1_110 = arith.constant 1 : index
    %c0_111 = arith.constant 0 : index
    %c0_112 = arith.constant 0 : index
    %222 = vector.load %arg8[%c1_110, %c0_111, %c0_112] : memref<2x1x32xf32, #tpu.memory_space<vmem>>, vector<1x1x32xf32>
    %223 = vector.shape_cast %222 : vector<1x1x32xf32> to vector<1x32xf32>
    %224 = vector.broadcast %223 : vector<1x32xf32> to vector<32x32xf32>
    %225 = arith.addf %221, %224 : vector<32x32xf32>
    %c1_113 = arith.constant 1 : index
    %c0_114 = arith.constant 0 : index
    %c0_115 = arith.constant 0 : index
    %226 = vector.load %arg9[%c1_113, %c0_114, %c0_115] : memref<2x32x32xf32, #tpu.memory_space<vmem>>, vector<1x32x32xf32>
    %227 = vector.shape_cast %226 : vector<1x32x32xf32> to vector<32x32xf32>
    %cst_116 = arith.constant dense<0.000000e+00> : vector<32x32xf32>
    %228 = tpu.matmul %211, %227, %cst_116 {dimension_numbers = #tpu.dot_dimension_numbers<[1], [0], [0], [1], [0, 0, 1, 1], [], []>} : vector<32x32xf32>, vector<32x32xf32>, vector<32x32xf32> -> vector<32x32xf32>
    %c1_117 = arith.constant 1 : index
    %c0_118 = arith.constant 0 : index
    %c0_119 = arith.constant 0 : index
    %229 = vector.load %arg10[%c1_117, %c0_118, %c0_119] : memref<2x1x32xf32, #tpu.memory_space<vmem>>, vector<1x1x32xf32>
    %230 = vector.shape_cast %229 : vector<1x1x32xf32> to vector<1x32xf32>
    %231 = vector.broadcast %230 : vector<1x32xf32> to vector<32x32xf32>
    %232 = arith.addf %228, %231 : vector<32x32xf32>
    %233 = vector.shape_cast %218 : vector<32x32xf32> to vector<2x16x32xf32>
    %234 = vector.shape_cast %225 : vector<32x32xf32> to vector<2x16x32xf32>
    %235 = vector.shape_cast %232 : vector<32x32xf32> to vector<2x16x32xf32>
    %c1_120 = arith.constant 1 : index
    %c0_121 = arith.constant 0 : index
    %c0_122 = arith.constant 0 : index
    %236 = vector.load %arg11[%c1_120, %c0_121, %c0_122] : memref<2x32x32xf32, #tpu.memory_space<vmem>>, vector<1x32x32xf32>
    %237 = vector.shape_cast %236 : vector<1x32x32xf32> to vector<32x32xf32>
    %cst_123 = arith.constant 0.000000e+00 : f32
    %238 = vector.broadcast %cst_123 : f32 to vector<32x32xf32>
    %239 = vector.extract_strided_slice %233 {offsets = [0, 0, 0], sizes = [2, 16, 8], strides = [1, 1, 1]} : vector<2x16x32xf32> to vector<2x16x8xf32>
    %240 = vector.extract_strided_slice %234 {offsets = [0, 0, 0], sizes = [2, 16, 8], strides = [1, 1, 1]} : vector<2x16x32xf32> to vector<2x16x8xf32>
    %241 = vector.extract_strided_slice %235 {offsets = [0, 0, 0], sizes = [2, 16, 8], strides = [1, 1, 1]} : vector<2x16x32xf32> to vector<2x16x8xf32>
    "tpu.trace_start"() <{level = 10 : i32, message = "bqd,bkd->bqk"}> : () -> ()
    %cst_124 = arith.constant dense<0.000000e+00> : vector<2x16x16xf32>
    %242 = tpu.matmul %239, %240, %cst_124 {dimension_numbers = #tpu.dot_dimension_numbers<[2], [2], [1], [1], [0, 0, 0, 1, 1, 1], [0], [0]>} : vector<2x16x8xf32>, vector<2x16x8xf32>, vector<2x16x16xf32> -> vector<2x16x16xf32>
    "tpu.trace_stop"() : () -> ()
    %cst_125 = arith.constant dense<0xFF800000> : vector<2x16xf32>
    %243 = vector.multi_reduction <maximumf>, %242, %cst_125 [2] : vector<2x16x16xf32> to vector<2x16xf32>
    %244 = vector.shape_cast %243 : vector<2x16xf32> to vector<2x16x1xf32>
    %245 = vector.broadcast %244 : vector<2x16x1xf32> to vector<2x16x16xf32>
    %246 = arith.subf %242, %245 : vector<2x16x16xf32>
    %247 = math.exp %246 : vector<2x16x16xf32>
    %cst_126 = arith.constant dense<0.000000e+00> : vector<2x16xf32>
    %248 = vector.multi_reduction <add>, %247, %cst_126 [2] : vector<2x16x16xf32> to vector<2x16xf32>
    %249 = vector.shape_cast %248 : vector<2x16xf32> to vector<2x16x1xf32>
    %250 = tpu.reciprocal %249 {approx = true} : vector<2x16x1xf32> -> vector<2x16x1xf32>
    %251 = vector.broadcast %250 : vector<2x16x1xf32> to vector<2x16x16xf32>
    %252 = arith.mulf %247, %251 : vector<2x16x16xf32>
    "tpu.trace_start"() <{level = 10 : i32, message = "bqk,bkd->bqd"}> : () -> ()
    %cst_127 = arith.constant dense<0.000000e+00> : vector<2x16x8xf32>
    %253 = tpu.matmul %252, %241, %cst_127 {dimension_numbers = #tpu.dot_dimension_numbers<[2], [1], [1], [2], [0, 0, 0, 1, 1, 2], [0], [0]>} : vector<2x16x16xf32>, vector<2x16x8xf32>, vector<2x16x8xf32> -> vector<2x16x8xf32>
    "tpu.trace_stop"() : () -> ()
    %254 = vector.shape_cast %253 : vector<2x16x8xf32> to vector<32x8xf32>
    %255 = vector.extract_strided_slice %237 {offsets = [0, 0], sizes = [8, 32], strides = [1, 1]} : vector<32x32xf32> to vector<8x32xf32>
    %cst_128 = arith.constant dense<0.000000e+00> : vector<32x32xf32>
    %256 = tpu.matmul %254, %255, %cst_128 {dimension_numbers = #tpu.dot_dimension_numbers<[1], [0], [0], [1], [0, 0, 1, 1], [], []>} : vector<32x8xf32>, vector<8x32xf32>, vector<32x32xf32> -> vector<32x32xf32>
    %257 = arith.addf %238, %256 : vector<32x32xf32>
    %258 = vector.extract_strided_slice %233 {offsets = [0, 0, 8], sizes = [2, 16, 8], strides = [1, 1, 1]} : vector<2x16x32xf32> to vector<2x16x8xf32>
    %259 = vector.extract_strided_slice %234 {offsets = [0, 0, 8], sizes = [2, 16, 8], strides = [1, 1, 1]} : vector<2x16x32xf32> to vector<2x16x8xf32>
    %260 = vector.extract_strided_slice %235 {offsets = [0, 0, 8], sizes = [2, 16, 8], strides = [1, 1, 1]} : vector<2x16x32xf32> to vector<2x16x8xf32>
    "tpu.trace_start"() <{level = 10 : i32, message = "bqd,bkd->bqk"}> : () -> ()
    %cst_129 = arith.constant dense<0.000000e+00> : vector<2x16x16xf32>
    %261 = tpu.matmul %258, %259, %cst_129 {dimension_numbers = #tpu.dot_dimension_numbers<[2], [2], [1], [1], [0, 0, 0, 1, 1, 1], [0], [0]>} : vector<2x16x8xf32>, vector<2x16x8xf32>, vector<2x16x16xf32> -> vector<2x16x16xf32>
    "tpu.trace_stop"() : () -> ()
    %cst_130 = arith.constant dense<0xFF800000> : vector<2x16xf32>
    %262 = vector.multi_reduction <maximumf>, %261, %cst_130 [2] : vector<2x16x16xf32> to vector<2x16xf32>
    %263 = vector.shape_cast %262 : vector<2x16xf32> to vector<2x16x1xf32>
    %264 = vector.broadcast %263 : vector<2x16x1xf32> to vector<2x16x16xf32>
    %265 = arith.subf %261, %264 : vector<2x16x16xf32>
    %266 = math.exp %265 : vector<2x16x16xf32>
    %cst_131 = arith.constant dense<0.000000e+00> : vector<2x16xf32>
    %267 = vector.multi_reduction <add>, %266, %cst_131 [2] : vector<2x16x16xf32> to vector<2x16xf32>
    %268 = vector.shape_cast %267 : vector<2x16xf32> to vector<2x16x1xf32>
    %269 = tpu.reciprocal %268 {approx = true} : vector<2x16x1xf32> -> vector<2x16x1xf32>
    %270 = vector.broadcast %269 : vector<2x16x1xf32> to vector<2x16x16xf32>
    %271 = arith.mulf %266, %270 : vector<2x16x16xf32>
    "tpu.trace_start"() <{level = 10 : i32, message = "bqk,bkd->bqd"}> : () -> ()
    %cst_132 = arith.constant dense<0.000000e+00> : vector<2x16x8xf32>
    %272 = tpu.matmul %271, %260, %cst_132 {dimension_numbers = #tpu.dot_dimension_numbers<[2], [1], [1], [2], [0, 0, 0, 1, 1, 2], [0], [0]>} : vector<2x16x16xf32>, vector<2x16x8xf32>, vector<2x16x8xf32> -> vector<2x16x8xf32>
    "tpu.trace_stop"() : () -> ()
    %273 = vector.shape_cast %272 : vector<2x16x8xf32> to vector<32x8xf32>
    %274 = vector.extract_strided_slice %237 {offsets = [8, 0], sizes = [8, 32], strides = [1, 1]} : vector<32x32xf32> to vector<8x32xf32>
    %cst_133 = arith.constant dense<0.000000e+00> : vector<32x32xf32>
    %275 = tpu.matmul %273, %274, %cst_133 {dimension_numbers = #tpu.dot_dimension_numbers<[1], [0], [0], [1], [0, 0, 1, 1], [], []>} : vector<32x8xf32>, vector<8x32xf32>, vector<32x32xf32> -> vector<32x32xf32>
    %276 = arith.addf %257, %275 : vector<32x32xf32>
    %277 = vector.extract_strided_slice %233 {offsets = [0, 0, 16], sizes = [2, 16, 8], strides = [1, 1, 1]} : vector<2x16x32xf32> to vector<2x16x8xf32>
    %278 = vector.extract_strided_slice %234 {offsets = [0, 0, 16], sizes = [2, 16, 8], strides = [1, 1, 1]} : vector<2x16x32xf32> to vector<2x16x8xf32>
    %279 = vector.extract_strided_slice %235 {offsets = [0, 0, 16], sizes = [2, 16, 8], strides = [1, 1, 1]} : vector<2x16x32xf32> to vector<2x16x8xf32>
    "tpu.trace_start"() <{level = 10 : i32, message = "bqd,bkd->bqk"}> : () -> ()
    %cst_134 = arith.constant dense<0.000000e+00> : vector<2x16x16xf32>
    %280 = tpu.matmul %277, %278, %cst_134 {dimension_numbers = #tpu.dot_dimension_numbers<[2], [2], [1], [1], [0, 0, 0, 1, 1, 1], [0], [0]>} : vector<2x16x8xf32>, vector<2x16x8xf32>, vector<2x16x16xf32> -> vector<2x16x16xf32>
    "tpu.trace_stop"() : () -> ()
    %cst_135 = arith.constant dense<0xFF800000> : vector<2x16xf32>
    %281 = vector.multi_reduction <maximumf>, %280, %cst_135 [2] : vector<2x16x16xf32> to vector<2x16xf32>
    %282 = vector.shape_cast %281 : vector<2x16xf32> to vector<2x16x1xf32>
    %283 = vector.broadcast %282 : vector<2x16x1xf32> to vector<2x16x16xf32>
    %284 = arith.subf %280, %283 : vector<2x16x16xf32>
    %285 = math.exp %284 : vector<2x16x16xf32>
    %cst_136 = arith.constant dense<0.000000e+00> : vector<2x16xf32>
    %286 = vector.multi_reduction <add>, %285, %cst_136 [2] : vector<2x16x16xf32> to vector<2x16xf32>
    %287 = vector.shape_cast %286 : vector<2x16xf32> to vector<2x16x1xf32>
    %288 = tpu.reciprocal %287 {approx = true} : vector<2x16x1xf32> -> vector<2x16x1xf32>
    %289 = vector.broadcast %288 : vector<2x16x1xf32> to vector<2x16x16xf32>
    %290 = arith.mulf %285, %289 : vector<2x16x16xf32>
    "tpu.trace_start"() <{level = 10 : i32, message = "bqk,bkd->bqd"}> : () -> ()
    %cst_137 = arith.constant dense<0.000000e+00> : vector<2x16x8xf32>
    %291 = tpu.matmul %290, %279, %cst_137 {dimension_numbers = #tpu.dot_dimension_numbers<[2], [1], [1], [2], [0, 0, 0, 1, 1, 2], [0], [0]>} : vector<2x16x16xf32>, vector<2x16x8xf32>, vector<2x16x8xf32> -> vector<2x16x8xf32>
    "tpu.trace_stop"() : () -> ()
    %292 = vector.shape_cast %291 : vector<2x16x8xf32> to vector<32x8xf32>
    %293 = vector.extract_strided_slice %237 {offsets = [16, 0], sizes = [8, 32], strides = [1, 1]} : vector<32x32xf32> to vector<8x32xf32>
    %cst_138 = arith.constant dense<0.000000e+00> : vector<32x32xf32>
    %294 = tpu.matmul %292, %293, %cst_138 {dimension_numbers = #tpu.dot_dimension_numbers<[1], [0], [0], [1], [0, 0, 1, 1], [], []>} : vector<32x8xf32>, vector<8x32xf32>, vector<32x32xf32> -> vector<32x32xf32>
    %295 = arith.addf %276, %294 : vector<32x32xf32>
    %296 = vector.extract_strided_slice %233 {offsets = [0, 0, 24], sizes = [2, 16, 8], strides = [1, 1, 1]} : vector<2x16x32xf32> to vector<2x16x8xf32>
    %297 = vector.extract_strided_slice %234 {offsets = [0, 0, 24], sizes = [2, 16, 8], strides = [1, 1, 1]} : vector<2x16x32xf32> to vector<2x16x8xf32>
    %298 = vector.extract_strided_slice %235 {offsets = [0, 0, 24], sizes = [2, 16, 8], strides = [1, 1, 1]} : vector<2x16x32xf32> to vector<2x16x8xf32>
    "tpu.trace_start"() <{level = 10 : i32, message = "bqd,bkd->bqk"}> : () -> ()
    %cst_139 = arith.constant dense<0.000000e+00> : vector<2x16x16xf32>
    %299 = tpu.matmul %296, %297, %cst_139 {dimension_numbers = #tpu.dot_dimension_numbers<[2], [2], [1], [1], [0, 0, 0, 1, 1, 1], [0], [0]>} : vector<2x16x8xf32>, vector<2x16x8xf32>, vector<2x16x16xf32> -> vector<2x16x16xf32>
    "tpu.trace_stop"() : () -> ()
    %cst_140 = arith.constant dense<0xFF800000> : vector<2x16xf32>
    %300 = vector.multi_reduction <maximumf>, %299, %cst_140 [2] : vector<2x16x16xf32> to vector<2x16xf32>
    %301 = vector.shape_cast %300 : vector<2x16xf32> to vector<2x16x1xf32>
    %302 = vector.broadcast %301 : vector<2x16x1xf32> to vector<2x16x16xf32>
    %303 = arith.subf %299, %302 : vector<2x16x16xf32>
    %304 = math.exp %303 : vector<2x16x16xf32>
    %cst_141 = arith.constant dense<0.000000e+00> : vector<2x16xf32>
    %305 = vector.multi_reduction <add>, %304, %cst_141 [2] : vector<2x16x16xf32> to vector<2x16xf32>
    %306 = vector.shape_cast %305 : vector<2x16xf32> to vector<2x16x1xf32>
    %307 = tpu.reciprocal %306 {approx = true} : vector<2x16x1xf32> -> vector<2x16x1xf32>
    %308 = vector.broadcast %307 : vector<2x16x1xf32> to vector<2x16x16xf32>
    %309 = arith.mulf %304, %308 : vector<2x16x16xf32>
    "tpu.trace_start"() <{level = 10 : i32, message = "bqk,bkd->bqd"}> : () -> ()
    %cst_142 = arith.constant dense<0.000000e+00> : vector<2x16x8xf32>
    %310 = tpu.matmul %309, %298, %cst_142 {dimension_numbers = #tpu.dot_dimension_numbers<[2], [1], [1], [2], [0, 0, 0, 1, 1, 2], [0], [0]>} : vector<2x16x16xf32>, vector<2x16x8xf32>, vector<2x16x8xf32> -> vector<2x16x8xf32>
    "tpu.trace_stop"() : () -> ()
    %311 = vector.shape_cast %310 : vector<2x16x8xf32> to vector<32x8xf32>
    %312 = vector.extract_strided_slice %237 {offsets = [24, 0], sizes = [8, 32], strides = [1, 1]} : vector<32x32xf32> to vector<8x32xf32>
    %cst_143 = arith.constant dense<0.000000e+00> : vector<32x32xf32>
    %313 = tpu.matmul %311, %312, %cst_143 {dimension_numbers = #tpu.dot_dimension_numbers<[1], [0], [0], [1], [0, 0, 1, 1], [], []>} : vector<32x8xf32>, vector<8x32xf32>, vector<32x32xf32> -> vector<32x32xf32>
    %314 = arith.addf %295, %313 : vector<32x32xf32>
    %c1_144 = arith.constant 1 : index
    %c0_145 = arith.constant 0 : index
    %c0_146 = arith.constant 0 : index
    %315 = vector.load %arg12[%c1_144, %c0_145, %c0_146] : memref<2x1x32xf32, #tpu.memory_space<vmem>>, vector<1x1x32xf32>
    %316 = vector.shape_cast %315 : vector<1x1x32xf32> to vector<1x32xf32>
    %317 = vector.broadcast %316 : vector<1x32xf32> to vector<32x32xf32>
    %318 = arith.addf %314, %317 : vector<32x32xf32>
    %319 = arith.addf %211, %318 : vector<32x32xf32>
    %c1_147 = arith.constant 1 : index
    %c0_148 = arith.constant 0 : index
    %c0_149 = arith.constant 0 : index
    %320 = vector.load %arg13[%c1_147, %c0_148, %c0_149] : memref<2x1x32xf32, #tpu.memory_space<vmem>>, vector<1x1x32xf32>
    %321 = vector.shape_cast %320 : vector<1x1x32xf32> to vector<1x32xf32>
    %c1_150 = arith.constant 1 : index
    %c0_151 = arith.constant 0 : index
    %c0_152 = arith.constant 0 : index
    %322 = vector.load %arg14[%c1_150, %c0_151, %c0_152] : memref<2x1x32xf32, #tpu.memory_space<vmem>>, vector<1x1x32xf32>
    %323 = vector.shape_cast %322 : vector<1x1x32xf32> to vector<1x32xf32>
    %cst_153 = arith.constant dense<0.000000e+00> : vector<32xf32>
    %324 = vector.multi_reduction <add>, %319, %cst_153 [1] : vector<32x32xf32> to vector<32xf32>
    %325 = vector.shape_cast %324 : vector<32xf32> to vector<32x1xf32>
    %cst_154 = arith.constant 3.200000e+01 : f32
    %326 = vector.broadcast %cst_154 : f32 to vector<32x1xf32>
    %327 = arith.divf %325, %326 : vector<32x1xf32>
    %328 = vector.broadcast %327 : vector<32x1xf32> to vector<32x32xf32>
    %329 = arith.subf %319, %328 : vector<32x32xf32>
    %330 = arith.mulf %329, %329 : vector<32x32xf32>
    %cst_155 = arith.constant dense<0.000000e+00> : vector<32xf32>
    %331 = vector.multi_reduction <add>, %330, %cst_155 [1] : vector<32x32xf32> to vector<32xf32>
    %332 = vector.shape_cast %331 : vector<32xf32> to vector<32x1xf32>
    %cst_156 = arith.constant 3.200000e+01 : f32
    %333 = vector.broadcast %cst_156 : f32 to vector<32x1xf32>
    %334 = arith.divf %332, %333 : vector<32x1xf32>
    %cst_157 = arith.constant 9.99999974E-6 : f32
    %335 = vector.broadcast %cst_157 : f32 to vector<32x1xf32>
    %336 = arith.addf %334, %335 : vector<32x1xf32>
    %337 = math.rsqrt %336 : vector<32x1xf32>
    %338 = vector.broadcast %337 : vector<32x1xf32> to vector<32x32xf32>
    %339 = arith.mulf %329, %338 : vector<32x32xf32>
    %340 = vector.broadcast %321 : vector<1x32xf32> to vector<32x32xf32>
    %341 = arith.mulf %339, %340 : vector<32x32xf32>
    %342 = vector.broadcast %323 : vector<1x32xf32> to vector<32x32xf32>
    %343 = arith.addf %341, %342 : vector<32x32xf32>
    %c1_158 = arith.constant 1 : index
    %c0_159 = arith.constant 0 : index
    %c0_160 = arith.constant 0 : index
    %344 = vector.load %arg15[%c1_158, %c0_159, %c0_160] : memref<2x32x128xf32, #tpu.memory_space<vmem>>, vector<1x32x128xf32>
    %345 = vector.shape_cast %344 : vector<1x32x128xf32> to vector<32x128xf32>
    %cst_161 = arith.constant dense<0.000000e+00> : vector<32x128xf32>
    %346 = tpu.matmul %343, %345, %cst_161 {dimension_numbers = #tpu.dot_dimension_numbers<[1], [0], [0], [1], [0, 0, 1, 1], [], []>} : vector<32x32xf32>, vector<32x128xf32>, vector<32x128xf32> -> vector<32x128xf32>
    %c1_162 = arith.constant 1 : index
    %c0_163 = arith.constant 0 : index
    %c0_164 = arith.constant 0 : index
    %347 = vector.load %arg16[%c1_162, %c0_163, %c0_164] : memref<2x1x128xf32, #tpu.memory_space<vmem>>, vector<1x1x128xf32>
    %348 = vector.shape_cast %347 : vector<1x1x128xf32> to vector<1x128xf32>
    %349 = vector.broadcast %348 : vector<1x128xf32> to vector<32x128xf32>
    %350 = arith.addf %346, %349 : vector<32x128xf32>
    %cst_165 = arith.constant 5.000000e-01 : f32
    %351 = vector.broadcast %cst_165 : f32 to vector<32x128xf32>
    %352 = arith.mulf %351, %350 : vector<32x128xf32>
    %cst_166 = arith.constant 4.471500e-02 : f32
    %353 = vector.broadcast %cst_166 : f32 to vector<32x128xf32>
    %354 = arith.mulf %353, %350 : vector<32x128xf32>
    %355 = arith.mulf %354, %350 : vector<32x128xf32>
    %356 = arith.mulf %355, %350 : vector<32x128xf32>
    %357 = arith.addf %350, %356 : vector<32x128xf32>
    %cst_167 = arith.constant 0.797884583 : f32
    %358 = vector.broadcast %cst_167 : f32 to vector<32x128xf32>
    %359 = arith.mulf %358, %357 : vector<32x128xf32>
    %360 = math.tanh %359 : vector<32x128xf32>
    %cst_168 = arith.constant 1.000000e+00 : f32
    %361 = vector.broadcast %cst_168 : f32 to vector<32x128xf32>
    %362 = arith.addf %361, %360 : vector<32x128xf32>
    %363 = arith.mulf %352, %362 : vector<32x128xf32>
    %c1_169 = arith.constant 1 : index
    %c0_170 = arith.constant 0 : index
    %c0_171 = arith.constant 0 : index
    %364 = vector.load %arg17[%c1_169, %c0_170, %c0_171] : memref<2x128x32xf32, #tpu.memory_space<vmem>>, vector<1x128x32xf32>
    %365 = vector.shape_cast %364 : vector<1x128x32xf32> to vector<128x32xf32>
    %cst_172 = arith.constant dense<0.000000e+00> : vector<32x32xf32>
    %366 = tpu.matmul %363, %365, %cst_172 {dimension_numbers = #tpu.dot_dimension_numbers<[1], [0], [0], [1], [0, 0, 1, 1], [], []>} : vector<32x128xf32>, vector<128x32xf32>, vector<32x32xf32> -> vector<32x32xf32>
    %c1_173 = arith.constant 1 : index
    %c0_174 = arith.constant 0 : index
    %c0_175 = arith.constant 0 : index
    %367 = vector.load %arg18[%c1_173, %c0_174, %c0_175] : memref<2x1x32xf32, #tpu.memory_space<vmem>>, vector<1x1x32xf32>
    %368 = vector.shape_cast %367 : vector<1x1x32xf32> to vector<1x32xf32>
    %369 = vector.broadcast %368 : vector<1x32xf32> to vector<32x32xf32>
    %370 = arith.addf %366, %369 : vector<32x32xf32>
    %371 = arith.addf %343, %370 : vector<32x32xf32>
    %c1_176 = arith.constant 1 : index
    %c0_177 = arith.constant 0 : index
    %c0_178 = arith.constant 0 : index
    %372 = vector.load %arg19[%c1_176, %c0_177, %c0_178] : memref<2x1x32xf32, #tpu.memory_space<vmem>>, vector<1x1x32xf32>
    %373 = vector.shape_cast %372 : vector<1x1x32xf32> to vector<1x32xf32>
    %c1_179 = arith.constant 1 : index
    %c0_180 = arith.constant 0 : index
    %c0_181 = arith.constant 0 : index
    %374 = vector.load %arg20[%c1_179, %c0_180, %c0_181] : memref<2x1x32xf32, #tpu.memory_space<vmem>>, vector<1x1x32xf32>
    %375 = vector.shape_cast %374 : vector<1x1x32xf32> to vector<1x32xf32>
    %cst_182 = arith.constant dense<0.000000e+00> : vector<32xf32>
    %376 = vector.multi_reduction <add>, %371, %cst_182 [1] : vector<32x32xf32> to vector<32xf32>
    %377 = vector.shape_cast %376 : vector<32xf32> to vector<32x1xf32>
    %cst_183 = arith.constant 3.200000e+01 : f32
    %378 = vector.broadcast %cst_183 : f32 to vector<32x1xf32>
    %379 = arith.divf %377, %378 : vector<32x1xf32>
    %380 = vector.broadcast %379 : vector<32x1xf32> to vector<32x32xf32>
    %381 = arith.subf %371, %380 : vector<32x32xf32>
    %382 = arith.mulf %381, %381 : vector<32x32xf32>
    %cst_184 = arith.constant dense<0.000000e+00> : vector<32xf32>
    %383 = vector.multi_reduction <add>, %382, %cst_184 [1] : vector<32x32xf32> to vector<32xf32>
    %384 = vector.shape_cast %383 : vector<32xf32> to vector<32x1xf32>
    %cst_185 = arith.constant 3.200000e+01 : f32
    %385 = vector.broadcast %cst_185 : f32 to vector<32x1xf32>
    %386 = arith.divf %384, %385 : vector<32x1xf32>
    %cst_186 = arith.constant 9.99999974E-6 : f32
    %387 = vector.broadcast %cst_186 : f32 to vector<32x1xf32>
    %388 = arith.addf %386, %387 : vector<32x1xf32>
    %389 = math.rsqrt %388 : vector<32x1xf32>
    %390 = vector.broadcast %389 : vector<32x1xf32> to vector<32x32xf32>
    %391 = arith.mulf %381, %390 : vector<32x32xf32>
    %392 = vector.broadcast %373 : vector<1x32xf32> to vector<32x32xf32>
    %393 = arith.mulf %391, %392 : vector<32x32xf32>
    %394 = vector.broadcast %375 : vector<1x32xf32> to vector<32x32xf32>
    %395 = arith.addf %393, %394 : vector<32x32xf32>
    %c0_187 = arith.constant 0 : index
    %c0_188 = arith.constant 0 : index
    %396 = vector.load %arg21[%c0_187, %c0_188] : memref<1x32xf32, #tpu.memory_space<vmem>>, vector<1x32xf32>
    %c0_189 = arith.constant 0 : index
    %c0_190 = arith.constant 0 : index
    %397 = vector.load %arg22[%c0_189, %c0_190] : memref<1x32xf32, #tpu.memory_space<vmem>>, vector<1x32xf32>
    %cst_191 = arith.constant dense<0.000000e+00> : vector<32xf32>
    %398 = vector.multi_reduction <add>, %395, %cst_191 [1] : vector<32x32xf32> to vector<32xf32>
    %399 = vector.shape_cast %398 : vector<32xf32> to vector<32x1xf32>
    %cst_192 = arith.constant 3.200000e+01 : f32
    %400 = vector.broadcast %cst_192 : f32 to vector<32x1xf32>
    %401 = arith.divf %399, %400 : vector<32x1xf32>
    %402 = vector.broadcast %401 : vector<32x1xf32> to vector<32x32xf32>
    %403 = arith.subf %395, %402 : vector<32x32xf32>
    %404 = arith.mulf %403, %403 : vector<32x32xf32>
    %cst_193 = arith.constant dense<0.000000e+00> : vector<32xf32>
    %405 = vector.multi_reduction <add>, %404, %cst_193 [1] : vector<32x32xf32> to vector<32xf32>
    %406 = vector.shape_cast %405 : vector<32xf32> to vector<32x1xf32>
    %cst_194 = arith.constant 3.200000e+01 : f32
    %407 = vector.broadcast %cst_194 : f32 to vector<32x1xf32>
    %408 = arith.divf %406, %407 : vector<32x1xf32>
    %cst_195 = arith.constant 9.99999974E-6 : f32
    %409 = vector.broadcast %cst_195 : f32 to vector<32x1xf32>
    %410 = arith.addf %408, %409 : vector<32x1xf32>
    %411 = math.rsqrt %410 : vector<32x1xf32>
    %412 = vector.broadcast %411 : vector<32x1xf32> to vector<32x32xf32>
    %413 = arith.mulf %403, %412 : vector<32x32xf32>
    %414 = vector.broadcast %396 : vector<1x32xf32> to vector<32x32xf32>
    %415 = arith.mulf %413, %414 : vector<32x32xf32>
    %416 = vector.broadcast %397 : vector<1x32xf32> to vector<32x32xf32>
    %417 = arith.addf %415, %416 : vector<32x32xf32>
    %c0_196 = arith.constant 0 : index
    %c0_197 = arith.constant 0 : index
    %418 = vector.load %arg23[%c0_196, %c0_197] : memref<32x128xf32, #tpu.memory_space<vmem>>, vector<32x128xf32>
    %cst_198 = arith.constant dense<0.000000e+00> : vector<32x128xf32>
    %419 = tpu.matmul %417, %418, %cst_198 {dimension_numbers = #tpu.dot_dimension_numbers<[1], [0], [0], [1], [0, 0, 1, 1], [], []>} : vector<32x32xf32>, vector<32x128xf32>, vector<32x128xf32> -> vector<32x128xf32>
    %c0_199 = arith.constant 0 : index
    %c0_200 = arith.constant 0 : index
    %420 = vector.load %arg24[%c0_199, %c0_200] : memref<1x128xf32, #tpu.memory_space<vmem>>, vector<1x128xf32>
    %421 = vector.broadcast %420 : vector<1x128xf32> to vector<32x128xf32>
    %422 = arith.addf %419, %421 : vector<32x128xf32>
    %423 = vector.shape_cast %422 : vector<32x128xf32> to vector<2x16x128xf32>
    %c0_201 = arith.constant 0 : index
    %c0_202 = arith.constant 0 : index
    %c0_203 = arith.constant 0 : index
    %424 = vector.load %arg25[%c0_201, %c0_202, %c0_203] : memref<2x16x128xf32, #tpu.memory_space<vmem>>, vector<2x16x128xf32>
    tpu.vector_store %arg25[%c0_201, %c0_202, %c0_203], %423 {strides = array<i32>} : memref<2x16x128xf32, #tpu.memory_space<vmem>>, vector<2x16x128xf32>,
    return
  }
  func.func @transform_0(%arg0: i32) -> (i32, i32, i32) {
    %c0_i32 = arith.constant 0 : i32
    %c0_i32_0 = arith.constant 0 : i32
    %c0_i32_1 = arith.constant 0 : i32
    return %arg0, %c0_i32, %c0_i32_0 : i32, i32, i32
  }
  func.func @transform_1(%arg0: i32) -> (i32, i32) {
    %c0_i32 = arith.constant 0 : i32
    %c0_i32_0 = arith.constant 0 : i32
    %c0_i32_1 = arith.constant 0 : i32
    return %c0_i32, %c0_i32_0 : i32, i32
  }
  func.func @transform_2(%arg0: i32) -> (i32, i32) {
    %c0_i32 = arith.constant 0 : i32
    %c0_i32_0 = arith.constant 0 : i32
    %c0_i32_1 = arith.constant 0 : i32
    return %c0_i32, %c0_i32_0 : i32, i32
  }
  func.func @transform_3(%arg0: i32) -> (i32, i32) {
    %c0_i32 = arith.constant 0 : i32
    %c0_i32_0 = arith.constant 0 : i32
    %c0_i32_1 = arith.constant 0 : i32
    return %c0_i32, %c0_i32_0 : i32, i32
  }
  func.func @transform_4(%arg0: i32) -> (i32, i32, i32) {
    %c0_i32 = arith.constant 0 : i32
    %c0_i32_0 = arith.constant 0 : i32
    %c0_i32_1 = arith.constant 0 : i32
    %c0_i32_2 = arith.constant 0 : i32
    return %c0_i32, %c0_i32_0, %c0_i32_1 : i32, i32, i32
  }
  func.func @transform_5(%arg0: i32) -> (i32, i32, i32) {
    %c0_i32 = arith.constant 0 : i32
    %c0_i32_0 = arith.constant 0 : i32
    %c0_i32_1 = arith.constant 0 : i32
    %c0_i32_2 = arith.constant 0 : i32
    return %c0_i32, %c0_i32_0, %c0_i32_1 : i32, i32, i32
  }
  func.func @transform_6(%arg0: i32) -> (i32, i32, i32) {
    %c0_i32 = arith.constant 0 : i32
    %c0_i32_0 = arith.constant 0 : i32
    %c0_i32_1 = arith.constant 0 : i32
    %c0_i32_2 = arith.constant 0 : i32
    return %c0_i32, %c0_i32_0, %c0_i32_1 : i32, i32, i32
  }
  func.func @transform_7(%arg0: i32) -> (i32, i32, i32) {
    %c0_i32 = arith.constant 0 : i32
    %c0_i32_0 = arith.constant 0 : i32
    %c0_i32_1 = arith.constant 0 : i32
    %c0_i32_2 = arith.constant 0 : i32
    return %c0_i32, %c0_i32_0, %c0_i32_1 : i32, i32, i32
  }
  func.func @transform_8(%arg0: i32) -> (i32, i32, i32) {
    %c0_i32 = arith.constant 0 : i32
    %c0_i32_0 = arith.constant 0 : i32
    %c0_i32_1 = arith.constant 0 : i32
    %c0_i32_2 = arith.constant 0 : i32
    return %c0_i32, %c0_i32_0, %c0_i32_1 : i32, i32, i32
  }
  func.func @transform_9(%arg0: i32) -> (i32, i32, i32) {
    %c0_i32 = arith.constant 0 : i32
    %c0_i32_0 = arith.constant 0 : i32
    %c0_i32_1 = arith.constant 0 : i32
    %c0_i32_2 = arith.constant 0 : i32
    return %c0_i32, %c0_i32_0, %c0_i32_1 : i32, i32, i32
  }
  func.func @transform_10(%arg0: i32) -> (i32, i32, i32) {
    %c0_i32 = arith.constant 0 : i32
    %c0_i32_0 = arith.constant 0 : i32
    %c0_i32_1 = arith.constant 0 : i32
    %c0_i32_2 = arith.constant 0 : i32
    return %c0_i32, %c0_i32_0, %c0_i32_1 : i32, i32, i32
  }
  func.func @transform_11(%arg0: i32) -> (i32, i32, i32) {
    %c0_i32 = arith.constant 0 : i32
    %c0_i32_0 = arith.constant 0 : i32
    %c0_i32_1 = arith.constant 0 : i32
    %c0_i32_2 = arith.constant 0 : i32
    return %c0_i32, %c0_i32_0, %c0_i32_1 : i32, i32, i32
  }
  func.func @transform_12(%arg0: i32) -> (i32, i32, i32) {
    %c0_i32 = arith.constant 0 : i32
    %c0_i32_0 = arith.constant 0 : i32
    %c0_i32_1 = arith.constant 0 : i32
    %c0_i32_2 = arith.constant 0 : i32
    return %c0_i32, %c0_i32_0, %c0_i32_1 : i32, i32, i32
  }
  func.func @transform_13(%arg0: i32) -> (i32, i32, i32) {
    %c0_i32 = arith.constant 0 : i32
    %c0_i32_0 = arith.constant 0 : i32
    %c0_i32_1 = arith.constant 0 : i32
    %c0_i32_2 = arith.constant 0 : i32
    return %c0_i32, %c0_i32_0, %c0_i32_1 : i32, i32, i32
  }
  func.func @transform_14(%arg0: i32) -> (i32, i32, i32) {
    %c0_i32 = arith.constant 0 : i32
    %c0_i32_0 = arith.constant 0 : i32
    %c0_i32_1 = arith.constant 0 : i32
    %c0_i32_2 = arith.constant 0 : i32
    return %c0_i32, %c0_i32_0, %c0_i32_1 : i32, i32, i32
  }
  func.func @transform_15(%arg0: i32) -> (i32, i32, i32) {
    %c0_i32 = arith.constant 0 : i32
    %c0_i32_0 = arith.constant 0 : i32
    %c0_i32_1 = arith.constant 0 : i32
    %c0_i32_2 = arith.constant 0 : i32
    return %c0_i32, %c0_i32_0, %c0_i32_1 : i32, i32, i32
  }
  func.func @transform_16(%arg0: i32) -> (i32, i32, i32) {
    %c0_i32 = arith.constant 0 : i32
    %c0_i32_0 = arith.constant 0 : i32
    %c0_i32_1 = arith.constant 0 : i32
    %c0_i32_2 = arith.constant 0 : i32
    return %c0_i32, %c0_i32_0, %c0_i32_1 : i32, i32, i32
  }
  func.func @transform_17(%arg0: i32) -> (i32, i32, i32) {
    %c0_i32 = arith.constant 0 : i32
    %c0_i32_0 = arith.constant 0 : i32
    %c0_i32_1 = arith.constant 0 : i32
    %c0_i32_2 = arith.constant 0 : i32
    return %c0_i32, %c0_i32_0, %c0_i32_1 : i32, i32, i32
  }
  func.func @transform_18(%arg0: i32) -> (i32, i32, i32) {
    %c0_i32 = arith.constant 0 : i32
    %c0_i32_0 = arith.constant 0 : i32
    %c0_i32_1 = arith.constant 0 : i32
    %c0_i32_2 = arith.constant 0 : i32
    return %c0_i32, %c0_i32_0, %c0_i32_1 : i32, i32, i32
  }
  func.func @transform_19(%arg0: i32) -> (i32, i32, i32) {
    %c0_i32 = arith.constant 0 : i32
    %c0_i32_0 = arith.constant 0 : i32
    %c0_i32_1 = arith.constant 0 : i32
    %c0_i32_2 = arith.constant 0 : i32
    return %c0_i32, %c0_i32_0, %c0_i32_1 : i32, i32, i32
  }
  func.func @transform_20(%arg0: i32) -> (i32, i32) {
    %c0_i32 = arith.constant 0 : i32
    %c0_i32_0 = arith.constant 0 : i32
    %c0_i32_1 = arith.constant 0 : i32
    return %c0_i32, %c0_i32_0 : i32, i32
  }
  func.func @transform_21(%arg0: i32) -> (i32, i32) {
    %c0_i32 = arith.constant 0 : i32
    %c0_i32_0 = arith.constant 0 : i32
    %c0_i32_1 = arith.constant 0 : i32
    return %c0_i32, %c0_i32_0 : i32, i32
  }
  func.func @transform_22(%arg0: i32) -> (i32, i32) {
    %c0_i32 = arith.constant 0 : i32
    %c0_i32_0 = arith.constant 0 : i32
    %c0_i32_1 = arith.constant 0 : i32
    return %c0_i32, %c0_i32_0 : i32, i32
  }
  func.func @transform_23(%arg0: i32) -> (i32, i32) {
    %c0_i32 = arith.constant 0 : i32
    %c0_i32_0 = arith.constant 0 : i32
    %c0_i32_1 = arith.constant 0 : i32
    return %c0_i32, %c0_i32_0 : i32, i32
  }
  func.func @transform_24(%arg0: i32) -> (i32, i32, i32) {
    %c0_i32 = arith.constant 0 : i32
    %c0_i32_0 = arith.constant 0 : i32
    %c0_i32_1 = arith.constant 0 : i32
    return %arg0, %c0_i32, %c0_i32_0 : i32, i32, i32
  }
}

</mosaic_0001>

<bundles_post_ra>
// kernel: tpu_custom_call.1
= control target key start
LH: loop header
LB: loop body
LE: loop exit
PB: predicated region body
PF: predicated region fallthrough
CT: control target
= control target key end

     0   :  { %s9759_s0 = inlined_call_operand.vmem [shape: f32[4,16,32], index: 0, kind: input, shape index: {}]   ;;  %s9760_s1 = inlined_call_operand.hbm [shape: f32[16,32], index: 1, kind: input, shape index: {}]   ;;  %s9761_s2 = inlined_call_operand.vmem [shape: f32[1,32], index: 2, kind: input, shape index: {}]   ;;  %s9762_s3 = inlined_call_operand.hbm [shape: f32[1,32], index: 3, kind: input, shape index: {}]   ;;  %s9763_s4 = inlined_call_operand.vmem [shape: f32[2,32,32], index: 4, kind: input, shape index: {}]   ;;  %s9764_s5 = inlined_call_operand.vmem [shape: f32[2,1,32], index: 5, kind: input, shape index: {}]   ;;  %s9765_s6 = inlined_call_operand.vmem [shape: f32[2,32,32], index: 6, kind: input, shape index: {}]   ;;  %s9766_s7 = inlined_call_operand.vmem [shape: f32[2,1,32], index: 7, kind: input, shape index: {}]   ;;  %s9767_s8 = inlined_call_operand.vmem [shape: f32[2,32,32], index: 8, kind: input, shape index: {}]   ;;  %s9768_s9 = inlined_call_operand.hbm [shape: f32[2,1,32], index: 9, kind: input, shape index: {}]   ;;  %s9769_s10 = inlined_call_operand.vmem [shape: f32[2,32,32], index: 10, kind: input, shape index: {}]   ;;  %s9770_s11 = inlined_call_operand.vmem [shape: f32[2,1,32], index: 11, kind: input, shape index: {}]   ;;  %s9771_s12 = inlined_call_operand.vmem [shape: f32[2,1,32], index: 12, kind: input, shape index: {}]   ;;  %s9772_s13 = inlined_call_operand.vmem [shape: f32[2,1,32], index: 13, kind: input, shape index: {}]   ;;  %s9773_s14 = inlined_call_operand.hbm [shape: f32[2,32,128], index: 14, kind: input, shape index: {}]   ;;  %s9774_s15 = inlined_call_operand.vmem [shape: f32[2,1,128], index: 15, kind: input, shape index: {}]   ;;  %s9775_s16 = inlined_call_operand.vmem [shape: f32[2,128,32], index: 16, kind: input, shape index: {}]   ;;  %s9776_s17 = inlined_call_operand.vmem [shape: f32[2,1,32], index: 17, kind: input, shape index: {}]   ;;  %s9777_s18 = inlined_call_operand.vmem [shape: f32[2,1,32], index: 18, kind: input, shape index: {}]   ;;  %s9778_s19 = inlined_call_operand.vmem [shape: f32[2,1,32], index: 19, kind: input, shape index: {}]   ;;  %s9779_s20 = inlined_call_operand.vmem [shape: f32[1,32], index: 20, kind: input, shape index: {}]   ;;  %s9780_s21 = inlined_call_operand.vmem [shape: f32[1,32], index: 21, kind: input, shape index: {}]   ;;  %s9781_s22 = inlined_call_operand.vmem [shape: f32[32,128], index: 22, kind: input, shape index: {}]   ;;  %s9782_s23 = inlined_call_operand.vmem [shape: f32[1,128], index: 23, kind: input, shape index: {}]   ;;  %s9783_s24 = inlined_call_operand.hbm [shape: f32[4,16,128], index: 24, kind: output, shape index: {}]  }
   0x1   :  { %9811 = sst [smem:[#allocation23_spill]] %s9759_s0 }
   0x2   :  { %9812 = sst [smem:[#allocation24_spill]] %s9760_s1 }
   0x3   :  { %9813 = sst [smem:[#allocation25_spill]] %s9761_s2 }
   0x4   :  { %9814 = sst [smem:[#allocation26_spill]] %s9762_s3 }
   0x5   :  { %9815 = sst [smem:[#allocation27_spill]] %s9763_s4 }
   0x6   :  { %9816 = sst [smem:[#allocation28_spill]] %s9764_s5 }
   0x7   :  { %9817 = sst [smem:[#allocation29_spill]] %s9765_s6 }
   0x8   :  { %9818 = sst [smem:[#allocation30_spill]] %s9766_s7 }
   0x9   :  { %9819 = sst [smem:[#allocation31_spill]] %s9767_s8 }
   0xa   :  { %9820 = sst [smem:[#allocation32_spill]] %s9780_s21 }
   0xb   :  { %9821 = sst [smem:[#allocation33_spill]] %s9782_s23 }
   0xc   :  { %9822 = sst [smem:[#allocation34_spill]] %s9783_s24 }
   0xd   :  { %29 = vsyncpa [#allocation3], 0 }
   0xe   :  { %30 = vsyncpa [#allocation6], 0 }
   0xf   :  { %31 = vsyncpa [#allocation9], 0 }
  0x10   :  { %32 = vsyncpa [#allocation4], 0 }
  0x11   :  { %34 = vsyncpa [#allocation4 + $0x1], 0  ;;  %s8686_s5 = smov 0   ;;  %s8688_s26 = smov 0  }
  0x12   :  { %s8690_s27 = smov 0   ;;  %s8692_s28 = smov 0  }
  0x13 LB: > { %9823 = sst [smem:[#allocation15_spill]] %s8533_s5  ;;  %s8707_s6 = sadd.s32 4294967295, %s8545_s28   ;;  %s8545_s28 = sphi %s8692_s28, %s9870_s28   ;;  %s8541_s27 = sphi %s8690_s27, %s9873_s27   ;;  %s8537_s26 = sphi %s8688_s26, %s9872_s26   ;;  %s8533_s5 = sphi %s8686_s5, %s9871_s5  }
  0x14   : > { %9824 = sst [smem:[#allocation16_spill]] %s8537_s26  ;;  %s6613_s2 = sadd.s32 4294967294, %s8545_s28  }
  0x15   : > { %9825 = sst [smem:[#allocation17_spill]] %s8541_s27  ;;  %s8711_s29 = sadd.s32 1, %s8545_s28  }
  0x16   : > { %9826 = sst [smem:[#allocation18_spill]] %s8545_s28  ;;  %s556_s0 = sadd.s32 1, %s8541_s27 }
  0x17   : > { %9827 = sst [smem:[#allocation19_spill]] %s8711_s29  ;;  %s553_s7 = ssub.s32 %s8545_s28, %s8711_s29 }
  0x18   : > { %p566_p0 = scmp.ne.s32.totalorder %s8541_s27, %s8537_s26  ;;  %p554_p1 = scmp.eq.s32.totalorder %s553_s7, 0 }
  0x19   : > { %p567_p2 = scmp.eq.s32.totalorder %s8707_s6, 1  ;;  %p572_p3 = scmp.ne.s32.totalorder %s8537_s26, %s8533_s5 }
  0x1a   : > { %p573_p4 = scmp.eq.s32.totalorder %s6613_s2, 1  ;;  %p6614_p7 = scmp.ge.s32.totalorder %s8545_s28, 1 }
  0x1b   : > { %s8722_s30 = scalar_select %p554_p1, %s8541_s27, %s556_s0  }
  0x1c   : > { %p8724_p5 = por %p567_p2, %p566_p0  ;;  %p8728_p6 = por %p573_p4, %p572_p3 }
  0x1d   : > { %9828 = sst [smem:[#allocation20_spill]] %s8722_s30  ;;  %p580_p8 = scmp.lt.s32.totalorder %s8545_s28, 3 }
  0x1e   : > { %s9829_s3 = scalar_select %p8724_p5, 1, 0 }
  0x1f   : > { %s9831_s25 = scalar_select %p8728_p6, 1, 0 }
  0x20   : > { %9830 = sst [smem:[#allocation21_spill]] %s9829_s3  ;;  %p9800_p9 = scmp.eq.s32.totalorder %s8707_s6, 0 }
  0x21   : > { %9832 = sst [smem:[#allocation22_spill]] %s9831_s25  ;;  %p8735_p10 = pnand %p6614_p7, %p580_p8 }
  0x22   : > { %s8547_s4 = smov [#allocation5]   ;;  %s8548_s2 = smov [#allocation2]  }
  0x23   : > { %s9833_s8 = scalar_select %p8735_p10, 1, 0 }
  0x24   : > { %s609_s1 = sshll.u32 %s8547_s4, 4  ;;  %p7976_p11 = pneg %p8735_p10  ;;  %s610_s1 = int_to_ptr.vmem [resolvable:$true] %s609_s1 }
  0x25   : > { %s592_s0 = sshll.u32 %s8548_s2, 4  ;;  %s8549_s30 = smov [#allocation7]   ;;  %s8747_s0 = int_to_ptr.vmem [resolvable:$true] %s592_s0 }
  0x26   : > { %p8743_p12 = pnand %p9800_p9, %p7976_p11  ;;  %s8749_s27 = sshll.u32 %s8549_s30, 4  ;;  %s635_s27 = int_to_ptr.vmem [resolvable:$true] %s8749_s27 }
  0x27   : > { %s9835_s5 = sld [smem:[#allocation26_spill]] }
  0x28   : > { %p8759_p0 = pneg %p8743_p12 }
  0x2d   : > { %s9836_s24 = smov %s9835_s5  ;;  %s8359_s4 = scalar_lea.hbm %s9835_s5, 16 }
  0x2e   : > { %p8360_p13 = scmp.ne.s32.totalorder %s9836_s24, %s8359_s4  ;;  %p8366_p3 = scmp.lt.u32.totalorder %s8359_s4, %s9836_s24 }
  0x30   : > { %p8362_p1 = pnand %p8759_p0, %p8360_p13 }
  0x32   : > { %p8363_p2 = pneg %p8362_p1 }
  0x34   : > { %p8368_p4 = pnand %p8366_p3, %p8363_p2 }
  0x36   : > { %8371 = shalt.err (!%p8368_p4)
}
  0x37   : > { %s8372_s5 = scalar_lea.vmem %s610_s1, 16  ;;  %s8379_s28 = scalar_lea.vmem %s610_s1, 32 }
  0x38   : > { %p8373_p7 = scmp.ne.s32.totalorder %s610_s1, %s8372_s5  ;;  %p8380_p9 = scmp.lt.s32.totalorder %s610_s1, %s610_s1 }
  0x39   : > { %p8381_p6 = scmp.lt.s32.totalorder %s8379_s28, %s8372_s5 }
  0x3a   : > { %p8375_p8 = pnand %p8373_p7, %p8759_p0 }
  0x3b   : > { %p8382_p5 = por %p8381_p6, %p8380_p9 }
  0x3c   : > { %p8376_p11 = pneg %p8375_p8 }
  0x3e   : > { %p8383_p10 = pnand %p8382_p5, %p8376_p11 }
  0x40   : > { %8386 = shalt.err (!%p8383_p10)
}
  0x41   : > { %7982 = dma.hbm_to_vmem [thread:$0]  (!%p8743_p12), %s9836_s24, 16, %s610_s1, [#allocation6]  }
  0x42   : > { %s9838_s4 = sld [smem:[#allocation24_spill]] }
  0x48   : > { %s8387_s30 = scalar_lea.hbm %s9838_s4, 256 }
  0x49   : > { %p8388_p13 = scmp.ne.s32.totalorder %s9838_s4, %s8387_s30  ;;  %p8394_p5 = scmp.lt.u32.totalorder %s8387_s30, %s9838_s4 }
  0x4b   : > { %p8390_p1 = pnand %p8388_p13, %p8759_p0 }
  0x4d   : > { %p8391_p6 = pneg %p8390_p1 }
  0x4f   : > { %p8396_p9 = pnand %p8394_p5, %p8391_p6 }
  0x51   : > { %8399 = shalt.err (!%p8396_p9)
}
  0x52   : > { %s8400_s1 = scalar_lea.vmem %s8747_s0, 256  ;;  %p8408_p4 = scmp.lt.s32.totalorder %s8747_s0, %s8747_s0 }
  0x53   : > { %p8401_p10 = scmp.ne.s32.totalorder %s8747_s0, %s8400_s1  ;;  %p8409_p7 = scmp.lt.s32.totalorder %s8400_s1, %s8400_s1 }
  0x55   : > { %p8403_p2 = pnand %p8401_p10, %p8759_p0  ;;  %p8410_p8 = por %p8409_p7, %p8408_p4 }
  0x57   : > { %p8404_p3 = pneg %p8403_p2 }
  0x59   : > { %p8411_p11 = pnand %p8410_p8, %p8404_p3 }
  0x5b   : > { %8414 = shalt.err (!%p8411_p11)
}
  0x5c   : > { %s9805_s21 = smov 128   ;;  %s9806_s26 = smov 8  }
  0x5d   : > { %7979 = dma.hbm_to_vmem [thread:$0]  (!%p8743_p12), %s9838_s4, 256, %s8747_s0, [#allocation3], %s9805_s21, %s9805_s21, %s9806_s26  }
  0x5e   : > { %s8415_s30 = scalar_lea.hbm %s9768_s9, 32 }
  0x5f   : > { %p8416_p13 = scmp.ne.s32.totalorder %s9768_s9, %s8415_s30  ;;  %p8422_p5 = scmp.lt.u32.totalorder %s8415_s30, %s9768_s9 }
  0x61   : > { %p8418_p1 = pnand %p8416_p13, %p8759_p0 }
  0x63   : > { %p8419_p6 = pneg %p8418_p1 }
  0x65   : > { %p8424_p9 = pnand %p8422_p5, %p8419_p6 }
  0x67   : > { %8427 = shalt.err (!%p8424_p9)
}
  0x68   : > { %s8428_s29 = scalar_lea.vmem %s635_s27, 32  ;;  %p8436_p4 = scmp.lt.s32.totalorder %s635_s27, %s635_s27 }
  0x69   : > { %p8429_p10 = scmp.ne.s32.totalorder %s635_s27, %s8428_s29  ;;  %p8437_p7 = scmp.lt.s32.totalorder %s8428_s29, %s8428_s29 }
  0x6b   : > { %p8431_p2 = pnand %p8429_p10, %p8759_p0  ;;  %p8438_p8 = por %p8437_p7, %p8436_p4 }
  0x6d   : > { %p8432_p3 = pneg %p8431_p2 }
  0x6f   : > { %p8439_p11 = pnand %p8438_p8, %p8432_p3 }
  0x71   : > { %8442 = shalt.err (!%p8439_p11)
}
  0x72   : > { %s8552_s0 = smov 16   ;;  %s8553_s3 = smov 1  }
  0x73   : > { %7985 = dma.hbm_to_vmem [thread:$0]  (!%p8743_p12), %s9768_s9, 32, %s635_s27, [#allocation6], %s8552_s0, %s8552_s0, %s8553_s3  }
  0x74   : > { %s8554_s25 = smov [#allocation8]   ;;  %s8443_s1 = scalar_lea.hbm %s9773_s14, 1024 }
  0x75   : > { %s659_s30 = sshll.u32 %s8554_s25, 4  ;;  %p8444_p13 = scmp.ne.s32.totalorder %s9773_s14, %s8443_s1  ;;  %s660_s30 = int_to_ptr.vmem [resolvable:$true] %s659_s30 }
  0x76   : > { %p8450_p5 = scmp.lt.u32.totalorder %s8443_s1, %s9773_s14 }
  0x77   : > { %p8446_p1 = pnand %p8444_p13, %p8759_p0 }
  0x79   : > { %p8447_p6 = pneg %p8446_p1 }
  0x7b   : > { %p8452_p9 = pnand %p8450_p5, %p8447_p6 }
  0x7d   : > { %8455 = shalt.err (!%p8452_p9)
}
  0x7e   : > { %s8456_s27 = scalar_lea.vmem %s660_s30, 1024  ;;  %p8464_p4 = scmp.lt.s32.totalorder %s660_s30, %s660_s30 }
  0x7f   : > { %p8457_p10 = scmp.ne.s32.totalorder %s660_s30, %s8456_s27  ;;  %p8465_p7 = scmp.lt.s32.totalorder %s8456_s27, %s8456_s27 }
  0x81   : > { %p8459_p2 = pnand %p8457_p10, %p8759_p0  ;;  %p8466_p8 = por %p8465_p7, %p8464_p4 }
  0x83   : > { %p8460_p3 = pneg %p8459_p2 }
  0x85   : > { %p8467_p11 = pnand %p8466_p8, %p8460_p3 }
  0x87   : > { %8470 = shalt.err (!%p8467_p11)
}
  0x88   : > { %s9839_s21 = smov 8   ;;  %s9840_s0 = smov 128  }
  0x89   : > { %7988 = dma.hbm_to_vmem [thread:$0]  (!%p8743_p12), %s9773_s14, 1024, %s660_s30, [#allocation9], %s9840_s0, %s9840_s0, %s9839_s21  }
  0x8a   : > { %p9841_p13 = scmp.ne.s32.totalorder %s9833_s8, 0 }
  0x8b   : > { %p9842_p0 = scmp.eq.s32.totalorder (!%p9841_p13), %s8707_s6, 0 }
  0x8c   : > { %712 = sbr.rel (%p9841_p13) target bundleno = 9278 (0x243e), region = 116 }
  0x93   : > { %8516 = dma.done.wait (%p9842_p0), [#allocation3], 256   ;;  %p9843_p1 = pmov %p9842_p0 }
  0x94   : > { %p9844_p6 = pmov %p9842_p0 }
  0x95   : > { %8518 = vsyncadd (%p9843_p1), [#allocation3], 4294967040 }
  0x96   : > { %8520 = dma.done.wait (%p9844_p6), [#allocation6], 48   ;;  %p9845_p5 = pmov %p9842_p0 }
  0x97   : > { %p9846_p9 = pmov %p9842_p0 }
  0x98   : > { %8522 = vsyncadd (%p9845_p5), [#allocation6], 4294967248 }
  0x99   : > { %8524 = dma.done.wait (%p9846_p9), [#allocation9], 1024   ;;  %p9847_p12 = pmov %p9842_p0 }
  0x9a   : > { %s6626_s8 = sshll.u32 %s8707_s6, 1  ;;  %s9848_s24 = sld [smem:[#allocation23_spill]]  ;;  %v803_v1 = vld [vmem:[#allocation2] sm:$0xff]  ;;  %vm811_vm0 = vcmask 261120   ;;  %v804_v6 = vld [vmem:[#allocation2 + $0x8] sm:$0xff]  ;;  %vm1189_vm1 = vcmask 64512  }
  0x9b   : > { %8526 = vsyncadd (%p9847_p12), [#allocation9], 4294966272  ;;  %p792_p10 = scmp.lt.s32.totalorder %s6626_s8, 3  ;;  %s9849_s5 = sld [smem:[#allocation27_spill]]  ;;  %vm1364_vm3 = vcmask 130048  }
  0x9c   : > { %s9851_s0 = sld [smem:[#allocation31_spill]]  ;;  %s9852_s29 = sld [smem:[#allocation29_spill]]  ;;  %vm8970_vm2 = vmpackc.low %vm1189_vm1, %vm1189_vm1 }
  0x9d   : > { %s9875_s8 = smov (!%p792_p10, %s6626_s8), 3  ;;  %s9854_s30 = sld [smem:[#allocation28_spill]] }
  0x9e   : > { %s6865_s7 = sshll.u32 %s9875_s8, 4  ;;  %s9853_s8 = sld [smem:[#allocation25_spill]] }
  0x9f   : > { %s9855_s27 = sld [smem:[#allocation30_spill]]  ;;  %s8555_s4 = smov 120  }
  0xa0   : > { %s796_s23 = scalar_lea.vmem %s9848_s24, %s6865_s7  ;;  %s8556_s26 = smov 112  }
  0xa1   : > { %v799_v0 = vld [vmem:[%s796_s23] sm:$0xff]  ;;  %v801_v2 = vld [vmem:[%s796_s23 + $0x10] sm:$0xff]  ;;  %v800_v5 = vld [vmem:[%s796_s23 + $0x8] sm:$0xff]  ;;  %s9850_s1 = smov %s9849_s5  ;;  %s9808_s24 = smov 104  }
  0xa2   : > { %v805_v3 = vadd.f32 %v803_v1, %v799_v0  ;;  %v807_v4 = vadd.f32 %v803_v1, %v801_v2  ;;  %v802_v7 = vld [vmem:[%s796_s23 + $0x18] sm:$0xff]  ;;  %v806_v8 = vadd.f32 %v804_v6, %v800_v5  ;;  %v885_v34 = vld [vmem:[%s9849_s5] sm:$0xff]  ;;  %v886_v35 = vld [vmem:[%s9850_s1 + $0x8] sm:$0xff]  ;;  %s9859_s28 = smov 104   ;;  %s9861_s7 = sld [smem:[#allocation16_spill]] }
  0xa3   : > { %v808_v9 = vadd.f32 %v804_v6, %v802_v7  ;;  %v1089_v36 = vld [vmem:[%s9851_s0] sm:$0xff]  ;;  %v7638_v37 = vpack.c.bf16 %v886_v35, %v885_v34  ;;  %v1090_v38 = vld [vmem:[%s9851_s0 + $0x8] sm:$0xff]  ;;  %v887_v39 = vld [vmem:[%s9850_s1 + $0x10] sm:$0xff]  ;;  %s9862_s25 = sld [smem:[#allocation33_spill]] }
  0xa4   : > { %v812_v10 = vsel %vm811_vm0, %v805_v3, 0.0  ;;  %v818_v11 = vsel %vm811_vm0, %v807_v4, 0.0  ;;  %v815_v12 = vsel %vm811_vm0, %v806_v8, 0.0  ;;  %v888_v40 = vld [vmem:[%s9850_s1 + $0x18] sm:$0xff]  ;;  %v7654_v41 = vpack.c.bf16 %v1090_v38, %v1089_v36  ;;  %v1091_v43 = vld [vmem:[%s9851_s0 + $0x10] sm:$0xff]  ;;  %v993_v46 = vld [vmem:[%s9852_s29] sm:$0xff] }
  0xa5   : > { %813 = vadd.xlane.f32.xlu0 %v812_v10  ;;  %819 = vadd.xlane.f32.xlu1 %v818_v11  ;;  %v821_v13 = vsel %vm811_vm0, %v808_v9, 0.0  ;;  %v7642_v42 = vpack.c.bf16 %v888_v40, %v887_v39  ;;  %v1092_v44 = vld [vmem:[%s9851_s0 + $0x18] sm:$0xff]  ;;  %v994_v47 = vld [vmem:[%s9852_s29 + $0x8] sm:$0xff]  ;;  %v6629_v62 = vld [vmem:[%s9853_s8] ss:$0 sm:$0xff]  ;;  %s9856_s21 = smov %s9855_s27  ;;  %s9860_s8 = sld [smem:[#allocation32_spill]] }
  0xa6   : > { %7639 = vmatprep.subr.bf16.mxu1 %v7638_v37  ;;  %7655 = vmatprep.subr.bf16.mxu0 %v7654_v41  ;;  %v7658_v45 = vpack.c.bf16 %v1092_v44, %v1091_v43  ;;  %v7646_v48 = vpack.c.bf16 %v994_v47, %v993_v46  ;;  %v6630_v0 = vld [vmem:[#allocation5] ss:$0 sm:$0xff]  ;;  %v6636_v36 = vld [vmem:[%s9855_s27] ss:$0 sm:$0xff]  ;;  %s9863_s5 = sld [smem:[#allocation21_spill]] }
  0xa7   : > { %7641 = vmatpush3.bf16.msra.mxu1 %v7638_v37  ;;  %7657 = vmatpush3.bf16.msra.mxu0 %v7654_v41  ;;  %v995_v7 = vld [vmem:[%s9852_s29 + $0x10] sm:$0xff] }
  0xa8   : > { %7643 = vmatprep.subr.bf16.mxu1 %v7642_v42  ;;  %7659 = vmatprep.subr.bf16.mxu0 %v7658_v45  ;;  %s788_s2 = sand.u32 1, %s9861_s7   ;;  %s9864_s7 = sld [smem:[#allocation34_spill]] }
  0xa9   : > { %816 = vadd.xlane.f32.xlu0 %v815_v12  ;;  %822 = vadd.xlane.f32.xlu1 %v821_v13  ;;  %s6625_s3 = sshll.u32 %s788_s2, 5 }
  0xab   : > { %7645 = vmatpush3.bf16.msra.mxu1 %v7642_v42  ;;  %7661 = vmatpush3.bf16.msra.mxu0 %v7658_v45 }
  0xac   : > { %7647 = vmatprep.subr.bf16.mxu1 %v7646_v48  ;;  %p9865_p3 = scmp.ne.s32.totalorder %s9863_s5, 0 }
 0x132   : > { %v814_v14 = vpop.xlane.xlu0 %813  ;;  %v820_v15 = vpop.xlane.xlu1 %819 }
 0x133   : > { %v825_v16 = vmul.f32 0.03125, %v814_v14  ;;  %v827_v17 = vmul.f32 0.03125, %v820_v15 }
 0x135   : > { %v829_v18 = vsub.f32 %v805_v3, %v825_v16  ;;  %v8863_v19 = vsub.f32 %v807_v4, %v827_v17 }
 0x136   : > { %v817_v20 = vpop.xlane.xlu0 %816  ;;  %v823_v21 = vpop.xlane.xlu1 %822 }
 0x137   : > { %v826_v22 = vmul.f32 0.03125, %v817_v20  ;;  %v828_v23 = vmul.f32 0.03125, %v823_v21  ;;  %v833_v24 = vmul.f32 %v829_v18, %v829_v18  ;;  %v835_v25 = vmul.f32 %v8863_v19, %v8863_v19 }
 0x139   : > { %v830_v26 = vsub.f32 %v806_v8, %v826_v22  ;;  %v8867_v27 = vsub.f32 %v808_v9, %v828_v23  ;;  %v837_v28 = vsel %vm811_vm0, %v833_v24, 0.0  ;;  %v843_v29 = vsel %vm811_vm0, %v835_v25, 0.0  ;;  %v996_v8 = vld [vmem:[%s9852_s29 + $0x18] sm:$0xff] }
 0x13a   : > { %838 = vadd.xlane.f32.xlu0 %v837_v28  ;;  %v7650_v14 = vpack.c.bf16 %v996_v8, %v995_v7 }
 0x13b   : > { %v834_v30 = vmul.f32 %v830_v26, %v830_v26  ;;  %v836_v31 = vmul.f32 %v8867_v27, %v8867_v27 }
 0x13d   : > { %v840_v32 = vsel %vm811_vm0, %v834_v30, 0.0  ;;  %v846_v33 = vsel %vm811_vm0, %v836_v31, 0.0 }
 0x13e   : > { %844 = vadd.xlane.f32.xlu0 %v843_v29  ;;  %841 = vadd.xlane.f32.xlu1 %v840_v32 }
 0x142   : > { %847 = vadd.xlane.f32.xlu1 %v846_v33 }
 0x1c7   : > { %v839_v49 = vpop.xlane.xlu0 %838 }
 0x1c8   : > { %v849_v50 = vmul.f32 0.03125, %v839_v49 }
 0x1ca   : > { %v853_v51 = vadd.f32 1e-08, %v849_v50 }
 0x1cb   : > { %v842_v52 = vpop.xlane.xlu1 %841  ;;  %v845_v53 = vpop.xlane.xlu0 %844 }
 0x1cc   : > { %8167 = vrsqrt.f32 %v853_v51  ;;  %v850_v54 = vmul.f32 0.03125, %v842_v52  ;;  %v851_v55 = vmul.f32 0.03125, %v845_v53 }
 0x1ce   : > { %v854_v56 = vadd.f32 1e-08, %v850_v54  ;;  %v855_v57 = vadd.f32 1e-08, %v851_v55 }
 0x1cf   : > { %v848_v58 = vpop.xlane.xlu1 %847 }
 0x1d0   : > { %8169 = vrsqrt.f32 %v854_v56  ;;  %v852_v59 = vmul.f32 0.03125, %v848_v58 }
 0x1d1   : > { %8171 = vrsqrt.f32 %v855_v57 }
 0x1d2   : > { %v856_v60 = vadd.f32 1e-08, %v852_v59 }
 0x1d4   : > { %8173 = vrsqrt.f32 %v856_v60 }
 0x1d6   : > { %v8168_v61 = vpop.eup %8167 }
 0x1d7   : > { %v861_v63 = vmul.f32 %v8168_v61, %v829_v18  ;;  %v6641_v18 = vld [vmem:[#allocation7] ss:$0 sm:$0xff] }
 0x1d9   : > { %v871_v1 = vmul.f32 %v6629_v62, %v861_v63 }
 0x1da   : > { %v8170_v2 = vpop.eup %8169 }
 0x1db   : > { %v8172_v3 = vpop.eup %8171  ;;  %v8908_v4 = vadd.f32 %v6630_v0, %v871_v1  ;;  %v862_v5 = vmul.f32 %v8170_v2, %v830_v26 }
 0x1dc   : > { %v863_v6 = vmul.f32 %v8172_v3, %v8863_v19  ;;  %v6631_v19 = vld [vmem:[%s9854_s30] ss:$0 sm:$0xff] }
 0x1dd   : > { %7156 = vmatprep.mubr.msk.f32.mxu1 %vm811_vm0, %v8908_v4  ;;  %7184 = vmatprep.mubr.msk.f32.mxu0 %vm811_vm0, %v8908_v4  ;;  %v872_v9 = vmul.f32 %v6629_v62, %v862_v5 }
 0x1de   : > { %v8174_v10 = vpop.eup %8173  ;;  %v873_v11 = vmul.f32 %v6629_v62, %v863_v6 }
 0x1df   : > { %v8921_v12 = vadd.f32 %v6630_v0, %v872_v9  ;;  %v864_v13 = vmul.f32 %v8174_v10, %v8867_v27 }
 0x1e0   : > { %v8924_v15 = vadd.f32 %v6630_v0, %v873_v11 }
 0x1e1   : > { %7157 = vmatmul.mubr.msk.f32.vlgmr.msra.gmra.mrb[0].mxu1 %vm811_vm0, %v8921_v12  ;;  %7185 = vmatmul.mubr.msk.f32.vlgmr.msra.gmra.mrb[0].mxu0 %vm811_vm0, %v8921_v12  ;;  %v874_v16 = vmul.f32 %v6629_v62, %v864_v13 }
 0x1e2   : > { %7159 = vmatprep.mubr.msk.f32.mxu1 %vm811_vm0, %v8924_v15  ;;  %7649 = vmatpush3.bf16.msra.mxu1 %v7646_v48 }
 0x1e3   : > { %7187 = vmatprep.mubr.msk.f32.mxu0 %vm811_vm0, %v8924_v15  ;;  %v8934_v17 = vadd.f32 %v6630_v0, %v874_v16  ;;  %7651 = vmatprep.subr.bf16.mxu1 %v7650_v14 }
 0x1e5   : > { %7160 = vmatmul.mubr.msk.f32.gmra.mrb[2].mxu1 %vm811_vm0, %v8934_v17  ;;  %7188 = vmatmul.mubr.msk.f32.gmra.mrb[2].mxu0 %vm811_vm0, %v8934_v17 }
 0x1e6   : > { %7653 = vmatpush3.bf16.msra.mxu1 %v7650_v14  ;;  %7170 = vmatprep.mubr.msk.f32.mxu1 %vm811_vm0, %v8908_v4 }
 0x1e9   : > { %7171 = vmatmul.mubr.msk.f32.vlgmr.msra.gmra.mrb[4].mxu1 %vm811_vm0, %v8921_v12 }
 0x1ea   : > { %7173 = vmatprep.mubr.msk.f32.mxu1 %vm811_vm0, %v8924_v15 }
 0x1ed   : > { %7174 = vmatmul.mubr.msk.f32.gmra.mrb[6].mxu1 %vm811_vm0, %v8934_v17 }
 0x2b4   : > { %v7158_v20 = vpop.f32.mrb[0].mxu1  ;;  %v7186_v21 = vpop.f32.mrb[0].mxu0 }
 0x2b5   : > { %v1172_v22 = vadd.f32 %v7186_v21, %v6641_v18  ;;  %v974_v23 = vpop.f32.mrb[1].mxu1  ;;  %v1166_v24 = vpop.f32.mrb[1].mxu0  ;;  %v8986_v52 = vadd.f32 %v7158_v20, %v6631_v19 }
 0x2b6   : > { %v8951_v25 = vadd.f32 %v6631_v19, %v974_v23  ;;  %v1167_v26 = vadd.f32 %v6641_v18, %v1166_v24 }
 0x2b8   : > { %v7161_v27 = vpop.f32.mrb[2].mxu1  ;;  %v7189_v28 = vpop.f32.mrb[2].mxu0  ;;  %7194 = vmatprep.mubr.msk.f32.mxu1 %vm1189_vm1, %v8951_v25  ;;  %v7674_v29 = vpack.c.bf16 %v1172_v22, %v1167_v26  ;;  %v8955_v30 = vpack.i.bf16 %v1172_v22, %v1167_v26 }
 0x2b9   : > { %v1182_v31 = vadd.f32 %v7189_v28, %v6641_v18  ;;  %v984_v32 = vpop.f32.mrb[3].mxu1  ;;  %v1176_v33 = vpop.f32.mrb[3].mxu0  ;;  %v8990_v53 = vadd.f32 %v7161_v27, %v6631_v19 }
 0x2ba   : > { %v8957_v34 = vadd.f32 %v6631_v19, %v984_v32  ;;  %v1177_v35 = vadd.f32 %v6641_v18, %v1176_v33 }
 0x2bc   : > { %v7172_v37 = vpop.f32.mrb[4].mxu1  ;;  %7201 = vmatprep.mubr.msk.f32.mxu0 %vm1189_vm1, %v8957_v34  ;;  %v8964_v38 = vpack.c.bf16 %v1182_v31, %v1177_v35  ;;  %v8966_v39 = vpack.i.bf16 %v1182_v31, %v1177_v35 }
 0x2bd   : > { %v1076_v40 = vadd.f32 %v7172_v37, %v6636_v36  ;;  %v1070_v41 = vpop.f32.mrb[5].mxu1 }
 0x2be   : > { %v1071_v42 = vadd.f32 %v6636_v36, %v1070_v41 }
 0x2c0   : > { %v7175_v44 = vpop.f32.mrb[6].mxu1  ;;  %v7662_v45 = vpack.c.bf16 %v1076_v40, %v1071_v42  ;;  %v8974_v46 = vpack.i.bf16 %v1076_v40, %v1071_v42 }
 0x2c1   : > { %v1086_v47 = vadd.f32 %v7175_v44, %v6636_v36  ;;  %v1080_v48 = vpop.f32.mrb[7].mxu1 }
 0x2c2   : > { %v1081_v49 = vadd.f32 %v6636_v36, %v1080_v48  ;;  %7664 = vmatprep.subr.msk.bf16.mxu1 %vm8970_vm2, %v7662_v45 }
 0x2c3   : > { %7667 = vmatpush3.bf16.xpose.msk.msra.mxu1 %vm8970_vm2, %v7662_v45 }
 0x2c4   : > { %7675 = vmatprep.subr.bf16.mxu1 %v7674_v29  ;;  %v7668_v50 = vpack.c.bf16 %v1086_v47, %v1081_v49  ;;  %v8980_v51 = vpack.i.bf16 %v1086_v47, %v1081_v49 }
 0x2c6   : > { %7670 = vmatprep.subr.msk.bf16.mxu0 %vm8970_vm2, %v7668_v50 }
 0x2c7   : > { %7673 = vmatpush3.bf16.xpose.msk.msra.mxu0 %vm8970_vm2, %v7668_v50 }
 0x2ca   : > { %7195 = vmatmul.mubr.msk.f32.vlgmr.msra.gmra.mrb[8].mxu1 %vm1189_vm1, %v8986_v52 }
 0x2cb   : > { %7677 = vmatpush3.bf16.msra.mxu1 %v7674_v29 }
 0x2cc   : > { %7679 = vmatprep.subr.bf16.mxu1 %v8964_v38 }
 0x2ce   : > { %7202 = vmatmul.mubr.msk.f32.vlgmr.msra.gmra.mrb[4].mxu0 %vm1189_vm1, %v8990_v53 }
 0x39d   : > { %v7196_v54 = vpop.f32.mrb[8].mxu1 }
 0x39e   : > { %v1268_v55 = vpop.f32.mrb[9].mxu1  ;;  %v1368_v56 = vsel %vm1364_vm3, %v7196_v54, -inf }
 0x39f   : > { %1369 = vmax.xlane.f32.xlu1 %v1368_v56  ;;  %v1365_v57 = vsel %vm1364_vm3, %v1268_v55, -inf }
 0x3a0   : > { %1366 = vmax.xlane.f32.xlu0 %v1365_v57 }
 0x3a1   : > { %v7203_v58 = vpop.f32.mrb[4].mxu0 }
 0x3a2   : > { %v1355_v59 = vpop.f32.mrb[5].mxu0  ;;  %v1374_v60 = vsel %vm1364_vm3, %v7203_v58, -inf }
 0x3a3   : > { %1375 = vmax.xlane.f32.xlu1 %v1374_v60  ;;  %v1371_v61 = vsel %vm1364_vm3, %v1355_v59, -inf }
 0x3a4   : > { %1372 = vmax.xlane.f32.xlu0 %v1371_v61 }
 0x42c   : > { %v1370_v62 = vpop.xlane.xlu1 %1369 }
 0x42d   : > { %v1378_v63 = vsub.f32 %v7196_v54, %v1370_v62  ;;  %v1367_v0 = vpop.xlane.xlu0 %1366 }
 0x42e   : > { %v1377_v1 = vsub.f32 %v1268_v55, %v1367_v0 }
 0x42f   : > { %v1383_v2 = vmul.f32 1.442695, %v1378_v63 }
 0x430   : > { %v1381_v3 = vmul.f32 1.442695, %v1377_v1  ;;  %v1376_v5 = vpop.xlane.xlu1 %1375 }
 0x431   : > { %8175 = vpow2.f32 %v1383_v2  ;;  %v1380_v6 = vsub.f32 %v7203_v58, %v1376_v5  ;;  %v1373_v7 = vpop.xlane.xlu0 %1372 }
 0x432   : > { %8177 = vpow2.f32 %v1381_v3  ;;  %v1379_v8 = vsub.f32 %v1355_v59, %v1373_v7 }
 0x433   : > { %v1387_v9 = vmul.f32 1.442695, %v1380_v6 }
 0x434   : > { %v1385_v10 = vmul.f32 1.442695, %v1379_v8 }
 0x435   : > { %8179 = vpow2.f32 %v1387_v9 }
 0x436   : > { %8181 = vpow2.f32 %v1385_v10 }
 0x43b   : > { %v8176_v11 = vpop.eup %8175 }
 0x43c   : > { %v8178_v13 = vpop.eup %8177  ;;  %v1392_v14 = vsel %vm1364_vm3, %v8176_v11, 0.0 }
 0x43d   : > { %1393 = vadd.xlane.f32.xlu1 %v1392_v14  ;;  %v1389_v16 = vsel %vm1364_vm3, %v8178_v13, 0.0 }
 0x43e   : > { %1390 = vadd.xlane.f32.xlu0 %v1389_v16 }
 0x43f   : > { %v8180_v18 = vpop.eup %8179 }
 0x440   : > { %v8182_v19 = vpop.eup %8181  ;;  %v1398_v20 = vsel %vm1364_vm3, %v8180_v18, 0.0 }
 0x441   : > { %1399 = vadd.xlane.f32.xlu1 %v1398_v20  ;;  %v1395_v21 = vsel %vm1364_vm3, %v8182_v19, 0.0 }
 0x442   : > { %1396 = vadd.xlane.f32.xlu0 %v1395_v21 }
 0x452   : > { %1571 = vrot.lane.b32.xlu1 %v8951_v25, %s8555_s4 }
 0x456   : > { %8053 = vrot.lane.b32.xlu1 %v8980_v51, %s8555_s4 }
 0x458   : > { %8048 = vrot.lane.b32.xlu0 %v8974_v46, %s8555_s4 }
 0x45a   : > { %1573 = vrot.lane.b32.xlu1 %v8986_v52, %s8555_s4 }
 0x45c   : > { %1662 = vrot.lane.b32.xlu0 %v8957_v34, %s8555_s4 }
 0x45e   : > { %1664 = vrot.lane.b32.xlu1 %v8990_v53, %s8555_s4 }
 0x4ca   : > { %v1394_v22 = vpop.xlane.xlu1 %1393 }
 0x4cb   : > { %8183 = vrcp.f32 %v1394_v22  ;;  %v1391_v23 = vpop.xlane.xlu0 %1390 }
 0x4cc   : > { %8185 = vrcp.f32 %v1391_v23 }
 0x4ce   : > { %v1400_v24 = vpop.xlane.xlu1 %1399 }
 0x4cf   : > { %8187 = vrcp.f32 %v1400_v24  ;;  %v1397_v26 = vpop.xlane.xlu0 %1396 }
 0x4d0   : > { %8189 = vrcp.f32 %v1397_v26 }
 0x4d2   : > { %v1572_v27 = vpop.permute.xlu1 %1571 }
 0x4d3   : > { %7222 = vmatprep.mubr.msk.f32.mxu0 %vm1189_vm1, %v1572_v27  ;;  %v8049_v28 = vpop.permute.xlu0 %8048 }
 0x4d4   : > { %v8051_v29 = vunpack.i.h.bf16 %v8049_v28  ;;  %v8050_v31 = vunpack.i.l.bf16 %v8049_v28 }
 0x4d5   : > { %v8184_v32 = vpop.eup %8183 }
 0x4d6   : > { %v8186_v33 = vpop.eup %8185  ;;  %v7682_v35 = vpack.c.bf16 %v8051_v29, %v8050_v31  ;;  %v8054_v36 = vpop.permute.xlu1 %8053  ;;  %v1406_v42 = vmul.f32 %v8184_v32, %v8176_v11 }
 0x4d7   : > { %v8056_v37 = vunpack.i.h.bf16 %v8054_v36  ;;  %v8055_v40 = vunpack.i.l.bf16 %v8054_v36  ;;  %v1405_v41 = vmul.f32 %v8186_v33, %v8178_v13  ;;  %v1663_v50 = vpop.permute.xlu0 %1662 }
 0x4d8   : > { %7684 = vmatprep.subr.msk.bf16.mxu0 %vm8970_vm2, %v7682_v35 }
 0x4d9   : > { %v8188_v44 = vpop.eup %8187  ;;  %v7688_v45 = vpack.c.bf16 %v8056_v37, %v8055_v40  ;;  %7208 = vmatprep.mubr.msk.f32.mxu1 %vm1364_vm3, %v1405_v41  ;;  %7687 = vmatpush3.bf16.xpose.msk.msra.mxu0 %vm8970_vm2, %v7682_v35 }
 0x4da   : > { %v8190_v47 = vpop.eup %8189  ;;  %7209 = vmatmul.mubr.msk.f32.vlgmr.msra.gmra.mrb[10].mxu1 %vm1364_vm3, %v1406_v42  ;;  %v1408_v49 = vmul.f32 %v8188_v44, %v8180_v18  ;;  %v1574_v54 = vpop.permute.xlu1 %1573 }
 0x4db   : > { %7681 = vmatpush3.bf16.msra.mxu1 %v8964_v38  ;;  %v1407_v48 = vmul.f32 %v8190_v47, %v8182_v19 }
 0x4dc   : > { %7690 = vmatprep.subr.msk.bf16.mxu1 %vm8970_vm2, %v7688_v45 }
 0x4dd   : > { %7215 = vmatprep.mubr.msk.f32.mxu1 %vm1364_vm3, %v1407_v48 }
 0x4de   : > { %7216 = vmatmul.mubr.msk.f32.vlgmr.msra.gmra.mrb[12].mxu1 %vm1364_vm3, %v1408_v49  ;;  %v1665_v55 = vpop.permute.xlu1 %1664 }
 0x4df   : > { %7229 = vmatprep.mubr.msk.f32.mxu1 %vm1189_vm1, %v1663_v50 }
 0x4e0   : > { %7223 = vmatmul.mubr.msk.f32.vlgmr.msra.gmra.mrb[6].mxu0 %vm1189_vm1, %v1574_v54 }
 0x4e4   : > { %7693 = vmatpush3.bf16.xpose.msk.msra.mxu1 %vm8970_vm2, %v7688_v45 }
 0x4eb   : > { %7230 = vmatmul.mubr.msk.f32.vlgmr.msra.gmra.mrb[14].mxu1 %vm1189_vm1, %v1665_v55 }
 0x5ad   : > { %v9032_v38 = vpop.f32.mrb[10].mxu1 }
 0x5ae   : > { %v9034_v56 = vpop.f32.mrb[11].mxu1 }
 0x5b1   : > { %v9036_v57 = vpop.f32.mrb[12].mxu1 }
 0x5b2   : > { %v9038_v58 = vpop.f32.mrb[13].mxu1 }
 0x5b3   : > { %v7224_v59 = vpop.f32.mrb[6].mxu0 }
 0x5b4   : > { %v1653_v60 = vpop.f32.mrb[7].mxu0  ;;  %v1756_v61 = vsel %vm1364_vm3, %v7224_v59, -inf }
 0x5b5   : > { %1757 = vmax.xlane.f32.xlu1 %v1756_v61  ;;  %v1753_v62 = vsel %vm1364_vm3, %v1653_v60, -inf }
 0x5b6   : > { %1754 = vmax.xlane.f32.xlu0 %v1753_v62 }
 0x5be   : > { %v7231_v63 = vpop.f32.mrb[14].mxu1 }
 0x5bf   : > { %v1744_v0 = vpop.f32.mrb[15].mxu1  ;;  %v1762_v2 = vsel %vm1364_vm3, %v7231_v63, -inf }
 0x5c0   : > { %v1759_v1 = vsel %vm1364_vm3, %v1744_v0, -inf }
 0x5c1   : > { %1760 = vmax.xlane.f32.xlu0 %v1759_v1 }
 0x5c5   : > { %1763 = vmax.xlane.f32.xlu0 %v1762_v2 }
 0x642   : > { %v1758_v3 = vpop.xlane.xlu1 %1757 }
 0x643   : > { %v1766_v5 = vsub.f32 %v7224_v59, %v1758_v3  ;;  %v1755_v6 = vpop.xlane.xlu0 %1754 }
 0x644   : > { %v1765_v7 = vsub.f32 %v1653_v60, %v1755_v6 }
 0x645   : > { %v1771_v8 = vmul.f32 1.442695, %v1766_v5 }
 0x646   : > { %v1769_v9 = vmul.f32 1.442695, %v1765_v7 }
 0x647   : > { %8191 = vpow2.f32 %v1771_v8 }
 0x648   : > { %8193 = vpow2.f32 %v1769_v9  ;;  %v1186_v9 = vld [vmem:[%s9769_s10 + $0x8] sm:$0xff] }
 0x649   : > { %7246 = vmatprep.subr.mxu0 %v1186_v9 }
 0x64a   : > { %7247 = vmatpush3.msra.mxu0 %v1186_v9 }
 0x64e   : > { %v1761_v10 = vpop.xlane.xlu0 %1760 }
 0x64f   : > { %v1767_v11 = vsub.f32 %v1744_v0, %v1761_v10  ;;  %v1185_v10 = vld [vmem:[%s9769_s10] sm:$0xff] }
 0x650   : > { %7254 = vmatprep.subr.mxu0 %v1185_v10 }
 0x651   : > { %v8192_v13 = vpop.eup %8191  ;;  %v1773_v14 = vmul.f32 1.442695, %v1767_v11 }
 0x652   : > { %v8194_v16 = vpop.eup %8193  ;;  %v1764_v18 = vpop.xlane.xlu0 %1763  ;;  %v1780_v19 = vsel %vm1364_vm3, %v8192_v13, 0.0 }
 0x653   : > { %8195 = vpow2.f32 %v1773_v14  ;;  %v1768_v20 = vsub.f32 %v7231_v63, %v1764_v18  ;;  %1781 = vadd.xlane.f32.xlu1 %v1780_v19  ;;  %v1777_v21 = vsel %vm1364_vm3, %v8194_v16, 0.0 }
 0x654   : > { %1778 = vadd.xlane.f32.xlu0 %v1777_v21 }
 0x655   : > { %v1775_v22 = vmul.f32 1.442695, %v1768_v20 }
 0x657   : > { %8197 = vpow2.f32 %v1775_v22 }
 0x65d   : > { %v8196_v23 = vpop.eup %8195 }
 0x65e   : > { %v1783_v24 = vsel %vm1364_vm3, %v8196_v23, 0.0 }
 0x65f   : > { %1784 = vadd.xlane.f32.xlu0 %v1783_v24 }
 0x661   : > { %v8198_v26 = vpop.eup %8197 }
 0x662   : > { %v1786_v27 = vsel %vm1364_vm3, %v8198_v26, 0.0 }
 0x663   : > { %1787 = vadd.xlane.f32.xlu1 %v1786_v27 }
 0x674   : > { %8063 = vrot.lane.b32.xlu1 %v8966_v39, %s8555_s4 }
 0x675   : > { %8058 = vrot.lane.b32.xlu0 %v8955_v30, %s8555_s4 }
 0x678   : > { %8068 = vrot.lane.b32.xlu1 %v8974_v46, %s8556_s26 }
 0x679   : > { %2169 = vrot.lane.b32.xlu0 %v8951_v25, %s8556_s26 }
 0x67c   : > { %8073 = vrot.lane.b32.xlu1 %v8980_v51, %s8556_s26 }
 0x67d   : > { %2260 = vrot.lane.b32.xlu0 %v8957_v34, %s8556_s26 }
 0x680   : > { %2171 = vrot.lane.b32.xlu1 %v8986_v52, %s8556_s26 }
 0x684   : > { %2262 = vrot.lane.b32.xlu1 %v8990_v53, %s8556_s26 }
 0x6e0   : > { %v1782_v29 = vpop.xlane.xlu1 %1781 }
 0x6e1   : > { %v1779_v28 = vpop.xlane.xlu0 %1778 }
 0x6e2   : > { %8199 = vrcp.f32 %v1779_v28 }
 0x6e3   : > { %8201 = vrcp.f32 %v1782_v29 }
 0x6ec   : > { %v8200_v31 = vpop.eup %8199  ;;  %v1785_v32 = vpop.xlane.xlu0 %1784 }
 0x6ed   : > { %8203 = vrcp.f32 %v1785_v32  ;;  %v1793_v33 = vmul.f32 %v8200_v31, %v8194_v16  ;;  %v8202_v42 = vpop.eup %8201 }
 0x6ee   : > { %v1794_v49 = vmul.f32 %v8202_v42, %v8192_v13 }
 0x6ef   : > { %7236 = vmatprep.mubr.msk.f32.mxu1 %vm1364_vm3, %v1793_v33 }
 0x6f0   : > { %v1788_v35 = vpop.xlane.xlu1 %1787  ;;  %v8059_v36 = vpop.permute.xlu0 %8058 }
 0x6f1   : > { %8205 = vrcp.f32 %v1788_v35  ;;  %v8061_v37 = vunpack.i.h.bf16 %v8059_v36  ;;  %v8060_v40 = vunpack.i.l.bf16 %v8059_v36 }
 0x6f3   : > { %v7694_v41 = vpack.c.bf16 %v8061_v37, %v8060_v40 }
 0x6f4   : > { %v8064_v44 = vpop.permute.xlu1 %8063  ;;  %v2170_v1 = vpop.permute.xlu0 %2169 }
 0x6f5   : > { %v8066_v45 = vunpack.i.h.bf16 %v8064_v44  ;;  %v8065_v47 = vunpack.i.l.bf16 %v8064_v44  ;;  %7695 = vmatprep.subr.bf16.mxu1 %v7694_v41 }
 0x6f6   : > { %7697 = vmatpush3.bf16.msra.mxu1 %v7694_v41 }
 0x6f7   : > { %v8204_v48 = vpop.eup %8203  ;;  %v7698_v50 = vpack.c.bf16 %v8066_v45, %v8065_v47 }
 0x6f8   : > { %v8069_v54 = vpop.permute.xlu1 %8068  ;;  %v1795_v55 = vmul.f32 %v8204_v48, %v8196_v23  ;;  %v2261_v7 = vpop.permute.xlu0 %2260 }
 0x6f9   : > { %v8071_v59 = vunpack.i.h.bf16 %v8069_v54  ;;  %v8070_v60 = vunpack.i.l.bf16 %v8069_v54  ;;  %7237 = vmatmul.mubr.msk.f32.vlgmr.msra.gmra.mrb[16].mxu1 %vm1364_vm3, %v1794_v49  ;;  %7699 = vmatprep.subr.bf16.mxu1 %v7698_v50 }
 0x6fa   : > { %7701 = vmatpush3.bf16.msra.mxu1 %v7698_v50  ;;  %7243 = vmatprep.mubr.msk.f32.mxu1 %vm1364_vm3, %v1795_v55 }
 0x6fb   : > { %v8206_v61 = vpop.eup %8205  ;;  %v7702_v62 = vpack.c.bf16 %v8071_v59, %v8070_v60 }
 0x6fc   : > { %v8074_v63 = vpop.permute.xlu1 %8073  ;;  %v1796_v0 = vmul.f32 %v8206_v61, %v8198_v26 }
 0x6fd   : > { %7704 = vmatprep.subr.msk.bf16.mxu1 %vm8970_vm2, %v7702_v62  ;;  %v8076_v2 = vunpack.i.h.bf16 %v8074_v63  ;;  %v8075_v3 = vunpack.i.l.bf16 %v8074_v63 }
 0x6fe   : > { %7244 = vmatmul.mubr.msk.f32.vlgmr.msra.gmra.mrb[18].mxu1 %vm1364_vm3, %v1796_v0 }
 0x6ff   : > { %7266 = vmatprep.mubr.msk.f32.mxu1 %vm1189_vm1, %v2170_v1  ;;  %v7708_v5 = vpack.c.bf16 %v8076_v2, %v8075_v3 }
 0x700   : > { %v2172_v6 = vpop.permute.xlu1 %2171 }
 0x703   : > { %7707 = vmatpush3.bf16.xpose.msk.msra.mxu1 %vm8970_vm2, %v7702_v62 }
 0x704   : > { %7710 = vmatprep.subr.msk.bf16.mxu1 %vm8970_vm2, %v7708_v5  ;;  %v2263_v8 = vpop.permute.xlu1 %2262 }
 0x70a   : > { %7267 = vmatmul.mubr.msk.f32.vlgmr.msra.gmra.mrb[20].mxu1 %vm1189_vm1, %v2172_v6 }
 0x70b   : > { %7713 = vmatpush3.bf16.xpose.msk.msra.mxu1 %vm8970_vm2, %v7708_v5  ;;  %7273 = vmatprep.mubr.msk.f32.mxu1 %vm1189_vm1, %v2261_v7 }
 0x712   : > { %7274 = vmatmul.mubr.msk.f32.vlgmr.msra.gmra.mrb[22].mxu1 %vm1189_vm1, %v2263_v8 }
 0x7cc   : > { %v7238_v11 = vpop.f32.mrb[16].mxu1 }
 0x7cd   : > { %v1877_v13 = vpop.f32.mrb[17].mxu1 }
 0x7ce   : > { %7248 = vmatprep.mubr.msk.f32.mxu0 %vm1189_vm1, %v1877_v13 }
 0x7cf   : > { %7249 = vmatmul.mubr.msk.f32.vlgmr.msra.gmra.mrb[8].mxu0 %vm1189_vm1, %v7238_v11 }
 0x7d0   : > { %7255 = vmatpush3.msra.mxu0 %v1185_v10 }
 0x7d1   : > { %v7245_v14 = vpop.f32.mrb[18].mxu1 }
 0x7d2   : > { %v1966_v16 = vpop.f32.mrb[19].mxu1 }
 0x7d3   : > { %7251 = vmatprep.mubr.msk.f32.mxu0 %vm1189_vm1, %v1966_v16 }
 0x7d4   : > { %7252 = vmatmul.mubr.msk.f32.gmra.mrb[10].mxu0 %vm1189_vm1, %v7245_v14 }
 0x7d5   : > { %7256 = vmatprep.mubr.msk.f32.mxu0 %vm1189_vm1, %v9034_v56 }
 0x7d8   : > { %7257 = vmatmul.mubr.msk.f32.vlgmr.msra.gmra.mrb[8].mxu0 %vm1189_vm1, %v9032_v38 }
 0x7d9   : > { %7259 = vmatprep.mubr.msk.f32.mxu0 %vm1189_vm1, %v9038_v58 }
 0x7dc   : > { %7260 = vmatmul.mubr.msk.f32.gmra.mrb[10].mxu0 %vm1189_vm1, %v9036_v57 }
 0x7dd   : > { %v7268_v18 = vpop.f32.mrb[20].mxu1 }
 0x7de   : > { %v2251_v19 = vpop.f32.mrb[21].mxu1  ;;  %v2354_v20 = vsel %vm1364_vm3, %v7268_v18, -inf }
 0x7df   : > { %2355 = vmax.xlane.f32.xlu1 %v2354_v20  ;;  %v2351_v21 = vsel %vm1364_vm3, %v2251_v19, -inf }
 0x7e0   : > { %2352 = vmax.xlane.f32.xlu0 %v2351_v21 }
 0x7e5   : > { %v7275_v22 = vpop.f32.mrb[22].mxu1 }
 0x7e6   : > { %v2342_v23 = vpop.f32.mrb[23].mxu1  ;;  %v2360_v38 = vsel %vm1364_vm3, %v7275_v22, -inf }
 0x7e7   : > { %v2357_v56 = vsel %vm1364_vm3, %v2342_v23, -inf }
 0x7e8   : > { %2358 = vmax.xlane.f32.xlu0 %v2357_v56 }
 0x7ec   : > { %2361 = vmax.xlane.f32.xlu0 %v2360_v38 }
 0x86c   : > { %v2356_v58 = vpop.xlane.xlu1 %2355 }
 0x86d   : > { %v2364_v24 = vsub.f32 %v7268_v18, %v2356_v58  ;;  %v2353_v26 = vpop.xlane.xlu0 %2352 }
 0x86e   : > { %v2363_v57 = vsub.f32 %v2251_v19, %v2353_v26 }
 0x86f   : > { %v2369_v27 = vmul.f32 1.442695, %v2364_v24 }
 0x870   : > { %v2367_v28 = vmul.f32 1.442695, %v2363_v57 }
 0x871   : > { %8207 = vpow2.f32 %v2369_v27 }
 0x872   : > { %8209 = vpow2.f32 %v2367_v28 }
 0x875   : > { %v2359_v29 = vpop.xlane.xlu0 %2358 }
 0x876   : > { %v2365_v31 = vsub.f32 %v2342_v23, %v2359_v29 }
 0x878   : > { %v2371_v32 = vmul.f32 1.442695, %v2365_v31 }
 0x879   : > { %v2362_v33 = vpop.xlane.xlu0 %2361 }
 0x87a   : > { %8211 = vpow2.f32 %v2371_v32  ;;  %v2366_v35 = vsub.f32 %v7275_v22, %v2362_v33 }
 0x87b   : > { %v8208_v36 = vpop.eup %8207 }
 0x87c   : > { %v8210_v37 = vpop.eup %8209  ;;  %v2373_v40 = vmul.f32 1.442695, %v2366_v35  ;;  %v2378_v41 = vsel %vm1364_vm3, %v8208_v36, 0.0 }
 0x87d   : > { %2379 = vadd.xlane.f32.xlu1 %v2378_v41  ;;  %v2375_v42 = vsel %vm1364_vm3, %v8210_v37, 0.0 }
 0x87e   : > { %8213 = vpow2.f32 %v2373_v40  ;;  %2376 = vadd.xlane.f32.xlu0 %v2375_v42 }
 0x884   : > { %v8212_v44 = vpop.eup %8211 }
 0x885   : > { %v2381_v45 = vsel %vm1364_vm3, %v8212_v44, 0.0 }
 0x886   : > { %2382 = vadd.xlane.f32.xlu0 %v2381_v45 }
 0x888   : > { %v8214_v47 = vpop.eup %8213 }
 0x889   : > { %v2384_v48 = vsel %vm1364_vm3, %v8214_v47, 0.0 }
 0x88a   : > { %2385 = vadd.xlane.f32.xlu1 %v2384_v48 }
 0x89b   : > { %8083 = vrot.lane.b32.xlu1 %v8966_v39, %s8556_s26 }
 0x89c   : > { %8078 = vrot.lane.b32.xlu0 %v8955_v30, %s8556_s26 }
 0x89f   : > { %8088 = vrot.lane.b32.xlu1 %v8974_v46, %s9808_s24 }
 0x8a0   : > { %2670 = vrot.lane.b32.xlu0 %v8951_v25, %s9808_s24 }
 0x8a3   : > { %8093 = vrot.lane.b32.xlu1 %v8980_v51, %s9808_s24 }
 0x8a4   : > { %2761 = vrot.lane.b32.xlu0 %v8957_v34, %s9808_s24 }
 0x8a7   : > { %2672 = vrot.lane.b32.xlu1 %v8986_v52, %s9808_s24 }
 0x8ab   : > { %2763 = vrot.lane.b32.xlu1 %v8990_v53, %s9808_s24  ;;  %v1187_v53 = vld [vmem:[%s9769_s10 + $0x10] sm:$0xff] }
 0x90a   : > { %v2380_v50 = vpop.xlane.xlu1 %2379 }
 0x90b   : > { %v2377_v49 = vpop.xlane.xlu0 %2376 }
 0x90c   : > { %8215 = vrcp.f32 %v2377_v49 }
 0x90d   : > { %8217 = vrcp.f32 %v2380_v50 }
 0x913   : > { %v2383_v46 = vpop.xlane.xlu0 %2382 }
 0x914   : > { %8219 = vrcp.f32 %v2383_v46 }
 0x916   : > { %v8216_v54 = vpop.eup %8215 }
 0x917   : > { %v2386_v25 = vpop.xlane.xlu1 %2385  ;;  %v8079_v55 = vpop.permute.xlu0 %8078  ;;  %v2391_v59 = vmul.f32 %v8216_v54, %v8210_v37 }
 0x918   : > { %8221 = vrcp.f32 %v2386_v25  ;;  %v8081_v51 = vunpack.i.h.bf16 %v8079_v55  ;;  %v8080_v60 = vunpack.i.l.bf16 %v8079_v55  ;;  %v8218_v52 = vpop.eup %8217 }
 0x919   : > { %7280 = vmatprep.mubr.msk.f32.mxu0 %vm1364_vm3, %v2391_v59  ;;  %v2392_v1 = vmul.f32 %v8218_v52, %v8208_v36 }
 0x91a   : > { %v7714_v34 = vpack.c.bf16 %v8081_v51, %v8080_v60 }
 0x91b   : > { %v8084_v61 = vpop.permute.xlu1 %8083  ;;  %v2671_v16 = vpop.permute.xlu0 %2670 }
 0x91c   : > { %v8086_v62 = vunpack.i.h.bf16 %v8084_v61  ;;  %v8085_v63 = vunpack.i.l.bf16 %v8084_v61  ;;  %7715 = vmatprep.subr.bf16.mxu0 %v7714_v34 }
 0x91d   : > { %7717 = vmatpush3.bf16.msra.mxu0 %v7714_v34 }
 0x91e   : > { %v8220_v0 = vpop.eup %8219  ;;  %v7718_v2 = vpack.c.bf16 %v8086_v62, %v8085_v63  ;;  %7290 = vmatprep.subr.mxu0 %v1187_v53 }
 0x91f   : > { %v8089_v3 = vpop.permute.xlu1 %8088  ;;  %v2393_v5 = vmul.f32 %v8220_v0, %v8212_v44  ;;  %v2762_v56 = vpop.permute.xlu0 %2761 }
 0x920   : > { %v8091_v6 = vunpack.i.h.bf16 %v8089_v3  ;;  %v8090_v7 = vunpack.i.l.bf16 %v8089_v3  ;;  %7281 = vmatmul.mubr.msk.f32.vlgmr.msra.gmra.mrb[12].mxu0 %vm1364_vm3, %v2392_v1  ;;  %7719 = vmatprep.subr.bf16.mxu1 %v7718_v2 }
 0x921   : > { %7721 = vmatpush3.bf16.msra.mxu1 %v7718_v2  ;;  %7287 = vmatprep.mubr.msk.f32.mxu1 %vm1364_vm3, %v2393_v5 }
 0x922   : > { %v8222_v8 = vpop.eup %8221  ;;  %v7722_v9 = vpack.c.bf16 %v8091_v6, %v8090_v7  ;;  %7291 = vmatpush3.msra.mxu0 %v1187_v53 }
 0x923   : > { %v8094_v10 = vpop.permute.xlu1 %8093  ;;  %v2394_v11 = vmul.f32 %v8222_v8, %v8214_v47 }
 0x924   : > { %v8096_v13 = vunpack.i.h.bf16 %v8094_v10  ;;  %v8095_v14 = vunpack.i.l.bf16 %v8094_v10  ;;  %7724 = vmatprep.subr.msk.bf16.mxu1 %vm8970_vm2, %v7722_v9 }
 0x925   : > { %7288 = vmatmul.mubr.msk.f32.vlgmr.msra.gmra.mrb[24].mxu1 %vm1364_vm3, %v2394_v11 }
 0x926   : > { %v7728_v18 = vpack.c.bf16 %v8096_v13, %v8095_v14  ;;  %7302 = vmatprep.mubr.msk.f32.mxu1 %vm1189_vm1, %v2671_v16  ;;  %v1188_v13 = vld [vmem:[%s9769_s10 + $0x18] sm:$0xff] }
 0x927   : > { %v2673_v19 = vpop.permute.xlu1 %2672 }
 0x928   : > { %7730 = vmatprep.subr.msk.bf16.mxu0 %vm8970_vm2, %v7728_v18 }
 0x92a   : > { %7727 = vmatpush3.bf16.xpose.msk.msra.mxu1 %vm8970_vm2, %v7722_v9 }
 0x92b   : > { %v2764_v38 = vpop.permute.xlu1 %2763 }
 0x931   : > { %7303 = vmatmul.mubr.msk.f32.vlgmr.msra.gmra.mrb[26].mxu1 %vm1189_vm1, %v2673_v19 }
 0x9f3   : > { %v7282_v20 = vpop.f32.mrb[12].mxu0 }
 0x9f4   : > { %v2473_v21 = vpop.f32.mrb[13].mxu0 }
 0x9f5   : > { %7292 = vmatprep.mubr.msk.f32.mxu0 %vm1189_vm1, %v2473_v21 }
 0x9f6   : > { %7293 = vmatmul.mubr.msk.f32.vlgmr.msra.gmra.mrb[8].mxu0 %vm1189_vm1, %v7282_v20  ;;  %v6710_v20 = vld [vmem:[%s9770_s11] ss:$0 sm:$0xff] }
 0x9f7   : > { %7733 = vmatpush3.bf16.xpose.msk.msra.mxu0 %vm8970_vm2, %v7728_v18 }
 0x9f8   : > { %v7289_v22 = vpop.f32.mrb[24].mxu1 }
 0x9f9   : > { %v2560_v23 = vpop.f32.mrb[25].mxu1 }
 0x9fa   : > { %7295 = vmatprep.mubr.msk.f32.mxu0 %vm1189_vm1, %v2560_v23 }
 0x9fb   : > { %7296 = vmatmul.mubr.msk.f32.gmra.mrb[10].mxu0 %vm1189_vm1, %v7289_v22 }
 0x9fc   : > { %7309 = vmatprep.mubr.msk.f32.mxu0 %vm1189_vm1, %v2762_v56 }
 0x9ff   : > { %7310 = vmatmul.mubr.msk.f32.vlgmr.msra.gmra.mrb[14].mxu0 %vm1189_vm1, %v2764_v38 }
 0xa04   : > { %v7304_v58 = vpop.f32.mrb[26].mxu1 }
 0xa05   : > { %v2752_v24 = vpop.f32.mrb[27].mxu1  ;;  %v2855_v26 = vsel %vm1364_vm3, %v7304_v58, -inf }
 0xa06   : > { %2856 = vmax.xlane.f32.xlu1 %v2855_v26  ;;  %v2852_v57 = vsel %vm1364_vm3, %v2752_v24, -inf }
 0xa07   : > { %2853 = vmax.xlane.f32.xlu0 %v2852_v57 }
 0xa93   : > { %v2857_v27 = vpop.xlane.xlu1 %2856 }
 0xa94   : > { %v2865_v28 = vsub.f32 %v7304_v58, %v2857_v27  ;;  %v2854_v33 = vpop.xlane.xlu0 %2853 }
 0xa95   : > { %v2864_v35 = vsub.f32 %v2752_v24, %v2854_v33 }
 0xa96   : > { %v2870_v29 = vmul.f32 1.442695, %v2865_v28 }
 0xa97   : > { %v2868_v36 = vmul.f32 1.442695, %v2864_v35 }
 0xa98   : > { %8223 = vpow2.f32 %v2870_v29 }
 0xa99   : > { %8225 = vpow2.f32 %v2868_v36 }
 0xaa2   : > { %v8224_v31 = vpop.eup %8223 }
 0xaa3   : > { %v2879_v32 = vsel %vm1364_vm3, %v8224_v31, 0.0  ;;  %v8226_v44 = vpop.eup %8225 }
 0xaa4   : > { %2880 = vadd.xlane.f32.xlu1 %v2879_v32  ;;  %v2876_v45 = vsel %vm1364_vm3, %v8226_v44, 0.0 }
 0xad2   : > { %v7311_v37 = vpop.f32.mrb[14].mxu0 }
 0xad3   : > { %v2843_v40 = vpop.f32.mrb[15].mxu0  ;;  %v2861_v42 = vsel %vm1364_vm3, %v7311_v37, -inf }
 0xad4   : > { %v2858_v41 = vsel %vm1364_vm3, %v2843_v40, -inf }
 0xad5   : > { %2859 = vmax.xlane.f32.xlu0 %v2858_v41 }
 0xad9   : > { %2862 = vmax.xlane.f32.xlu0 %v2861_v42 }
 0xadd   : > { %2877 = vadd.xlane.f32.xlu0 %v2876_v45 }
 0xb31   : > { %v2881_v61 = vpop.xlane.xlu1 %2880 }
 0xb62   : > { %v2860_v47 = vpop.xlane.xlu0 %2859 }
 0xb63   : > { %v2866_v48 = vsub.f32 %v2843_v40, %v2860_v47 }
 0xb65   : > { %v2872_v49 = vmul.f32 1.442695, %v2866_v48 }
 0xb66   : > { %v2863_v50 = vpop.xlane.xlu0 %2862 }
 0xb67   : > { %8227 = vpow2.f32 %v2872_v49  ;;  %v2867_v46 = vsub.f32 %v7311_v37, %v2863_v50 }
 0xb69   : > { %v2874_v54 = vmul.f32 1.442695, %v2867_v46 }
 0xb6a   : > { %v2878_v25 = vpop.xlane.xlu0 %2877 }
 0xb6b   : > { %8229 = vpow2.f32 %v2874_v54 }
 0xb6c   : > { %8231 = vrcp.f32 %v2878_v25 }
 0xb6d   : > { %8233 = vrcp.f32 %v2881_v61  ;;  %v3263_v61 = vld [vmem:[#allocation8 + $0x18] sm:$0xff] }
 0xb71   : > { %v8228_v55 = vpop.eup %8227 }
 0xb72   : > { %v2882_v59 = vsel %vm1364_vm3, %v8228_v55, 0.0 }
 0xb73   : > { %2883 = vadd.xlane.f32.xlu0 %v2882_v59 }
 0xb75   : > { %v8230_v51 = vpop.eup %8229 }
 0xb76   : > { %v8232_v60 = vpop.eup %8231  ;;  %v2885_v34 = vsel %vm1364_vm3, %v8230_v51, 0.0 }
 0xb77   : > { %2886 = vadd.xlane.f32.xlu1 %v2885_v34  ;;  %v2892_v52 = vmul.f32 %v8232_v60, %v8226_v44  ;;  %v8234_v3 = vpop.eup %8233  ;;  %v3261_v60 = vld [vmem:[#allocation8 + $0x8] sm:$0xff] }
 0xb78   : > { %v2893_v8 = vmul.f32 %v8234_v3, %v8224_v31 }
 0xb79   : > { %7316 = vmatprep.mubr.msk.f32.mxu1 %vm1364_vm3, %v2892_v52  ;;  %v3262_v52 = vld [vmem:[#allocation8 + $0x10] sm:$0xff] }
 0xb88   : > { %8103 = vrot.lane.b32.xlu1 %v8966_v39, %s9808_s24 }
 0xb89   : > { %8098 = vrot.lane.b32.xlu0 %v8955_v30, %s9808_s24  ;;  %s790_s24 = scalar_lea.vmem [#allocation10], %s6625_s3  ;;  %s9718_s3 = scalar_lea.sflag [#allocation4], %s788_s2 }
 0xc00   : > { %v2884_v53 = vpop.xlane.xlu0 %2883 }
 0xc01   : > { %8235 = vrcp.f32 %v2884_v53  ;;  %v7746_v53 = vpack.c.bf16 %v3263_v61, %v3262_v52 }
 0xc04   : > { %v2887_v62 = vpop.xlane.xlu1 %2886  ;;  %v8099_v63 = vpop.permute.xlu0 %8098 }
 0xc05   : > { %8237 = vrcp.f32 %v2887_v62  ;;  %v8101_v0 = vunpack.i.h.bf16 %v8099_v63  ;;  %v8100_v1 = vunpack.i.l.bf16 %v8099_v63  ;;  %v3404_v62 = vld [vmem:[%s9775_s16] sm:$0xff]  ;;  %v3405_v63 = vld [vmem:[%s9775_s16 + $0x8] sm:$0xff] }
 0xc07   : > { %v7734_v2 = vpack.c.bf16 %v8101_v0, %v8100_v1  ;;  %v7750_v0 = vpack.c.bf16 %v3405_v63, %v3404_v62 }
 0xc08   : > { %v8104_v5 = vpop.permute.xlu1 %8103 }
 0xc09   : > { %v8106_v6 = vunpack.i.h.bf16 %v8104_v5  ;;  %v8105_v7 = vunpack.i.l.bf16 %v8104_v5  ;;  %7735 = vmatprep.subr.bf16.mxu1 %v7734_v2 }
 0xc0a   : > { %7737 = vmatpush3.bf16.msra.mxu1 %v7734_v2 }
 0xc0b   : > { %v8236_v39 = vpop.eup %8235  ;;  %v7738_v9 = vpack.c.bf16 %v8106_v6, %v8105_v7 }
 0xc0c   : > { %v2894_v30 = vmul.f32 %v8236_v39, %v8228_v55 }
 0xc0d   : > { %7317 = vmatmul.mubr.msk.f32.vlgmr.msra.gmra.mrb[28].mxu1 %vm1364_vm3, %v2893_v8  ;;  %7739 = vmatprep.subr.bf16.mxu0 %v7738_v9 }
 0xc0e   : > { %7741 = vmatpush3.bf16.msra.mxu0 %v7738_v9  ;;  %7323 = vmatprep.mubr.msk.f32.mxu0 %vm1364_vm3, %v2894_v30 }
 0xc0f   : > { %v8238_v10 = vpop.eup %8237  ;;  %7326 = vmatprep.subr.mxu0 %v1188_v13 }
 0xc10   : > { %v2895_v11 = vmul.f32 %v8238_v10, %v8230_v51  ;;  %v3260_v51 = vld [vmem:[#allocation8] sm:$0xff] }
 0xc11   : > { %v7742_v34 = vpack.c.bf16 %v3261_v60, %v3260_v51 }
 0xc12   : > { %7324 = vmatmul.mubr.msk.f32.vlgmr.msra.gmra.mrb[16].mxu0 %vm1364_vm3, %v2895_v11 }
 0xc13   : > { %7327 = vmatpush3.msra.mxu0 %v1188_v13  ;;  %7743 = vmatprep.subr.bf16.mxu1 %v7742_v34 }
 0xc14   : > { %7745 = vmatpush3.bf16.msra.mxu1 %v7742_v34  ;;  %7751 = vmatprep.subr.bf16.mxu0 %v7750_v0 }
 0xc15   : > { %7747 = vmatprep.subr.bf16.mxu1 %v7746_v53 }
 0xc18   : > { %7749 = vmatpush3.bf16.msra.mxu1 %v7746_v53 }
 0xce0   : > { %v7318_v14 = vpop.f32.mrb[28].mxu1 }
 0xce1   : > { %v2974_v16 = vpop.f32.mrb[29].mxu1 }
 0xce2   : > { %7328 = vmatprep.mubr.msk.f32.mxu0 %vm1189_vm1, %v2974_v16 }
 0xce3   : > { %7329 = vmatmul.mubr.msk.f32.vlgmr.msra.gmra.mrb[8].mxu0 %vm1189_vm1, %v7318_v14  ;;  %v6711_v14 = vld [vmem:[%s9771_s12] ss:$0 sm:$0xff] }
 0xce4   : > { %7753 = vmatpush3.bf16.msra.mxu0 %v7750_v0 }
 0xce5   : > { %v7325_v18 = vpop.f32.mrb[16].mxu0 }
 0xce6   : > { %v3061_v19 = vpop.f32.mrb[17].mxu0 }
 0xce7   : > { %7331 = vmatprep.mubr.msk.f32.mxu0 %vm1189_vm1, %v3061_v19 }
 0xce8   : > { %7332 = vmatmul.mubr.msk.f32.gmra.mrb[10].mxu0 %vm1189_vm1, %v7325_v18 }
 0xdb6   : > { %v7330_v21 = vpop.f32.mrb[8].mxu0 }
 0xdb7   : > { %v3179_v22 = vadd.f32 %v7330_v21, %v6710_v20  ;;  %v3148_v23 = vpop.f32.mrb[9].mxu0 }
 0xdb8   : > { %v3178_v56 = vadd.f32 %v6710_v20, %v3148_v23 }
 0xdb9   : > { %v3183_v38 = vadd.f32 %v3179_v22, %v8921_v12 }
 0xdba   : > { %v3182_v58 = vadd.f32 %v3178_v56, %v8908_v4 }
 0xdbb   : > { %v7333_v24 = vpop.f32.mrb[10].mxu0  ;;  %v3191_v26 = vsel %vm811_vm0, %v3183_v38, 0.0 }
 0xdbc   : > { %v3181_v57 = vadd.f32 %v7333_v24, %v6710_v20  ;;  %3192 = vadd.xlane.f32.xlu0 %v3191_v26  ;;  %v3158_v27 = vpop.f32.mrb[11].mxu0  ;;  %v3188_v28 = vsel %vm811_vm0, %v3182_v58, 0.0 }
 0xdbd   : > { %v3180_v29 = vadd.f32 %v6710_v20, %v3158_v27  ;;  %3189 = vadd.xlane.f32.xlu1 %v3188_v28  ;;  %v6712_v20 = vld [vmem:[%s9772_s13] ss:$0 sm:$0xff] }
 0xdbe   : > { %v3185_v31 = vadd.f32 %v3181_v57, %v8934_v17 }
 0xdbf   : > { %v3184_v32 = vadd.f32 %v3180_v29, %v8924_v15 }
 0xdc0   : > { %v3197_v33 = vsel %vm811_vm0, %v3185_v31, 0.0 }
 0xdc1   : > { %3198 = vadd.xlane.f32.xlu1 %v3197_v33  ;;  %v3194_v12 = vsel %vm811_vm0, %v3184_v32, 0.0 }
 0xdc2   : > { %3195 = vadd.xlane.f32.xlu0 %v3194_v12  ;;  %v3408_v12 = vld [vmem:[%s9775_s16 + $0x20] sm:$0xff] }
 0xe49   : > { %v3193_v4 = vpop.xlane.xlu0 %3192 }
 0xe4a   : > { %v3201_v35 = vmul.f32 0.03125, %v3193_v4  ;;  %v3190_v36 = vpop.xlane.xlu1 %3189  ;;  %v3409_v4 = vld [vmem:[%s9775_s16 + $0x28] sm:$0xff] }
 0xe4b   : > { %v3200_v37 = vmul.f32 0.03125, %v3190_v36  ;;  %v3410_v36 = vld [vmem:[%s9775_s16 + $0x30] sm:$0xff] }
 0xe4c   : > { %v3205_v40 = vsub.f32 %v3183_v38, %v3201_v35  ;;  %v7758_v35 = vpack.c.bf16 %v3409_v4, %v3408_v12 }
 0xe4d   : > { %v3204_v41 = vsub.f32 %v3182_v58, %v3200_v37  ;;  %v3411_v37 = vld [vmem:[%s9775_s16 + $0x38] sm:$0xff] }
 0xe4e   : > { %v3199_v42 = vpop.xlane.xlu1 %3198  ;;  %v3209_v44 = vmul.f32 %v3205_v40, %v3205_v40 }
 0xe4f   : > { %v3203_v45 = vmul.f32 0.03125, %v3199_v42  ;;  %v3196_v47 = vpop.xlane.xlu0 %3195  ;;  %v3208_v48 = vmul.f32 %v3204_v41, %v3204_v41  ;;  %v3413_v42 = vld [vmem:[%s9775_s16 + $0x48] sm:$0xff] }
 0xe50   : > { %v3202_v17 = vmul.f32 0.03125, %v3196_v47  ;;  %v3215_v15 = vsel %vm811_vm0, %v3209_v44, 0.0  ;;  %v3415_v47 = vld [vmem:[%s9775_s16 + $0x58] sm:$0xff] }
 0xe51   : > { %v3207_v49 = vsub.f32 %v3185_v31, %v3203_v45  ;;  %3216 = vadd.xlane.f32.xlu1 %v3215_v15  ;;  %v3212_v50 = vsel %vm811_vm0, %v3208_v48, 0.0  ;;  %v3406_v31 = vld [vmem:[%s9775_s16 + $0x10] sm:$0xff]  ;;  %v3417_v15 = vld [vmem:[%s9775_s16 + $0x68] sm:$0xff] }
 0xe52   : > { %v3206_v46 = vsub.f32 %v3184_v32, %v3202_v17  ;;  %3213 = vadd.xlane.f32.xlu0 %v3212_v50  ;;  %v3407_v32 = vld [vmem:[%s9775_s16 + $0x18] sm:$0xff]  ;;  %v3414_v45 = vld [vmem:[%s9775_s16 + $0x50] sm:$0xff]  ;;  %v3416_v17 = vld [vmem:[%s9775_s16 + $0x60] sm:$0xff] }
 0xe53   : > { %v3211_v54 = vmul.f32 %v3207_v49, %v3207_v49  ;;  %v7754_v33 = vpack.c.bf16 %v3407_v32, %v3406_v31  ;;  %v7770_v48 = vpack.c.bf16 %v3415_v47, %v3414_v45  ;;  %v3418_v50 = vld [vmem:[%s9775_s16 + $0x70] sm:$0xff] }
 0xe54   : > { %v3210_v25 = vmul.f32 %v3206_v46, %v3206_v46 }
 0xe55   : > { %v3221_v55 = vsel %vm811_vm0, %v3211_v54, 0.0  ;;  %7755 = vmatprep.subr.bf16.mxu0 %v7754_v33 }
 0xe56   : > { %3222 = vadd.xlane.f32.xlu1 %v3221_v55  ;;  %v3218_v59 = vsel %vm811_vm0, %v3210_v25, 0.0  ;;  %7757 = vmatpush3.bf16.msra.mxu0 %v7754_v33  ;;  %v6713_v25 = vld [vmem:[%s9774_s15] ss:$0 sm:$0xff] }
 0xe57   : > { %3219 = vadd.xlane.f32.xlu0 %v3218_v59  ;;  %7759 = vmatprep.subr.bf16.mxu0 %v7758_v35 }
 0xe5a   : > { %7761 = vmatpush3.bf16.msra.mxu0 %v7758_v35 }
 0xede   : > { %v3217_v1 = vpop.xlane.xlu1 %3216 }
 0xedf   : > { %v3225_v2 = vmul.f32 0.03125, %v3217_v1  ;;  %v3214_v3 = vpop.xlane.xlu0 %3213 }
 0xee0   : > { %v3224_v5 = vmul.f32 0.03125, %v3214_v3 }
 0xee1   : > { %v3229_v6 = vadd.f32 1e-05, %v3225_v2 }
 0xee2   : > { %v3228_v7 = vadd.f32 1e-05, %v3224_v5 }
 0xee3   : > { %8239 = vrsqrt.f32 %v3229_v6  ;;  %v3223_v39 = vpop.xlane.xlu1 %3222 }
 0xee4   : > { %8241 = vrsqrt.f32 %v3228_v7  ;;  %v3227_v8 = vmul.f32 0.03125, %v3223_v39  ;;  %v3220_v9 = vpop.xlane.xlu0 %3219 }
 0xee5   : > { %v3226_v30 = vmul.f32 0.03125, %v3220_v9 }
 0xee6   : > { %v3231_v10 = vadd.f32 1e-05, %v3227_v8 }
 0xee7   : > { %v3230_v11 = vadd.f32 1e-05, %v3226_v30 }
 0xee8   : > { %8243 = vrsqrt.f32 %v3231_v10 }
 0xee9   : > { %8245 = vrsqrt.f32 %v3230_v11 }
 0xeed   : > { %v8240_v13 = vpop.eup %8239 }
 0xeee   : > { %v8242_v16 = vpop.eup %8241  ;;  %v3237_v18 = vmul.f32 %v8240_v13, %v3205_v40  ;;  %v7762_v40 = vpack.c.bf16 %v3411_v37, %v3410_v36  ;;  %v6718_v37 = vld [vmem:[%s9776_s17] ss:$0 sm:$0xff] }
 0xeef   : > { %v3236_v19 = vmul.f32 %v8242_v16, %v3204_v41  ;;  %v3412_v41 = vld [vmem:[%s9775_s16 + $0x40] sm:$0xff] }
 0xef0   : > { %v3247_v21 = vmul.f32 %v6711_v14, %v3237_v18  ;;  %7763 = vmatprep.subr.bf16.mxu0 %v7762_v40  ;;  %v7766_v44 = vpack.c.bf16 %v3413_v42, %v3412_v41 }
 0xef1   : > { %v3246_v22 = vmul.f32 %v6711_v14, %v3236_v19  ;;  %7765 = vmatpush3.bf16.msra.mxu0 %v7762_v40 }
 0xef2   : > { %v8244_v23 = vpop.eup %8243  ;;  %v9197_v24 = vadd.f32 %v6712_v20, %v3247_v21  ;;  %7767 = vmatprep.subr.bf16.mxu0 %v7766_v44 }
 0xef3   : > { %v8246_v56 = vpop.eup %8245  ;;  %v9195_v38 = vadd.f32 %v6712_v20, %v3246_v22  ;;  %v3239_v58 = vmul.f32 %v8244_v23, %v3207_v49  ;;  %v7774_v49 = vpack.c.bf16 %v3417_v15, %v3416_v17 }
 0xef4   : > { %v3238_v26 = vmul.f32 %v8246_v56, %v3206_v46  ;;  %v3419_v46 = vld [vmem:[%s9775_s16 + $0x78] sm:$0xff] }
 0xef5   : > { %7342 = vmatprep.mubr.msk.f32.mxu1 %vm811_vm0, %v9195_v38  ;;  %v3249_v57 = vmul.f32 %v6711_v14, %v3239_v58  ;;  %7769 = vmatpush3.bf16.msra.mxu0 %v7766_v44  ;;  %v7778_v54 = vpack.c.bf16 %v3419_v46, %v3418_v50 }
 0xef6   : > { %7343 = vmatmul.mubr.msk.f32.vlgmr.msra.gmra.mrb[30].mxu1 %vm811_vm0, %v9197_v24  ;;  %v3248_v27 = vmul.f32 %v6711_v14, %v3238_v26  ;;  %7771 = vmatprep.subr.bf16.mxu0 %v7770_v48 }
 0xef7   : > { %v9205_v29 = vadd.f32 %v6712_v20, %v3249_v57 }
 0xef8   : > { %v9203_v28 = vadd.f32 %v6712_v20, %v3248_v27 }
 0xef9   : > { %7773 = vmatpush3.bf16.msra.mxu0 %v7770_v48 }
 0xefa   : > { %7345 = vmatprep.mubr.msk.f32.mxu1 %vm811_vm0, %v9203_v28  ;;  %7775 = vmatprep.subr.bf16.mxu0 %v7774_v49 }
 0xefb   : > { %7346 = vmatmul.mubr.msk.f32.gmra.mrb[32].mxu1 %vm811_vm0, %v9205_v29 }
 0xefd   : > { %7777 = vmatpush3.bf16.msra.mxu0 %v7774_v49 }
 0xefe   : > { %7779 = vmatprep.subr.bf16.mxu0 %v7778_v54 }
 0xf01   : > { %7781 = vmatpush3.bf16.msra.mxu0 %v7778_v54 }
 0xfc9   : > { %v7344_v55 = vpop.f32.mrb[30].mxu1 }
 0xfca   : > { %v3355_v59 = vadd.f32 %v7344_v55, %v6713_v25  ;;  %v3349_v51 = vpop.f32.mrb[31].mxu1 }
 0xfcb   : > { %v3350_v60 = vadd.f32 %v6713_v25, %v3349_v51 }
 0xfcc   : > { %v3373_v34 = vmul.f32 0.044715, %v3355_v59  ;;  %v3369_v58 = vmul.f32 0.5, %v3355_v59 }
 0xfcd   : > { %v3372_v52 = vmul.f32 0.044715, %v3350_v60  ;;  %v3368_v23 = vmul.f32 0.5, %v3350_v60 }
 0xfce   : > { %v3377_v61 = vmul.f32 %v3373_v34, %v3355_v59  ;;  %v7347_v53 = vpop.f32.mrb[32].mxu1 }
 0xfcf   : > { %v3376_v62 = vmul.f32 %v3372_v52, %v3350_v60  ;;  %v3365_v63 = vadd.f32 %v7347_v53, %v6713_v25  ;;  %v3359_v0 = vpop.f32.mrb[33].mxu1 }
 0xfd0   : > { %v3381_v1 = vmul.f32 %v3377_v61, %v3355_v59  ;;  %v3360_v2 = vadd.f32 %v6713_v25, %v3359_v0 }
 0xfd1   : > { %v3375_v3 = vmul.f32 0.044715, %v3365_v63  ;;  %v3380_v5 = vmul.f32 %v3376_v62, %v3350_v60  ;;  %v3371_v4 = vmul.f32 0.5, %v3365_v63 }
 0xfd2   : > { %v3385_v6 = vadd.f32 %v3381_v1, %v3355_v59  ;;  %v3374_v7 = vmul.f32 0.044715, %v3360_v2  ;;  %v3370_v33 = vmul.f32 0.5, %v3360_v2 }
 0xfd3   : > { %v3379_v39 = vmul.f32 %v3375_v3, %v3365_v63  ;;  %v3384_v8 = vadd.f32 %v3380_v5, %v3350_v60 }
 0xfd4   : > { %v3389_v9 = vmul.f32 0.7978846, %v3385_v6  ;;  %v3378_v30 = vmul.f32 %v3374_v7, %v3360_v2 }
 0xfd5   : > { %v3388_v10 = vmul.f32 0.7978846, %v3384_v8  ;;  %v3383_v11 = vmul.f32 %v3379_v39, %v3365_v63  ;;  %v6721_v8 = vld [vmem:[%s9850_s1 + $0x20] sm:$0xff] }
 0xfd6   : > { %8247 = vtanh.f32 %v3389_v9  ;;  %v3382_v13 = vmul.f32 %v3378_v30, %v3360_v2  ;;  %v6722_v9 = vld [vmem:[%s9850_s1 + $0x28] sm:$0xff] }
 0xfd7   : > { %8249 = vtanh.f32 %v3388_v10  ;;  %v3387_v14 = vadd.f32 %v3383_v11, %v3365_v63  ;;  %v7782_v30 = vpack.c.bf16 %v6722_v9, %v6721_v8  ;;  %v6723_v10 = vld [vmem:[%s9850_s1 + $0x30] sm:$0xff]  ;;  %v6724_v11 = vld [vmem:[%s9850_s1 + $0x38] sm:$0xff] }
 0xfd8   : > { %v3386_v16 = vadd.f32 %v3382_v13, %v3360_v2  ;;  %v7786_v13 = vpack.c.bf16 %v6724_v11, %v6723_v10  ;;  %v6745_v10 = vld [vmem:[#allocation7 + $0x1] ss:$0 sm:$0xff] }
 0xfd9   : > { %v3391_v18 = vmul.f32 0.7978846, %v3387_v14  ;;  %7783 = vmatprep.subr.bf16.mxu1 %v7782_v30  ;;  %v6731_v14 = vld [vmem:[%s9852_s29 + $0x20] sm:$0xff] }
 0xfda   : > { %v3390_v19 = vmul.f32 0.7978846, %v3386_v16  ;;  %7785 = vmatpush3.bf16.msra.mxu1 %v7782_v30  ;;  %v6732_v16 = vld [vmem:[%s9852_s29 + $0x28] sm:$0xff] }
 0xfdb   : > { %8251 = vtanh.f32 %v3391_v18  ;;  %7787 = vmatprep.subr.bf16.mxu1 %v7786_v13  ;;  %v7790_v18 = vpack.c.bf16 %v6732_v16, %v6731_v14 }
 0xfdc   : > { %8253 = vtanh.f32 %v3390_v19 }
 0xfde   : > { %7789 = vmatpush3.bf16.msra.mxu1 %v7786_v13 }
 0xfdf   : > { %7791 = vmatprep.subr.bf16.mxu1 %v7790_v18 }
 0xfe0   : > { %v8248_v20 = vpop.eup %8247 }
 0xfe1   : > { %v8250_v21 = vpop.eup %8249  ;;  %v3397_v22 = vadd.f32 1.0, %v8248_v20 }
 0xfe2   : > { %v3396_v56 = vadd.f32 1.0, %v8250_v21 }
 0xfe3   : > { %v3401_v27 = vmul.f32 %v3397_v22, %v3369_v58 }
 0xfe4   : > { %v3400_v26 = vmul.f32 %v3396_v56, %v3368_v23 }
 0xfe5   : > { %v8252_v57 = vpop.eup %8251 }
 0xfe6   : > { %v8254_v31 = vpop.eup %8253  ;;  %7380 = vmatprep.mubr.f32.mxu0 %v3400_v26  ;;  %v3399_v32 = vadd.f32 1.0, %v8252_v57 }
 0xfe7   : > { %7381 = vmatmul.mubr.f32.vlgmr.msra.gmra.mrb[18].mxu0 %v3401_v27  ;;  %v3398_v12 = vadd.f32 1.0, %v8254_v31 }
 0xfe8   : > { %v3403_v36 = vmul.f32 %v3399_v32, %v3371_v4 }
 0xfe9   : > { %v3402_v35 = vmul.f32 %v3398_v12, %v3370_v33  ;;  %v6719_v12 = vld [vmem:[%s9777_s18] ss:$0 sm:$0xff] }
 0xfeb   : > { %7383 = vmatprep.mubr.f32.mxu0 %v3402_v35 }
 0xfec   : > { %7384 = vmatmul.mubr.f32.gmra.mrb[20].mxu0 %v3403_v36 }
0x10ba   : > { %v7382_v40 = vpop.f32.mrb[18].mxu0 }
0x10bb   : > { %v3499_v41 = vadd.f32 %v7382_v40, %v6718_v37  ;;  %v3493_v42 = vpop.f32.mrb[19].mxu0 }
0x10bc   : > { %v3494_v44 = vadd.f32 %v6718_v37, %v3493_v42  ;;  %v6733_v42 = vld [vmem:[%s9852_s29 + $0x30] sm:$0xff] }
0x10bd   : > { %v3513_v45 = vadd.f32 %v3499_v41, %v9197_v24 }
0x10be   : > { %v3512_v47 = vadd.f32 %v3494_v44, %v9195_v38  ;;  %v6734_v44 = vld [vmem:[%s9852_s29 + $0x38] sm:$0xff] }
0x10bf   : > { %v7385_v48 = vpop.f32.mrb[20].mxu0  ;;  %v3521_v17 = vsel %vm811_vm0, %v3513_v45, 0.0 }
0x10c0   : > { %v3509_v15 = vadd.f32 %v7385_v48, %v6718_v37  ;;  %3522 = vadd.xlane.f32.xlu1 %v3521_v17  ;;  %v3503_v49 = vpop.f32.mrb[21].mxu0  ;;  %v3518_v50 = vsel %vm811_vm0, %v3512_v47, 0.0 }
0x10c1   : > { %v3504_v46 = vadd.f32 %v6718_v37, %v3503_v49  ;;  %3519 = vadd.xlane.f32.xlu0 %v3518_v50  ;;  %v6720_v37 = vld [vmem:[%s9778_s19] ss:$0 sm:$0xff]  ;;  %v7794_v50 = vpack.c.bf16 %v6734_v44, %v6733_v42 }
0x10c2   : > { %v3515_v54 = vadd.f32 %v3509_v15, %v9205_v29 }
0x10c3   : > { %v3514_v25 = vadd.f32 %v3504_v46, %v9203_v28 }
0x10c4   : > { %v3527_v55 = vsel %vm811_vm0, %v3515_v54, 0.0 }
0x10c5   : > { %3528 = vadd.xlane.f32.xlu1 %v3527_v55  ;;  %v3524_v24 = vsel %vm811_vm0, %v3514_v25, 0.0  ;;  %v6742_v55 = vld [vmem:[%s9851_s0 + $0x28] sm:$0xff] }
0x10c6   : > { %3525 = vadd.xlane.f32.xlu0 %v3524_v24 }
0x114d   : > { %v3523_v38 = vpop.xlane.xlu1 %3522 }
0x114e   : > { %v3531_v59 = vmul.f32 0.03125, %v3523_v38  ;;  %v3520_v51 = vpop.xlane.xlu0 %3519 }
0x114f   : > { %v3530_v60 = vmul.f32 0.03125, %v3520_v51  ;;  %v6743_v51 = vld [vmem:[%s9851_s0 + $0x30] sm:$0xff] }
0x1150   : > { %v3535_v34 = vsub.f32 %v3513_v45, %v3531_v59 }
0x1151   : > { %v3534_v52 = vsub.f32 %v3512_v47, %v3530_v60  ;;  %v6744_v60 = vld [vmem:[%s9851_s0 + $0x38] sm:$0xff] }
0x1152   : > { %v3529_v61 = vpop.xlane.xlu1 %3528  ;;  %v3539_v53 = vmul.f32 %v3535_v34, %v3535_v34 }
0x1153   : > { %v3533_v62 = vmul.f32 0.03125, %v3529_v61  ;;  %v3526_v63 = vpop.xlane.xlu0 %3525  ;;  %v3538_v0 = vmul.f32 %v3534_v52, %v3534_v52 }
0x1154   : > { %v3532_v29 = vmul.f32 0.03125, %v3526_v63  ;;  %v3545_v28 = vsel %vm811_vm0, %v3539_v53, 0.0 }
0x1155   : > { %v3537_v1 = vsub.f32 %v3515_v54, %v3533_v62  ;;  %3546 = vadd.xlane.f32.xlu1 %v3545_v28  ;;  %v3542_v2 = vsel %vm811_vm0, %v3538_v0, 0.0  ;;  %v6736_v28 = vld [vmem:[%s9856_s21 + $0x1] ss:$0 sm:$0xff] }
0x1156   : > { %v3536_v3 = vsub.f32 %v3514_v25, %v3532_v29  ;;  %3543 = vadd.xlane.f32.xlu0 %v3542_v2  ;;  %v6741_v25 = vld [vmem:[%s9851_s0 + $0x20] sm:$0xff] }
0x1157   : > { %v3541_v5 = vmul.f32 %v3537_v1, %v3537_v1  ;;  %v7798_v59 = vpack.c.bf16 %v6742_v55, %v6741_v25 }
0x1158   : > { %v3540_v6 = vmul.f32 %v3536_v3, %v3536_v3 }
0x1159   : > { %v3551_v7 = vsel %vm811_vm0, %v3541_v5, 0.0 }
0x115a   : > { %3552 = vadd.xlane.f32.xlu1 %v3551_v7  ;;  %v3548_v39 = vsel %vm811_vm0, %v3540_v6, 0.0 }
0x115b   : > { %3549 = vadd.xlane.f32.xlu0 %v3548_v39 }
0x11e2   : > { %v3547_v19 = vpop.xlane.xlu1 %3546 }
0x11e3   : > { %v3555_v20 = vmul.f32 0.03125, %v3547_v19  ;;  %v3544_v21 = vpop.xlane.xlu0 %3543 }
0x11e4   : > { %v3554_v22 = vmul.f32 0.03125, %v3544_v21 }
0x11e5   : > { %v3559_v23 = vadd.f32 1e-05, %v3555_v20 }
0x11e6   : > { %v3558_v56 = vadd.f32 1e-05, %v3554_v22 }
0x11e7   : > { %8255 = vrsqrt.f32 %v3559_v23  ;;  %v3553_v58 = vpop.xlane.xlu1 %3552 }
0x11e8   : > { %8257 = vrsqrt.f32 %v3558_v56  ;;  %v3557_v26 = vmul.f32 0.03125, %v3553_v58  ;;  %v3550_v57 = vpop.xlane.xlu0 %3549 }
0x11e9   : > { %v3556_v27 = vmul.f32 0.03125, %v3550_v57 }
0x11ea   : > { %v3561_v31 = vadd.f32 1e-05, %v3557_v26 }
0x11eb   : > { %v3560_v32 = vadd.f32 1e-05, %v3556_v27 }
0x11ec   : > { %8259 = vrsqrt.f32 %v3561_v31 }
0x11ed   : > { %8261 = vrsqrt.f32 %v3560_v32 }
0x11f1   : > { %v8256_v33 = vpop.eup %8255 }
0x11f2   : > { %v8258_v4 = vpop.eup %8257  ;;  %v3567_v35 = vmul.f32 %v8256_v33, %v3535_v34  ;;  %v7802_v34 = vpack.c.bf16 %v6744_v60, %v6743_v51 }
0x11f3   : > { %v3566_v36 = vmul.f32 %v8258_v4, %v3534_v52  ;;  %v6726_v52 = vld [vmem:[%s9854_s30 + $0x1] ss:$0 sm:$0xff] }
0x11f4   : > { %v3577_v40 = vmul.f32 %v6719_v12, %v3567_v35 }
0x11f5   : > { %v3576_v41 = vmul.f32 %v6719_v12, %v3566_v36 }
0x11f6   : > { %v8260_v45 = vpop.eup %8259  ;;  %v9303_v15 = vadd.f32 %v6720_v37, %v3577_v40 }
0x11f7   : > { %v8262_v47 = vpop.eup %8261  ;;  %v9301_v48 = vadd.f32 %v6720_v37, %v3576_v41  ;;  %v3569_v17 = vmul.f32 %v8260_v45, %v3537_v1 }
0x11f8   : > { %v3568_v49 = vmul.f32 %v8262_v47, %v3536_v3 }
0x11f9   : > { %7394 = vmatprep.mubr.msk.f32.mxu1 %vm811_vm0, %v9301_v48  ;;  %v3579_v46 = vmul.f32 %v6719_v12, %v3569_v17 }
0x11fa   : > { %7395 = vmatmul.mubr.msk.f32.vlgmr.msra.gmra.mrb[34].mxu1 %vm811_vm0, %v9303_v15  ;;  %v3578_v54 = vmul.f32 %v6719_v12, %v3568_v49 }
0x11fb   : > { %7793 = vmatpush3.bf16.msra.mxu1 %v7790_v18  ;;  %v9317_v38 = vadd.f32 %v6720_v37, %v3579_v46 }
0x11fc   : > { %v9315_v24 = vadd.f32 %v6720_v37, %v3578_v54  ;;  %7795 = vmatprep.subr.bf16.mxu1 %v7794_v50 }
0x11fe   : > { %7397 = vmatprep.mubr.msk.f32.mxu1 %vm811_vm0, %v9315_v24 }
0x11ff   : > { %7398 = vmatmul.mubr.msk.f32.gmra.mrb[36].mxu1 %vm811_vm0, %v9317_v38 }
0x1200   : > { %7797 = vmatpush3.bf16.msra.mxu1 %v7794_v50  ;;  %7408 = vmatprep.mubr.msk.f32.mxu1 %vm811_vm0, %v9301_v48 }
0x1201   : > { %7799 = vmatprep.subr.bf16.mxu1 %v7798_v59 }
0x1203   : > { %7409 = vmatmul.mubr.msk.f32.vlgmr.msra.gmra.mrb[38].mxu1 %vm811_vm0, %v9303_v15 }
0x1204   : > { %7411 = vmatprep.mubr.msk.f32.mxu1 %vm811_vm0, %v9315_v24  ;;  %7801 = vmatpush3.bf16.msra.mxu1 %v7798_v59 }
0x1205   : > { %7803 = vmatprep.subr.bf16.mxu1 %v7802_v34 }
0x1207   : > { %7412 = vmatmul.mubr.msk.f32.gmra.mrb[40].mxu1 %vm811_vm0, %v9317_v38 }
0x1208   : > { %7805 = vmatpush3.bf16.msra.mxu1 %v7802_v34  ;;  %7422 = vmatprep.mubr.msk.f32.mxu1 %vm811_vm0, %v9301_v48 }
0x120b   : > { %7423 = vmatmul.mubr.msk.f32.vlgmr.msra.gmra.mrb[42].mxu1 %vm811_vm0, %v9303_v15 }
0x120c   : > { %7425 = vmatprep.mubr.msk.f32.mxu1 %vm811_vm0, %v9315_v24 }
0x120f   : > { %7426 = vmatmul.mubr.msk.f32.gmra.mrb[44].mxu1 %vm811_vm0, %v9317_v38 }
0x12cd   : > { %v7396_v61 = vpop.f32.mrb[34].mxu1 }
0x12ce   : > { %v3681_v53 = vpop.f32.mrb[35].mxu1  ;;  %v9369_v20 = vadd.f32 %v7396_v61, %v6726_v52 }
0x12cf   : > { %v9348_v62 = vadd.f32 %v6726_v52, %v3681_v53 }
0x12d1   : > { %7432 = vmatprep.mubr.msk.f32.mxu1 %vm1189_vm1, %v9348_v62 }
0x12d2   : > { %v7399_v63 = vpop.f32.mrb[36].mxu1 }
0x12d3   : > { %v3691_v0 = vpop.f32.mrb[37].mxu1  ;;  %v9377_v57 = vadd.f32 %v7399_v63, %v6726_v52 }
0x12d4   : > { %v9352_v29 = vadd.f32 %v6726_v52, %v3691_v0 }
0x12d6   : > { %v7410_v1 = vpop.f32.mrb[38].mxu1  ;;  %7439 = vmatprep.mubr.msk.f32.mxu0 %vm1189_vm1, %v9352_v29 }
0x12d7   : > { %v3785_v2 = vadd.f32 %v7410_v1, %v6736_v28  ;;  %v3779_v3 = vpop.f32.mrb[39].mxu1 }
0x12d8   : > { %v3780_v5 = vadd.f32 %v6736_v28, %v3779_v3 }
0x12da   : > { %v7413_v6 = vpop.f32.mrb[40].mxu1  ;;  %v7806_v7 = vpack.c.bf16 %v3785_v2, %v3780_v5  ;;  %v9359_v39 = vpack.i.bf16 %v3785_v2, %v3780_v5 }
0x12db   : > { %v3795_v8 = vadd.f32 %v7413_v6, %v6736_v28  ;;  %v3789_v9 = vpop.f32.mrb[41].mxu1 }
0x12dc   : > { %v3790_v30 = vadd.f32 %v6736_v28, %v3789_v9  ;;  %7808 = vmatprep.subr.msk.bf16.mxu1 %vm8970_vm2, %v7806_v7 }
0x12dd   : > { %7811 = vmatpush3.bf16.xpose.msk.msra.mxu1 %vm8970_vm2, %v7806_v7 }
0x12de   : > { %v7424_v11 = vpop.f32.mrb[42].mxu1  ;;  %v7812_v13 = vpack.c.bf16 %v3795_v8, %v3790_v30  ;;  %v9365_v14 = vpack.i.bf16 %v3795_v8, %v3790_v30 }
0x12df   : > { %v3883_v16 = vadd.f32 %v7424_v11, %v6745_v10  ;;  %v3877_v18 = vpop.f32.mrb[43].mxu1 }
0x12e0   : > { %v3878_v19 = vadd.f32 %v6745_v10, %v3877_v18  ;;  %7814 = vmatprep.subr.msk.bf16.mxu0 %vm8970_vm2, %v7812_v13 }
0x12e1   : > { %7817 = vmatpush3.bf16.xpose.msk.msra.mxu0 %vm8970_vm2, %v7812_v13 }
0x12e2   : > { %v7427_v21 = vpop.f32.mrb[44].mxu1  ;;  %v7818_v22 = vpack.c.bf16 %v3883_v16, %v3878_v19  ;;  %v9373_v23 = vpack.i.bf16 %v3883_v16, %v3878_v19 }
0x12e3   : > { %v3893_v56 = vadd.f32 %v7427_v21, %v6745_v10  ;;  %v3887_v58 = vpop.f32.mrb[45].mxu1 }
0x12e4   : > { %v3888_v26 = vadd.f32 %v6745_v10, %v3887_v58  ;;  %7433 = vmatmul.mubr.msk.f32.vlgmr.msra.gmra.mrb[46].mxu1 %vm1189_vm1, %v9369_v20  ;;  %7819 = vmatprep.subr.bf16.mxu1 %v7818_v22 }
0x12e5   : > { %7821 = vmatpush3.bf16.msra.mxu1 %v7818_v22 }
0x12e6   : > { %v9379_v27 = vpack.c.bf16 %v3893_v56, %v3888_v26  ;;  %v9381_v31 = vpack.i.bf16 %v3893_v56, %v3888_v26 }
0x12e8   : > { %7440 = vmatmul.mubr.msk.f32.vlgmr.msra.gmra.mrb[22].mxu0 %vm1189_vm1, %v9377_v57  ;;  %7823 = vmatprep.subr.bf16.mxu1 %v9379_v27 }
0x13b7   : > { %v7434_v32 = vpop.f32.mrb[46].mxu1 }
0x13b8   : > { %v3979_v33 = vpop.f32.mrb[47].mxu1  ;;  %v4078_v12 = vsel %vm1364_vm3, %v7434_v32, -inf }
0x13b9   : > { %4079 = vmax.xlane.f32.xlu1 %v4078_v12  ;;  %v4075_v4 = vsel %vm1364_vm3, %v3979_v33, -inf }
0x13ba   : > { %4076 = vmax.xlane.f32.xlu0 %v4075_v4 }
0x13bb   : > { %v7441_v35 = vpop.f32.mrb[22].mxu0 }
0x13bc   : > { %v4066_v36 = vpop.f32.mrb[23].mxu0  ;;  %v4084_v37 = vsel %vm1364_vm3, %v7441_v35, -inf }
0x13bd   : > { %4085 = vmax.xlane.f32.xlu1 %v4084_v37  ;;  %v4081_v40 = vsel %vm1364_vm3, %v4066_v36, -inf }
0x13be   : > { %4082 = vmax.xlane.f32.xlu0 %v4081_v40 }
0x1446   : > { %v4080_v41 = vpop.xlane.xlu1 %4079 }
0x1447   : > { %v4088_v42 = vsub.f32 %v7434_v32, %v4080_v41  ;;  %v4077_v44 = vpop.xlane.xlu0 %4076 }
0x1448   : > { %v4087_v45 = vsub.f32 %v3979_v33, %v4077_v44 }
0x1449   : > { %v4093_v47 = vmul.f32 1.442695, %v4088_v42 }
0x144a   : > { %v4091_v17 = vmul.f32 1.442695, %v4087_v45  ;;  %v4086_v49 = vpop.xlane.xlu1 %4085 }
0x144b   : > { %8263 = vpow2.f32 %v4093_v47  ;;  %v4090_v50 = vsub.f32 %v7441_v35, %v4086_v49  ;;  %v4083_v46 = vpop.xlane.xlu0 %4082 }
0x144c   : > { %8265 = vpow2.f32 %v4091_v17  ;;  %v4089_v54 = vsub.f32 %v4066_v36, %v4083_v46 }
0x144d   : > { %v4097_v25 = vmul.f32 1.442695, %v4090_v50 }
0x144e   : > { %v4095_v55 = vmul.f32 1.442695, %v4089_v54 }
0x144f   : > { %8267 = vpow2.f32 %v4097_v25 }
0x1450   : > { %8269 = vpow2.f32 %v4095_v55 }
0x1455   : > { %v8264_v59 = vpop.eup %8263 }
0x1456   : > { %v8266_v51 = vpop.eup %8265  ;;  %v4102_v60 = vsel %vm1364_vm3, %v8264_v59, 0.0 }
0x1457   : > { %4103 = vadd.xlane.f32.xlu1 %v4102_v60  ;;  %v4099_v34 = vsel %vm1364_vm3, %v8266_v51, 0.0 }
0x1458   : > { %4100 = vadd.xlane.f32.xlu0 %v4099_v34 }
0x1459   : > { %v8268_v52 = vpop.eup %8267 }
0x145a   : > { %v8270_v61 = vpop.eup %8269  ;;  %v4108_v53 = vsel %vm1364_vm3, %v8268_v52, 0.0 }
0x145b   : > { %4109 = vadd.xlane.f32.xlu1 %v4108_v53  ;;  %v4105_v63 = vsel %vm1364_vm3, %v8270_v61, 0.0 }
0x145c   : > { %4106 = vadd.xlane.f32.xlu0 %v4105_v63 }
0x146c   : > { %4372 = vrot.lane.b32.xlu1 %v9352_v29, %s8555_s4 }
0x1470   : > { %4374 = vrot.lane.b32.xlu1 %v9377_v57, %s8555_s4 }
0x1472   : > { %8108 = vrot.lane.b32.xlu0 %v9365_v14, %s8555_s4 }
0x1474   : > { %8113 = vrot.lane.b32.xlu1 %v9359_v39, %s8555_s4 }
0x1476   : > { %4281 = vrot.lane.b32.xlu0 %v9348_v62, %s8555_s4 }
0x1478   : > { %4283 = vrot.lane.b32.xlu1 %v9369_v20, %s8555_s4 }
0x14e4   : > { %v4104_v0 = vpop.xlane.xlu1 %4103 }
0x14e5   : > { %8271 = vrcp.f32 %v4104_v0  ;;  %v4101_v28 = vpop.xlane.xlu0 %4100 }
0x14e6   : > { %8273 = vrcp.f32 %v4101_v28 }
0x14e8   : > { %v4110_v1 = vpop.xlane.xlu1 %4109 }
0x14e9   : > { %8275 = vrcp.f32 %v4110_v1  ;;  %v4107_v2 = vpop.xlane.xlu0 %4106 }
0x14ea   : > { %8277 = vrcp.f32 %v4107_v2 }
0x14ec   : > { %v4373_v3 = vpop.permute.xlu1 %4372 }
0x14ed   : > { %v8109_v5 = vpop.permute.xlu0 %8108 }
0x14ee   : > { %v8111_v8 = vunpack.i.h.bf16 %v8109_v5  ;;  %v8110_v9 = vunpack.i.l.bf16 %v8109_v5 }
0x14ef   : > { %v8272_v6 = vpop.eup %8271 }
0x14f0   : > { %v8274_v7 = vpop.eup %8273  ;;  %v4375_v30 = vpop.permute.xlu1 %4374  ;;  %v4116_v13 = vmul.f32 %v8272_v6, %v8264_v59  ;;  %v7832_v19 = vpack.c.bf16 %v8111_v8, %v8110_v9 }
0x14f1   : > { %v4282_v10 = vpop.permute.xlu0 %4281  ;;  %v4115_v11 = vmul.f32 %v8274_v7, %v8266_v51 }
0x14f2   : > { %7460 = vmatprep.mubr.msk.f32.mxu0 %vm1189_vm1, %v4282_v10 }
0x14f3   : > { %v8276_v16 = vpop.eup %8275  ;;  %7446 = vmatprep.mubr.msk.f32.mxu1 %vm1364_vm3, %v4115_v11 }
0x14f4   : > { %v8278_v18 = vpop.eup %8277  ;;  %v8114_v21 = vpop.permute.xlu1 %8113  ;;  %7447 = vmatmul.mubr.msk.f32.vlgmr.msra.gmra.mrb[48].mxu1 %vm1364_vm3, %v4116_v13  ;;  %v4118_v26 = vmul.f32 %v8276_v16, %v8268_v52 }
0x14f5   : > { %v8116_v22 = vunpack.i.h.bf16 %v8114_v21  ;;  %v8115_v56 = vunpack.i.l.bf16 %v8114_v21  ;;  %7825 = vmatpush3.bf16.msra.mxu1 %v9379_v27  ;;  %v4117_v58 = vmul.f32 %v8278_v18, %v8270_v61 }
0x14f6   : > { %7834 = vmatprep.subr.msk.bf16.mxu1 %vm8970_vm2, %v7832_v19 }
0x14f7   : > { %v7826_v32 = vpack.c.bf16 %v8116_v22, %v8115_v56  ;;  %7453 = vmatprep.mubr.msk.f32.mxu1 %vm1364_vm3, %v4117_v58 }
0x14f8   : > { %7454 = vmatmul.mubr.msk.f32.vlgmr.msra.gmra.mrb[50].mxu1 %vm1364_vm3, %v4118_v26  ;;  %v4284_v27 = vpop.permute.xlu1 %4283 }
0x14f9   : > { %7828 = vmatprep.subr.msk.bf16.mxu0 %vm8970_vm2, %v7826_v32  ;;  %7467 = vmatprep.mubr.msk.f32.mxu1 %vm1189_vm1, %v4373_v3 }
0x14fa   : > { %7831 = vmatpush3.bf16.xpose.msk.msra.mxu0 %vm8970_vm2, %v7826_v32 }
0x14fe   : > { %7837 = vmatpush3.bf16.xpose.msk.msra.mxu1 %vm8970_vm2, %v7832_v19 }
0x1501   : > { %7461 = vmatmul.mubr.msk.f32.vlgmr.msra.gmra.mrb[24].mxu0 %vm1189_vm1, %v4284_v27 }
0x1505   : > { %7468 = vmatmul.mubr.msk.f32.vlgmr.msra.gmra.mrb[52].mxu1 %vm1189_vm1, %v4375_v30 }
0x15c7   : > { %v9423_v33 = vpop.f32.mrb[48].mxu1 }
0x15c8   : > { %v9425_v12 = vpop.f32.mrb[49].mxu1 }
0x15cb   : > { %v9427_v4 = vpop.f32.mrb[50].mxu1 }
0x15cc   : > { %v9429_v35 = vpop.f32.mrb[51].mxu1 }
0x15d4   : > { %v9431_v36 = vpop.f32.mrb[24].mxu0 }
0x15d5   : > { %v4363_v37 = vpop.f32.mrb[25].mxu0  ;;  %v4466_v5 = vsel %vm1364_vm3, %v9431_v36, -inf }
0x15d6   : > { %v4463_v45 = vsel %vm1364_vm3, %v4363_v37, -inf }
0x15d8   : > { %v7469_v40 = vpop.f32.mrb[52].mxu1 }
0x15d9   : > { %v4454_v41 = vpop.f32.mrb[53].mxu1  ;;  %v4472_v42 = vsel %vm1364_vm3, %v7469_v40, -inf }
0x15da   : > { %4473 = vmax.xlane.f32.xlu1 %v4472_v42  ;;  %v4469_v44 = vsel %vm1364_vm3, %v4454_v41, -inf }
0x15db   : > { %4470 = vmax.xlane.f32.xlu0 %v4469_v44 }
0x15eb   : > { %8123 = vrot.lane.b32.xlu1 %v9359_v39, %s8556_s26 }
0x15ef   : > { %8128 = vrot.lane.b32.xlu1 %v9365_v14, %s8556_s26 }
0x15f3   : > { %4879 = vrot.lane.b32.xlu1 %v9348_v62, %s8556_s26 }
0x15f7   : > { %4970 = vrot.lane.b32.xlu1 %v9352_v29, %s8556_s26 }
0x161b   : > { %4464 = vmax.xlane.f32.xlu1 %v4463_v45 }
0x162c   : > { %8133 = vrot.lane.b32.xlu1 %v9373_v23, %s8555_s4 }
0x1667   : > { %v4474_v47 = vpop.xlane.xlu1 %4473 }
0x1668   : > { %v4478_v17 = vsub.f32 %v7469_v40, %v4474_v47  ;;  %v4471_v49 = vpop.xlane.xlu0 %4470 }
0x1669   : > { %v4477_v50 = vsub.f32 %v4454_v41, %v4471_v49 }
0x166a   : > { %v4485_v46 = vmul.f32 1.442695, %v4478_v17 }
0x166b   : > { %v4483_v54 = vmul.f32 1.442695, %v4477_v50  ;;  %v8124_v60 = vpop.permute.xlu1 %8123 }
0x166c   : > { %8279 = vpow2.f32 %v4485_v46  ;;  %v8126_v10 = vunpack.i.h.bf16 %v8124_v60  ;;  %v8125_v11 = vunpack.i.l.bf16 %v8124_v60 }
0x166d   : > { %8281 = vpow2.f32 %v4483_v54 }
0x166e   : > { %v7846_v19 = vpack.c.bf16 %v8126_v10, %v8125_v11 }
0x166f   : > { %v8129_v34 = vpop.permute.xlu1 %8128 }
0x1670   : > { %v8131_v26 = vunpack.i.h.bf16 %v8129_v34  ;;  %v8130_v32 = vunpack.i.l.bf16 %v8129_v34 }
0x1672   : > { %v7852_v27 = vpack.c.bf16 %v8131_v26, %v8130_v32 }
0x1673   : > { %v4880_v52 = vpop.permute.xlu1 %4879 }
0x1676   : > { %v8280_v25 = vpop.eup %8279 }
0x1677   : > { %v4496_v55 = vsel %vm1364_vm3, %v8280_v25, 0.0  ;;  %v8282_v59 = vpop.eup %8281  ;;  %v4971_v61 = vpop.permute.xlu1 %4970 }
0x1678   : > { %4497 = vadd.xlane.f32.xlu0 %v4496_v55  ;;  %v4493_v51 = vsel %vm1364_vm3, %v8282_v59, 0.0 }
0x167c   : > { %4494 = vadd.xlane.f32.xlu0 %v4493_v51 }
0x1692   : > { %8118 = vrot.lane.b32.xlu0 %v9381_v31, %s8555_s4 }
0x1696   : > { %4881 = vrot.lane.b32.xlu0 %v9369_v20, %s8556_s26 }
0x169a   : > { %4972 = vrot.lane.b32.xlu0 %v9377_v57, %s8556_s26 }
0x16a8   : > { %v4465_v53 = vpop.xlane.xlu1 %4464 }
0x16a9   : > { %v4475_v63 = vsub.f32 %v4363_v37, %v4465_v53 }
0x16ab   : > { %v4479_v0 = vmul.f32 1.442695, %v4475_v63 }
0x16ac   : > { %v8134_v28 = vpop.permute.xlu1 %8133 }
0x16ad   : > { %v8136_v1 = vunpack.i.h.bf16 %v8134_v28  ;;  %v8135_v2 = vunpack.i.l.bf16 %v8134_v28  ;;  %8283 = vpow2.f32 %v4479_v0  ;;  %v6751_v0 = vld [vmem:[%s9769_s10 + $0x28] sm:$0xff]  ;;  %v6750_v28 = vld [vmem:[%s9769_s10 + $0x20] sm:$0xff] }
0x16af   : > { %v7838_v3 = vpack.c.bf16 %v8136_v1, %v8135_v2 }
0x16b1   : > { %7839 = vmatprep.subr.bf16.mxu0 %v7838_v3 }
0x16b2   : > { %7841 = vmatpush3.bf16.msra.mxu0 %v7838_v3 }
0x16b3   : > { %7484 = vmatprep.subr.mxu0 %v6751_v0 }
0x16b7   : > { %v8284_v6 = vpop.eup %8283 }
0x16b8   : > { %v4487_v7 = vsel %vm1364_vm3, %v8284_v6, 0.0 }
0x16b9   : > { %4467 = vmax.xlane.f32.xlu0 %v4466_v5 }
0x16bd   : > { %4488 = vadd.xlane.f32.xlu0 %v4487_v7 }
0x1705   : > { %v4498_v8 = vpop.xlane.xlu0 %4497 }
0x1706   : > { %8285 = vrcp.f32 %v4498_v8 }
0x1709   : > { %v4495_v9 = vpop.xlane.xlu0 %4494 }
0x170a   : > { %8287 = vrcp.f32 %v4495_v9 }
0x170d   : > { %v8119_v30 = vpop.permute.xlu0 %8118 }
0x170e   : > { %v8121_v13 = vunpack.i.h.bf16 %v8119_v30  ;;  %v8120_v16 = vunpack.i.l.bf16 %v8119_v30 }
0x1710   : > { %v7842_v18 = vpack.c.bf16 %v8121_v13, %v8120_v16  ;;  %v8286_v21 = vpop.eup %8285 }
0x1711   : > { %v4506_v58 = vmul.f32 %v8286_v21, %v8280_v25  ;;  %v4882_v37 = vpop.permute.xlu0 %4881 }
0x1712   : > { %7843 = vmatprep.subr.bf16.mxu1 %v7842_v18 }
0x1713   : > { %7845 = vmatpush3.bf16.msra.mxu1 %v7842_v18 }
0x1714   : > { %v8288_v22 = vpop.eup %8287  ;;  %7848 = vmatprep.subr.msk.bf16.mxu1 %vm8970_vm2, %v7846_v19 }
0x1715   : > { %v4505_v56 = vmul.f32 %v8288_v22, %v8282_v59  ;;  %v4973_v40 = vpop.permute.xlu0 %4972 }
0x1717   : > { %7481 = vmatprep.mubr.msk.f32.mxu1 %vm1364_vm3, %v4505_v56 }
0x1718   : > { %7482 = vmatmul.mubr.msk.f32.vlgmr.msra.gmra.mrb[54].mxu1 %vm1364_vm3, %v4506_v58 }
0x1719   : > { %7504 = vmatprep.mubr.msk.f32.mxu1 %vm1189_vm1, %v4880_v52 }
0x171c   : > { %7851 = vmatpush3.bf16.xpose.msk.msra.mxu1 %vm8970_vm2, %v7846_v19 }
0x171d   : > { %7854 = vmatprep.subr.msk.bf16.mxu1 %vm8970_vm2, %v7852_v27 }
0x1723   : > { %7505 = vmatmul.mubr.msk.f32.vlgmr.msra.gmra.mrb[56].mxu1 %vm1189_vm1, %v4882_v37 }
0x1724   : > { %7857 = vmatpush3.bf16.xpose.msk.msra.mxu1 %vm8970_vm2, %v7852_v27  ;;  %7511 = vmatprep.mubr.msk.f32.mxu1 %vm1189_vm1, %v4971_v61 }
0x172b   : > { %7512 = vmatmul.mubr.msk.f32.vlgmr.msra.gmra.mrb[58].mxu1 %vm1189_vm1, %v4973_v40 }
0x1746   : > { %v4468_v41 = vpop.xlane.xlu0 %4467 }
0x1747   : > { %v4476_v42 = vsub.f32 %v9431_v36, %v4468_v41 }
0x1749   : > { %v4481_v44 = vmul.f32 1.442695, %v4476_v42 }
0x174a   : > { %v4489_v45 = vpop.xlane.xlu0 %4488 }
0x174b   : > { %8289 = vpow2.f32 %v4481_v44 }
0x174c   : > { %8291 = vrcp.f32 %v4489_v45 }
0x1755   : > { %v8290_v47 = vpop.eup %8289 }
0x1756   : > { %v8292_v17 = vpop.eup %8291  ;;  %v4490_v49 = vsel %vm1364_vm3, %v8290_v47, 0.0 }
0x1757   : > { %4491 = vadd.xlane.f32.xlu0 %v4490_v49  ;;  %v4503_v50 = vmul.f32 %v8292_v17, %v8284_v6 }
0x1759   : > { %7474 = vmatprep.mubr.msk.f32.mxu0 %vm1364_vm3, %v4503_v50 }
0x17e4   : > { %v4492_v46 = vpop.xlane.xlu0 %4491 }
0x17e5   : > { %8293 = vrcp.f32 %v4492_v46 }
0x17eb   : > { %v7483_v54 = vpop.f32.mrb[54].mxu1 }
0x17ec   : > { %v4676_v25 = vpop.f32.mrb[55].mxu1 }
0x17ef   : > { %v8294_v55 = vpop.eup %8293 }
0x17f0   : > { %v4504_v59 = vmul.f32 %v8294_v55, %v8290_v47  ;;  %v6752_v47 = vld [vmem:[%s9769_s10 + $0x30] sm:$0xff] }
0x17f2   : > { %7475 = vmatmul.mubr.msk.f32.vlgmr.msra.gmra.mrb[26].mxu0 %vm1364_vm3, %v4504_v59 }
0x17f3   : > { %7485 = vmatpush3.msra.mxu0 %v6751_v0 }
0x17f4   : > { %7492 = vmatprep.subr.mxu0 %v6750_v28 }
0x17f6   : > { %v7506_v36 = vpop.f32.mrb[56].mxu1 }
0x17f7   : > { %v4961_v51 = vpop.f32.mrb[57].mxu1  ;;  %v5064_v60 = vsel %vm1364_vm3, %v7506_v36, -inf }
0x17f8   : > { %5065 = vmax.xlane.f32.xlu0 %v5064_v60  ;;  %v5061_v34 = vsel %vm1364_vm3, %v4961_v51, -inf }
0x17fc   : > { %5062 = vmax.xlane.f32.xlu0 %v5061_v34 }
0x17fe   : > { %v7513_v52 = vpop.f32.mrb[58].mxu1 }
0x17ff   : > { %v5052_v61 = vpop.f32.mrb[59].mxu1  ;;  %v5070_v63 = vsel %vm1364_vm3, %v7513_v52, -inf }
0x1800   : > { %v5067_v53 = vsel %vm1364_vm3, %v5052_v61, -inf }
0x1801   : > { %5068 = vmax.xlane.f32.xlu0 %v5067_v53 }
0x1805   : > { %5071 = vmax.xlane.f32.xlu0 %v5070_v63 }
0x1885   : > { %v5066_v1 = vpop.xlane.xlu0 %5065 }
0x1886   : > { %v5074_v2 = vsub.f32 %v7506_v36, %v5066_v1 }
0x1888   : > { %v5079_v3 = vmul.f32 1.442695, %v5074_v2 }
0x1889   : > { %v5063_v5 = vpop.xlane.xlu0 %5062 }
0x188a   : > { %8295 = vpow2.f32 %v5079_v3  ;;  %v5073_v6 = vsub.f32 %v4961_v51, %v5063_v5 }
0x188c   : > { %v5077_v7 = vmul.f32 1.442695, %v5073_v6 }
0x188e   : > { %8297 = vpow2.f32 %v5077_v7  ;;  %v5069_v8 = vpop.xlane.xlu0 %5068 }
0x188f   : > { %v5075_v9 = vsub.f32 %v5052_v61, %v5069_v8 }
0x1891   : > { %v5081_v13 = vmul.f32 1.442695, %v5075_v9 }
0x1892   : > { %v5072_v30 = vpop.xlane.xlu0 %5071 }
0x1893   : > { %v5076_v10 = vsub.f32 %v7513_v52, %v5072_v30 }
0x1894   : > { %v9485_v11 = vpop.eup %8295 }
0x1895   : > { %v5083_v16 = vmul.f32 1.442695, %v5076_v10  ;;  %v5088_v18 = vsel %vm1364_vm3, %v9485_v11, 0.0 }
0x1896   : > { %5089 = vadd.xlane.f32.xlu0 %v5088_v18 }
0x1897   : > { %8299 = vpow2.f32 %v5083_v16 }
0x1898   : > { %v8298_v19 = vpop.eup %8297  ;;  %8301 = vpow2.f32 %v5081_v13 }
0x1899   : > { %v5085_v21 = vsel %vm1364_vm3, %v8298_v19, 0.0 }
0x189a   : > { %5086 = vadd.xlane.f32.xlu1 %v5085_v21 }
0x18a1   : > { %v8300_v22 = vpop.eup %8299 }
0x18a2   : > { %v5094_v56 = vsel %vm1364_vm3, %v8300_v22, 0.0  ;;  %v8302_v58 = vpop.eup %8301 }
0x18a3   : > { %5095 = vadd.xlane.f32.xlu0 %v5094_v56  ;;  %v5091_v26 = vsel %vm1364_vm3, %v8302_v58, 0.0 }
0x18a7   : > { %5092 = vadd.xlane.f32.xlu0 %v5091_v26 }
0x18ab   : > { %8143 = vrot.lane.b32.xlu1 %v9381_v31, %s8556_s26 }
0x18af   : > { %5473 = vrot.lane.b32.xlu1 %v9377_v57, %s9859_s28 }
0x18bd   : > { %8138 = vrot.lane.b32.xlu0 %v9373_v23, %s8556_s26  ;;  %s6867_s26 = sshll.u32 %s8707_s6, 9  ;;  %s8558_s6 = smov [#allocation10]  }
0x18be   : > { %s9716_s23 = scalar_lea.hbm %s9864_s7, %s6867_s26 }
0x18c1   : > { %8148 = vrot.lane.b32.xlu0 %v9359_v39, %s9859_s28 }
0x18c5   : > { %v7476_v32 = vpop.f32.mrb[26].mxu0  ;;  %8153 = vrot.lane.b32.xlu0 %v9365_v14, %s9859_s28 }
0x18c6   : > { %v4587_v27 = vpop.f32.mrb[27].mxu0 }
0x18c7   : > { %7486 = vmatprep.mubr.msk.f32.mxu0 %vm1189_vm1, %v4587_v27 }
0x18c8   : > { %7487 = vmatmul.mubr.msk.f32.vlgmr.msra.gmra.mrb[28].mxu0 %vm1189_vm1, %v7476_v32 }
0x18c9   : > { %5380 = vrot.lane.b32.xlu0 %v9348_v62, %s9859_s28  ;;  %7489 = vmatprep.mubr.msk.f32.mxu0 %vm1189_vm1, %v4676_v25 }
0x18ca   : > { %7493 = vmatpush3.msra.mxu0 %v6750_v28 }
0x18cc   : > { %7490 = vmatmul.mubr.msk.f32.gmra.mrb[30].mxu0 %vm1189_vm1, %v7483_v54 }
0x18cd   : > { %5382 = vrot.lane.b32.xlu0 %v9369_v20, %s9859_s28  ;;  %7494 = vmatprep.mubr.msk.f32.mxu0 %vm1189_vm1, %v9425_v12 }
0x18d0   : > { %7495 = vmatmul.mubr.msk.f32.vlgmr.msra.gmra.mrb[28].mxu0 %vm1189_vm1, %v9423_v33 }
0x18d1   : > { %5471 = vrot.lane.b32.xlu0 %v9352_v29, %s9859_s28  ;;  %7497 = vmatprep.mubr.msk.f32.mxu0 %vm1189_vm1, %v9429_v35 }
0x18d4   : > { %7498 = vmatmul.mubr.msk.f32.gmra.mrb[30].mxu0 %vm1189_vm1, %v9427_v4 }
0x1923   : > { %v5090_v14 = vpop.xlane.xlu0 %5089 }
0x1927   : > { %v5087_v62 = vpop.xlane.xlu1 %5086 }
0x1928   : > { %8303 = vrcp.f32 %v5087_v62 }
0x1929   : > { %8305 = vrcp.f32 %v5090_v14 }
0x192b   : > { %v8144_v39 = vpop.permute.xlu1 %8143 }
0x192c   : > { %v8146_v20 = vunpack.i.h.bf16 %v8144_v39  ;;  %v8145_v57 = vunpack.i.l.bf16 %v8144_v39 }
0x192e   : > { %v7862_v37 = vpack.c.bf16 %v8146_v20, %v8145_v57 }
0x192f   : > { %v5474_v2 = vpop.permute.xlu1 %5473 }
0x1930   : > { %7863 = vmatprep.subr.bf16.mxu1 %v7862_v37  ;;  %v5096_v12 = vpop.xlane.xlu0 %5095 }
0x1931   : > { %7865 = vmatpush3.bf16.msra.mxu1 %v7862_v37  ;;  %8307 = vrcp.f32 %v5096_v12 }
0x1932   : > { %v8304_v33 = vpop.eup %8303 }
0x1933   : > { %v5101_v40 = vmul.f32 %v8304_v33, %v8298_v19  ;;  %v8306_v44 = vpop.eup %8305 }
0x1934   : > { %v5093_v29 = vpop.xlane.xlu0 %5092  ;;  %v5102_v54 = vmul.f32 %v8306_v44, %v9485_v11 }
0x1935   : > { %8309 = vrcp.f32 %v5093_v29  ;;  %7518 = vmatprep.mubr.msk.f32.mxu0 %vm1364_vm3, %v5101_v40 }
0x1938   : > { %v8139_v35 = vpop.permute.xlu0 %8138 }
0x1939   : > { %v8141_v4 = vunpack.i.h.bf16 %v8139_v35  ;;  %v8140_v41 = vunpack.i.l.bf16 %v8139_v35 }
0x193b   : > { %v7858_v42 = vpack.c.bf16 %v8141_v4, %v8140_v41  ;;  %v8308_v50 = vpop.eup %8307 }
0x193c   : > { %v8149_v45 = vpop.permute.xlu0 %8148  ;;  %v5104_v36 = vmul.f32 %v8308_v50, %v8300_v22 }
0x193d   : > { %v8151_v17 = vunpack.i.h.bf16 %v8149_v45  ;;  %v8150_v49 = vunpack.i.l.bf16 %v8149_v45  ;;  %7859 = vmatprep.subr.bf16.mxu0 %v7858_v42 }
0x193e   : > { %7861 = vmatpush3.bf16.msra.mxu0 %v7858_v42 }
0x193f   : > { %v8310_v46 = vpop.eup %8309  ;;  %v7866_v25 = vpack.c.bf16 %v8151_v17, %v8150_v49  ;;  %7528 = vmatprep.subr.mxu0 %v6752_v47 }
0x1940   : > { %v8154_v55 = vpop.permute.xlu0 %8153  ;;  %v5103_v59 = vmul.f32 %v8310_v46, %v8302_v58 }
0x1941   : > { %v8156_v51 = vunpack.i.h.bf16 %v8154_v55  ;;  %v8155_v60 = vunpack.i.l.bf16 %v8154_v55  ;;  %7519 = vmatmul.mubr.msk.f32.vlgmr.msra.gmra.mrb[32].mxu0 %vm1364_vm3, %v5102_v54  ;;  %7868 = vmatprep.subr.msk.bf16.mxu1 %vm8970_vm2, %v7866_v25 }
0x1942   : > { %7525 = vmatprep.mubr.msk.f32.mxu1 %vm1364_vm3, %v5103_v59  ;;  %7529 = vmatpush3.msra.mxu0 %v6752_v47 }
0x1943   : > { %v7872_v34 = vpack.c.bf16 %v8156_v51, %v8155_v60  ;;  %7526 = vmatmul.mubr.msk.f32.vlgmr.msra.gmra.mrb[60].mxu1 %vm1364_vm3, %v5104_v36  ;;  %v6753_v36 = vld [vmem:[%s9769_s10 + $0x38] sm:$0xff] }
0x1944   : > { %7871 = vmatpush3.bf16.xpose.msk.msra.mxu1 %vm8970_vm2, %v7866_v25  ;;  %v5381_v52 = vpop.permute.xlu0 %5380 }
0x1945   : > { %7540 = vmatprep.mubr.msk.f32.mxu1 %vm1189_vm1, %v5381_v52  ;;  %7874 = vmatprep.subr.msk.bf16.mxu0 %vm8970_vm2, %v7872_v34 }
0x1948   : > { %v5383_v61 = vpop.permute.xlu0 %5382 }
0x194b   : > { %7541 = vmatmul.mubr.msk.f32.vlgmr.msra.gmra.mrb[62].mxu1 %vm1189_vm1, %v5383_v61  ;;  %v6819_v61 = vld [vmem:[%s9770_s11 + $0x1] ss:$0 sm:$0xff] }
0x194c   : > { %v5472_v1 = vpop.permute.xlu0 %5471 }
0x1a14   : > { %v7520_v53 = vpop.f32.mrb[32].mxu0 }
0x1a15   : > { %v5183_v63 = vpop.f32.mrb[33].mxu0 }
0x1a16   : > { %v7527_v0 = vpop.f32.mrb[60].mxu1  ;;  %7530 = vmatprep.mubr.msk.f32.mxu0 %vm1189_vm1, %v5183_v63 }
0x1a17   : > { %v5270_v28 = vpop.f32.mrb[61].mxu1  ;;  %7531 = vmatmul.mubr.msk.f32.vlgmr.msra.gmra.mrb[28].mxu0 %vm1189_vm1, %v7520_v53 }
0x1a18   : > { %7877 = vmatpush3.bf16.xpose.msk.msra.mxu0 %vm8970_vm2, %v7872_v34  ;;  %7533 = vmatprep.mubr.msk.f32.mxu0 %vm1189_vm1, %v5270_v28 }
0x1a1b   : > { %7534 = vmatmul.mubr.msk.f32.gmra.mrb[30].mxu0 %vm1189_vm1, %v7527_v0 }
0x1a1c   : > { %7547 = vmatprep.mubr.msk.f32.mxu0 %vm1189_vm1, %v5472_v1 }
0x1a1e   : > { %v7542_v3 = vpop.f32.mrb[62].mxu1 }
0x1a1f   : > { %v5462_v5 = vpop.f32.mrb[63].mxu1  ;;  %v5565_v6 = vsel %vm1364_vm3, %v7542_v3, -inf  ;;  %7548 = vmatmul.mubr.msk.f32.vlgmr.msra.gmra.mrb[34].mxu0 %vm1189_vm1, %v5474_v2 }
0x1a20   : > { %5566 = vmax.xlane.f32.xlu1 %v5565_v6  ;;  %v5562_v7 = vsel %vm1364_vm3, %v5462_v5, -inf }
0x1a21   : > { %5563 = vmax.xlane.f32.xlu0 %v5562_v7 }
0x1aad   : > { %v5567_v11 = vpop.xlane.xlu1 %5566 }
0x1aae   : > { %v5564_v43 = vpop.xlane.xlu0 %5563  ;;  %v5575_v13 = vsub.f32 %v7542_v3, %v5567_v11 }
0x1aaf   : > { %v5574_v8 = vsub.f32 %v5462_v5, %v5564_v43 }
0x1ab0   : > { %v5580_v16 = vmul.f32 1.442695, %v5575_v13 }
0x1ab1   : > { %v5578_v9 = vmul.f32 1.442695, %v5574_v8 }
0x1ab3   : > { %8311 = vpow2.f32 %v5578_v9 }
0x1ab4   : > { %8313 = vpow2.f32 %v5580_v16 }
0x1abd   : > { %v8312_v30 = vpop.eup %8311 }
0x1abe   : > { %v5586_v10 = vsel %vm1364_vm3, %v8312_v30, 0.0  ;;  %v8314_v56 = vpop.eup %8313 }
0x1abf   : > { %5587 = vadd.xlane.f32.xlu1 %v5586_v10  ;;  %v5589_v58 = vsel %vm1364_vm3, %v8314_v56, 0.0 }
0x1af2   : > { %v7549_v18 = vpop.f32.mrb[34].mxu0 }
0x1af3   : > { %v5553_v19 = vpop.f32.mrb[35].mxu0  ;;  %v5571_v22 = vsel %vm1364_vm3, %v7549_v18, -inf }
0x1af4   : > { %v5568_v21 = vsel %vm1364_vm3, %v5553_v19, -inf }
0x1af5   : > { %5569 = vmax.xlane.f32.xlu0 %v5568_v21 }
0x1af9   : > { %5572 = vmax.xlane.f32.xlu0 %v5571_v22 }
0x1afd   : > { %5590 = vadd.xlane.f32.xlu0 %v5589_v58 }
0x1b4c   : > { %v5588_v26 = vpop.xlane.xlu1 %5587 }
0x1b4d   : > { %8315 = vrcp.f32 %v5588_v26 }
0x1b57   : > { %v8316_v32 = vpop.eup %8315 }
0x1b58   : > { %v5602_v27 = vmul.f32 %v8316_v32, %v8312_v30 }
0x1b5a   : > { %7554 = vmatprep.mubr.msk.f32.mxu1 %vm1364_vm3, %v5602_v27 }
0x1b82   : > { %v5570_v62 = vpop.xlane.xlu0 %5569 }
0x1b83   : > { %v5576_v39 = vsub.f32 %v5553_v19, %v5570_v62 }
0x1b85   : > { %v5582_v14 = vmul.f32 1.442695, %v5576_v39 }
0x1b86   : > { %v5573_v20 = vpop.xlane.xlu0 %5572 }
0x1b87   : > { %8317 = vpow2.f32 %v5582_v14  ;;  %v5577_v57 = vsub.f32 %v7549_v18, %v5573_v20 }
0x1b89   : > { %v5584_v37 = vmul.f32 1.442695, %v5577_v57 }
0x1b8a   : > { %v5591_v35 = vpop.xlane.xlu0 %5590 }
0x1b8b   : > { %8319 = vpow2.f32 %v5584_v37  ;;  %v5974_v37 = vld [vmem:[#allocation8 + $0x20] sm:$0xff] }
0x1b8c   : > { %8321 = vrcp.f32 %v5591_v35 }
0x1b91   : > { %v8318_v12 = vpop.eup %8317 }
0x1b92   : > { %v5592_v33 = vsel %vm1364_vm3, %v8318_v12, 0.0 }
0x1b93   : > { %5593 = vadd.xlane.f32.xlu1 %v5592_v33 }
0x1b95   : > { %v8320_v40 = vpop.eup %8319 }
0x1b96   : > { %v5595_v29 = vsel %vm1364_vm3, %v8320_v40, 0.0  ;;  %v8322_v17 = vpop.eup %8321 }
0x1b97   : > { %5596 = vadd.xlane.f32.xlu0 %v5595_v29  ;;  %v5603_v54 = vmul.f32 %v8322_v17, %v8314_v56  ;;  %v5977_v29 = vld [vmem:[#allocation8 + $0x38] sm:$0xff] }
0x1ba4   : > { %8158 = vrot.lane.b32.xlu1 %v9373_v23, %s9859_s28 }
0x1bad   : > { %8163 = vrot.lane.b32.xlu0 %v9381_v31, %s9859_s28  ;;  %s6510_s28 = sshll.u32 %s790_s24, 4  ;;  %s9711_s28 = int_to_ptr.vmem [resolvable:$true] %s6510_s28 }
0x1bae   : > { %s8471_s4 = scalar_lea.vmem %s9711_s28, 512 }
0x1baf   : > { %p8472_p2 = scmp.ne.s32.totalorder %s9711_s28, %s8471_s4 }
0x1bb1   : > { %p8473_p4 = pnand %p8472_p2, %p9865_p3 }
0x1bb3   : > { %p8474_p7 = pneg %p8473_p4 }
0x1c20   : > { %v5594_v4 = vpop.xlane.xlu1 %5593 }
0x1c21   : > { %8323 = vrcp.f32 %v5594_v4  ;;  %v6830_v4 = vld [vmem:[%s9775_s16 + $0x80] sm:$0xff] }
0x1c24   : > { %v8159_v41 = vpop.permute.xlu1 %8158  ;;  %v5597_v42 = vpop.xlane.xlu0 %5596 }
0x1c25   : > { %v8161_v44 = vunpack.i.h.bf16 %v8159_v41  ;;  %v8160_v45 = vunpack.i.l.bf16 %v8159_v41  ;;  %8325 = vrcp.f32 %v5597_v42  ;;  %v6831_v41 = vld [vmem:[%s9775_s16 + $0x88] sm:$0xff] }
0x1c26   : > { %v7894_v42 = vpack.c.bf16 %v6831_v41, %v6830_v4 }
0x1c27   : > { %v7878_v47 = vpack.c.bf16 %v8161_v44, %v8160_v45 }
0x1c28   : > { %v8164_v49 = vpop.permute.xlu0 %8163 }
0x1c29   : > { %v8166_v50 = vunpack.i.h.bf16 %v8164_v49  ;;  %v8165_v46 = vunpack.i.l.bf16 %v8164_v49  ;;  %7879 = vmatprep.subr.bf16.mxu1 %v7878_v47 }
0x1c2a   : > { %7881 = vmatpush3.bf16.msra.mxu1 %v7878_v47 }
0x1c2b   : > { %v8324_v23 = vpop.eup %8323  ;;  %v7882_v25 = vpack.c.bf16 %v8166_v50, %v8165_v46 }
0x1c2c   : > { %v5604_v31 = vmul.f32 %v8324_v23, %v8318_v12  ;;  %v5975_v12 = vld [vmem:[#allocation8 + $0x28] sm:$0xff] }
0x1c2d   : > { %7555 = vmatmul.mubr.msk.f32.vlgmr.msra.gmra.mrb[64].mxu1 %vm1364_vm3, %v5603_v54  ;;  %7883 = vmatprep.subr.bf16.mxu0 %v7882_v25  ;;  %v7886_v33 = vpack.c.bf16 %v5975_v12, %v5974_v37 }
0x1c2e   : > { %7885 = vmatpush3.bf16.msra.mxu0 %v7882_v25  ;;  %7561 = vmatprep.mubr.msk.f32.mxu0 %vm1364_vm3, %v5604_v31 }
0x1c2f   : > { %v8326_v55 = vpop.eup %8325  ;;  %7564 = vmatprep.subr.mxu0 %v6753_v36  ;;  %7887 = vmatprep.subr.bf16.mxu1 %v7886_v33 }
0x1c30   : > { %v5605_v59 = vmul.f32 %v8326_v55, %v8320_v40  ;;  %v5976_v40 = vld [vmem:[#allocation8 + $0x30] sm:$0xff]  ;;  %7889 = vmatpush3.bf16.msra.mxu1 %v7886_v33 }
0x1c31   : > { %v7890_v35 = vpack.c.bf16 %v5977_v29, %v5976_v40 }
0x1c32   : > { %7562 = vmatmul.mubr.msk.f32.vlgmr.msra.gmra.mrb[36].mxu0 %vm1364_vm3, %v5605_v59 }
0x1c33   : > { %7565 = vmatpush3.msra.mxu0 %v6753_v36  ;;  %7891 = vmatprep.subr.bf16.mxu1 %v7890_v35  ;;  %v6822_v36 = vld [vmem:[%s9771_s12 + $0x1] ss:$0 sm:$0xff] }
0x1c34   : > { %7893 = vmatpush3.bf16.msra.mxu1 %v7890_v35  ;;  %7895 = vmatprep.subr.bf16.mxu0 %v7894_v42 }
0x1d00   : > { %v7556_v51 = vpop.f32.mrb[64].mxu1 }
0x1d01   : > { %v5684_v60 = vpop.f32.mrb[65].mxu1 }
0x1d02   : > { %7566 = vmatprep.mubr.msk.f32.mxu0 %vm1189_vm1, %v5684_v60 }
0x1d03   : > { %7567 = vmatmul.mubr.msk.f32.vlgmr.msra.gmra.mrb[28].mxu0 %vm1189_vm1, %v7556_v51 }
0x1d04   : > { %7897 = vmatpush3.bf16.msra.mxu0 %v7894_v42 }
0x1d05   : > { %v7563_v34 = vpop.f32.mrb[36].mxu0 }
0x1d06   : > { %v5771_v52 = vpop.f32.mrb[37].mxu0 }
0x1d07   : > { %7569 = vmatprep.mubr.msk.f32.mxu0 %vm1189_vm1, %v5771_v52  ;;  %v6823_v52 = vld [vmem:[%s9772_s13 + $0x1] ss:$0 sm:$0xff] }
0x1d08   : > { %7570 = vmatmul.mubr.msk.f32.gmra.mrb[30].mxu0 %vm1189_vm1, %v7563_v34 }
0x1dd6   : > { %v7568_v53 = vpop.f32.mrb[28].mxu0 }
0x1dd7   : > { %v5890_v63 = vadd.f32 %v7568_v53, %v6819_v61  ;;  %v5858_v0 = vpop.f32.mrb[29].mxu0 }
0x1dd8   : > { %v5889_v28 = vadd.f32 %v6819_v61, %v5858_v0 }
0x1dd9   : > { %v5894_v1 = vadd.f32 %v5890_v63, %v9303_v15 }
0x1dda   : > { %v5893_v2 = vadd.f32 %v5889_v28, %v9301_v48 }
0x1ddb   : > { %v7571_v3 = vpop.f32.mrb[30].mxu0  ;;  %v5904_v5 = vsel %vm811_vm0, %v5894_v1, 0.0 }
0x1ddc   : > { %v5892_v6 = vadd.f32 %v7571_v3, %v6819_v61  ;;  %5905 = vadd.xlane.f32.xlu0 %v5904_v5  ;;  %v5868_v7 = vpop.f32.mrb[31].mxu0  ;;  %v5901_v43 = vsel %vm811_vm0, %v5893_v2, 0.0 }
0x1ddd   : > { %v5891_v8 = vadd.f32 %v6819_v61, %v5868_v7  ;;  %5902 = vadd.xlane.f32.xlu1 %v5901_v43 }
0x1dde   : > { %v5896_v9 = vadd.f32 %v5892_v6, %v9317_v38 }
0x1ddf   : > { %v5895_v30 = vadd.f32 %v5891_v8, %v9315_v24  ;;  %v6832_v8 = vld [vmem:[%s9775_s16 + $0x90] sm:$0xff] }
0x1de0   : > { %v5910_v10 = vsel %vm811_vm0, %v5896_v9, 0.0 }
0x1de1   : > { %5911 = vadd.xlane.f32.xlu0 %v5910_v10  ;;  %v5907_v15 = vsel %vm811_vm0, %v5895_v30, 0.0  ;;  %v6834_v10 = vld [vmem:[%s9775_s16 + $0xa0] sm:$0xff] }
0x1de2   : > { %5908 = vadd.xlane.f32.xlu1 %v5907_v15  ;;  %v6835_v15 = vld [vmem:[%s9775_s16 + $0xa8] sm:$0xff] }
0x1e69   : > { %v5906_v48 = vpop.xlane.xlu0 %5905 }
0x1e6a   : > { %v5914_v11 = vmul.f32 0.03125, %v5906_v48  ;;  %v5903_v13 = vpop.xlane.xlu1 %5902  ;;  %v7902_v48 = vpack.c.bf16 %v6835_v15, %v6834_v10 }
0x1e6b   : > { %v5913_v16 = vmul.f32 0.03125, %v5903_v13  ;;  %v6837_v13 = vld [vmem:[%s9775_s16 + $0xb8] sm:$0xff] }
0x1e6c   : > { %v5918_v18 = vsub.f32 %v5894_v1, %v5914_v11  ;;  %v6836_v11 = vld [vmem:[%s9775_s16 + $0xb0] sm:$0xff] }
0x1e6d   : > { %v5917_v19 = vsub.f32 %v5893_v2, %v5913_v16  ;;  %v7906_v16 = vpack.c.bf16 %v6837_v13, %v6836_v11  ;;  %v6847_v11 = vld [vmem:[%s9776_s17 + $0x1] ss:$0 sm:$0xff] }
0x1e6e   : > { %v5912_v21 = vpop.xlane.xlu0 %5911  ;;  %v5922_v22 = vmul.f32 %v5918_v18, %v5918_v18 }
0x1e6f   : > { %v5916_v56 = vmul.f32 0.03125, %v5912_v21  ;;  %v5909_v58 = vpop.xlane.xlu1 %5908  ;;  %v5921_v26 = vmul.f32 %v5917_v19, %v5917_v19 }
0x1e70   : > { %v5915_v38 = vmul.f32 0.03125, %v5909_v58  ;;  %v5928_v24 = vsel %vm811_vm0, %v5922_v22, 0.0  ;;  %v6840_v22 = vld [vmem:[%s9775_s16 + $0xd0] sm:$0xff] }
0x1e71   : > { %v5920_v32 = vsub.f32 %v5896_v9, %v5916_v56  ;;  %5929 = vadd.xlane.f32.xlu0 %v5928_v24  ;;  %v5925_v27 = vsel %vm811_vm0, %v5921_v26, 0.0  ;;  %v6833_v9 = vld [vmem:[%s9775_s16 + $0x98] sm:$0xff]  ;;  %v6842_v26 = vld [vmem:[%s9775_s16 + $0xe0] sm:$0xff] }
0x1e72   : > { %v5919_v62 = vsub.f32 %v5895_v30, %v5915_v38  ;;  %5926 = vadd.xlane.f32.xlu1 %v5925_v27  ;;  %v7898_v30 = vpack.c.bf16 %v6833_v9, %v6832_v8  ;;  %v6841_v56 = vld [vmem:[%s9775_s16 + $0xd8] sm:$0xff]  ;;  %v6843_v38 = vld [vmem:[%s9775_s16 + $0xe8] sm:$0xff] }
0x1e73   : > { %v5924_v39 = vmul.f32 %v5920_v32, %v5920_v32  ;;  %v7914_v58 = vpack.c.bf16 %v6841_v56, %v6840_v22  ;;  %v7918_v24 = vpack.c.bf16 %v6843_v38, %v6842_v26  ;;  %v6845_v27 = vld [vmem:[%s9775_s16 + $0xf8] sm:$0xff] }
0x1e74   : > { %v5923_v14 = vmul.f32 %v5919_v62, %v5919_v62  ;;  %7899 = vmatprep.subr.bf16.mxu0 %v7898_v30 }
0x1e75   : > { %v5934_v20 = vsel %vm811_vm0, %v5924_v39, 0.0  ;;  %7901 = vmatpush3.bf16.msra.mxu0 %v7898_v30  ;;  %v6825_v39 = vld [vmem:[%s9774_s15 + $0x1] ss:$0 sm:$0xff] }
0x1e76   : > { %5935 = vadd.xlane.f32.xlu0 %v5934_v20  ;;  %v5931_v57 = vsel %vm811_vm0, %v5923_v14, 0.0  ;;  %7903 = vmatprep.subr.bf16.mxu0 %v7902_v48 }
0x1e77   : > { %5932 = vadd.xlane.f32.xlu1 %v5931_v57 }
0x1e79   : > { %7905 = vmatpush3.bf16.msra.mxu0 %v7902_v48 }
0x1e7a   : > { %7907 = vmatprep.subr.bf16.mxu0 %v7906_v16 }
0x1e7d   : > { %7909 = vmatpush3.bf16.msra.mxu0 %v7906_v16 }
0x1efe   : > { %v5930_v44 = vpop.xlane.xlu0 %5929 }
0x1eff   : > { %v5938_v45 = vmul.f32 0.03125, %v5930_v44  ;;  %v5927_v47 = vpop.xlane.xlu1 %5926 }
0x1f00   : > { %v5937_v17 = vmul.f32 0.03125, %v5927_v47 }
0x1f01   : > { %v5942_v49 = vadd.f32 1e-05, %v5938_v45 }
0x1f02   : > { %v5941_v50 = vadd.f32 1e-05, %v5937_v17 }
0x1f03   : > { %8327 = vrsqrt.f32 %v5942_v49  ;;  %v5936_v46 = vpop.xlane.xlu0 %5935 }
0x1f04   : > { %8329 = vrsqrt.f32 %v5941_v50  ;;  %v5940_v23 = vmul.f32 0.03125, %v5936_v46  ;;  %v5933_v54 = vpop.xlane.xlu1 %5932 }
0x1f05   : > { %v5939_v25 = vmul.f32 0.03125, %v5933_v54 }
0x1f06   : > { %v5944_v31 = vadd.f32 1e-05, %v5940_v23 }
0x1f07   : > { %v5943_v55 = vadd.f32 1e-05, %v5939_v25 }
0x1f08   : > { %8331 = vrsqrt.f32 %v5944_v31 }
0x1f09   : > { %8333 = vrsqrt.f32 %v5943_v55 }
0x1f0d   : > { %v8328_v59 = vpop.eup %8327 }
0x1f0e   : > { %v8330_v51 = vpop.eup %8329  ;;  %v5950_v60 = vmul.f32 %v8328_v59, %v5918_v18  ;;  %v6838_v18 = vld [vmem:[%s9775_s16 + $0xc0] sm:$0xff] }
0x1f0f   : > { %v5949_v34 = vmul.f32 %v8330_v51, %v5917_v19  ;;  %v6839_v19 = vld [vmem:[%s9775_s16 + $0xc8] sm:$0xff] }
0x1f10   : > { %v5960_v61 = vmul.f32 %v6822_v36, %v5950_v60  ;;  %v7910_v21 = vpack.c.bf16 %v6839_v19, %v6838_v18 }
0x1f11   : > { %v5959_v53 = vmul.f32 %v6822_v36, %v5949_v34 }
0x1f12   : > { %v8332_v63 = vpop.eup %8331  ;;  %v9596_v2 = vadd.f32 %v6823_v52, %v5960_v61  ;;  %7911 = vmatprep.subr.bf16.mxu0 %v7910_v21 }
0x1f13   : > { %v8334_v0 = vpop.eup %8333  ;;  %v9594_v28 = vadd.f32 %v6823_v52, %v5959_v53  ;;  %v5952_v1 = vmul.f32 %v8332_v63, %v5920_v32  ;;  %7913 = vmatpush3.bf16.msra.mxu0 %v7910_v21  ;;  %v6844_v32 = vld [vmem:[%s9775_s16 + $0xf0] sm:$0xff] }
0x1f14   : > { %v5951_v3 = vmul.f32 %v8334_v0, %v5919_v62  ;;  %7915 = vmatprep.subr.bf16.mxu0 %v7914_v58  ;;  %v7922_v62 = vpack.c.bf16 %v6845_v27, %v6844_v32 }
0x1f15   : > { %7580 = vmatprep.mubr.msk.f32.mxu1 %vm811_vm0, %v9594_v28  ;;  %v5962_v5 = vmul.f32 %v6822_v36, %v5952_v1 }
0x1f16   : > { %7581 = vmatmul.mubr.msk.f32.vlgmr.msra.gmra.mrb[66].mxu1 %vm811_vm0, %v9596_v2  ;;  %v5961_v6 = vmul.f32 %v6822_v36, %v5951_v3 }
0x1f17   : > { %v9604_v43 = vadd.f32 %v6823_v52, %v5962_v5  ;;  %7917 = vmatpush3.bf16.msra.mxu0 %v7914_v58 }
0x1f18   : > { %v9602_v7 = vadd.f32 %v6823_v52, %v5961_v6  ;;  %7919 = vmatprep.subr.bf16.mxu0 %v7918_v24 }
0x1f1a   : > { %7583 = vmatprep.mubr.msk.f32.mxu1 %vm811_vm0, %v9602_v7 }
0x1f1b   : > { %7584 = vmatmul.mubr.msk.f32.gmra.mrb[68].mxu1 %vm811_vm0, %v9604_v43  ;;  %7921 = vmatpush3.bf16.msra.mxu0 %v7918_v24 }
0x1f1c   : > { %7923 = vmatprep.subr.bf16.mxu0 %v7922_v62 }
0x1f1f   : > { %7925 = vmatpush3.bf16.msra.mxu0 %v7922_v62 }
0x1fe9   : > { %v7582_v14 = vpop.f32.mrb[66].mxu1 }
0x1fea   : > { %v6070_v20 = vadd.f32 %v7582_v14, %v6825_v39  ;;  %v6064_v57 = vpop.f32.mrb[67].mxu1 }
0x1feb   : > { %v6065_v37 = vadd.f32 %v6825_v39, %v6064_v57 }
0x1fec   : > { %v6088_v12 = vmul.f32 0.044715, %v6070_v20  ;;  %v6084_v0 = vmul.f32 0.5, %v6070_v20 }
0x1fed   : > { %v6087_v33 = vmul.f32 0.044715, %v6065_v37  ;;  %v6083_v53 = vmul.f32 0.5, %v6065_v37 }
0x1fee   : > { %v6092_v40 = vmul.f32 %v6088_v12, %v6070_v20  ;;  %v7585_v29 = vpop.f32.mrb[68].mxu1 }
0x1fef   : > { %v6091_v35 = vmul.f32 %v6087_v33, %v6065_v37  ;;  %v6080_v4 = vadd.f32 %v7585_v29, %v6825_v39  ;;  %v6074_v41 = vpop.f32.mrb[69].mxu1 }
0x1ff0   : > { %v6096_v42 = vmul.f32 %v6092_v40, %v6070_v20  ;;  %v6075_v44 = vadd.f32 %v6825_v39, %v6074_v41 }
0x1ff1   : > { %v6090_v45 = vmul.f32 0.044715, %v6080_v4  ;;  %v6095_v47 = vmul.f32 %v6091_v35, %v6065_v37  ;;  %v6086_v10 = vmul.f32 0.5, %v6080_v4 }
0x1ff2   : > { %v6100_v17 = vadd.f32 %v6096_v42, %v6070_v20  ;;  %v6089_v49 = vmul.f32 0.044715, %v6075_v44  ;;  %v6085_v9 = vmul.f32 0.5, %v6075_v44 }
0x1ff3   : > { %v6094_v50 = vmul.f32 %v6090_v45, %v6080_v4  ;;  %v6099_v46 = vadd.f32 %v6095_v47, %v6065_v37 }
0x1ff4   : > { %v6104_v23 = vmul.f32 0.7978846, %v6100_v17  ;;  %v6093_v54 = vmul.f32 %v6089_v49, %v6075_v44 }
0x1ff5   : > { %v6103_v25 = vmul.f32 0.7978846, %v6099_v46  ;;  %v6098_v31 = vmul.f32 %v6094_v50, %v6080_v4 }
0x1ff6   : > { %8335 = vtanh.f32 %v6104_v23  ;;  %v6097_v55 = vmul.f32 %v6093_v54, %v6075_v44 }
0x1ff7   : > { %8337 = vtanh.f32 %v6103_v25  ;;  %v6102_v59 = vadd.f32 %v6098_v31, %v6080_v4 }
0x1ff8   : > { %v6101_v36 = vadd.f32 %v6097_v55, %v6075_v44 }
0x1ff9   : > { %v6106_v51 = vmul.f32 0.7978846, %v6102_v59 }
0x1ffa   : > { %v6105_v60 = vmul.f32 0.7978846, %v6101_v36 }
0x1ffb   : > { %8339 = vtanh.f32 %v6106_v51 }
0x1ffc   : > { %8341 = vtanh.f32 %v6105_v60 }
0x2000   : > { %v8336_v34 = vpop.eup %8335 }
0x2001   : > { %v8338_v52 = vpop.eup %8337  ;;  %v6112_v61 = vadd.f32 1.0, %v8336_v34 }
0x2002   : > { %v6111_v63 = vadd.f32 1.0, %v8338_v52 }
0x2003   : > { %v6116_v5 = vmul.f32 %v6112_v61, %v6084_v0  ;;  %v6850_v61 = vld [vmem:[%s9777_s18 + $0x1] ss:$0 sm:$0xff] }
0x2004   : > { %v6115_v1 = vmul.f32 %v6111_v63, %v6083_v53  ;;  %v6851_v0 = vld [vmem:[%s9778_s19 + $0x1] ss:$0 sm:$0xff] }
0x2005   : > { %v8340_v3 = vpop.eup %8339 }
0x2006   : > { %v8342_v6 = vpop.eup %8341  ;;  %7618 = vmatprep.mubr.f32.mxu0 %v6115_v1  ;;  %v6114_v8 = vadd.f32 1.0, %v8340_v3 }
0x2007   : > { %7619 = vmatmul.mubr.f32.vlgmr.msra.gmra.mrb[38].mxu0 %v6116_v5  ;;  %v6113_v30 = vadd.f32 1.0, %v8342_v6 }
0x2008   : > { %v6118_v48 = vmul.f32 %v6114_v8, %v6086_v10 }
0x2009   : > { %v6117_v15 = vmul.f32 %v6113_v30, %v6085_v9 }
0x200b   : > { %7621 = vmatprep.mubr.f32.mxu0 %v6117_v15 }
0x200c   : > { %7622 = vmatmul.mubr.f32.gmra.mrb[40].mxu0 %v6118_v48 }
0x20da   : > { %v7620_v13 = vpop.f32.mrb[38].mxu0 }
0x20db   : > { %v6216_v16 = vadd.f32 %v7620_v13, %v6847_v11  ;;  %v6210_v18 = vpop.f32.mrb[39].mxu0 }
0x20dc   : > { %v6211_v19 = vadd.f32 %v6847_v11, %v6210_v18 }
0x20dd   : > { %v6230_v21 = vadd.f32 %v6216_v16, %v9596_v2 }
0x20de   : > { %v6229_v22 = vadd.f32 %v6211_v19, %v9594_v28 }
0x20df   : > { %v7623_v56 = vpop.f32.mrb[40].mxu0  ;;  %v6240_v58 = vsel %vm811_vm0, %v6230_v21, 0.0 }
0x20e0   : > { %v6226_v26 = vadd.f32 %v7623_v56, %v6847_v11  ;;  %6241 = vadd.xlane.f32.xlu0 %v6240_v58  ;;  %v6220_v38 = vpop.f32.mrb[41].mxu0  ;;  %v6237_v24 = vsel %vm811_vm0, %v6229_v22, 0.0 }
0x20e1   : > { %v6221_v32 = vadd.f32 %v6847_v11, %v6220_v38  ;;  %6238 = vadd.xlane.f32.xlu1 %v6237_v24 }
0x20e2   : > { %v6232_v27 = vadd.f32 %v6226_v26, %v9604_v43 }
0x20e3   : > { %v6231_v62 = vadd.f32 %v6221_v32, %v9602_v7 }
0x20e4   : > { %v6246_v39 = vsel %vm811_vm0, %v6232_v27, 0.0 }
0x20e5   : > { %6247 = vadd.xlane.f32.xlu0 %v6246_v39  ;;  %v6243_v2 = vsel %vm811_vm0, %v6231_v62, 0.0 }
0x20e6   : > { %6244 = vadd.xlane.f32.xlu1 %v6243_v2 }
0x216d   : > { %v6242_v28 = vpop.xlane.xlu0 %6241 }
0x216e   : > { %v6250_v14 = vmul.f32 0.03125, %v6242_v28  ;;  %v6239_v20 = vpop.xlane.xlu1 %6238 }
0x216f   : > { %v6249_v57 = vmul.f32 0.03125, %v6239_v20 }
0x2170   : > { %v6254_v37 = vsub.f32 %v6230_v21, %v6250_v14 }
0x2171   : > { %v6253_v12 = vsub.f32 %v6229_v22, %v6249_v57 }
0x2172   : > { %v6248_v33 = vpop.xlane.xlu0 %6247  ;;  %v6258_v40 = vmul.f32 %v6254_v37, %v6254_v37 }
0x2173   : > { %v6252_v29 = vmul.f32 0.03125, %v6248_v33  ;;  %v6245_v35 = vpop.xlane.xlu1 %6244  ;;  %v6257_v4 = vmul.f32 %v6253_v12, %v6253_v12 }
0x2174   : > { %v6251_v43 = vmul.f32 0.03125, %v6245_v35  ;;  %v6264_v7 = vsel %vm811_vm0, %v6258_v40, 0.0 }
0x2175   : > { %v6256_v41 = vsub.f32 %v6232_v27, %v6252_v29  ;;  %6265 = vadd.xlane.f32.xlu0 %v6264_v7  ;;  %v6261_v42 = vsel %vm811_vm0, %v6257_v4, 0.0  ;;  %v6383_v4 = vld [vmem:[%s9781_s22] sm:$0xff] }
0x2176   : > { %v6255_v44 = vsub.f32 %v6231_v62, %v6251_v43  ;;  %6262 = vadd.xlane.f32.xlu1 %v6261_v42  ;;  %v6384_v43 = vld [vmem:[%s9781_s22 + $0x8] sm:$0xff]  ;;  %v6386_v42 = vld [vmem:[%s9781_s22 + $0x18] sm:$0xff] }
0x2177   : > { %v6260_v45 = vmul.f32 %v6256_v41, %v6256_v41  ;;  %v7926_v7 = vpack.c.bf16 %v6384_v43, %v6383_v4 }
0x2178   : > { %v6259_v47 = vmul.f32 %v6255_v44, %v6255_v44 }
0x2179   : > { %v6270_v17 = vsel %vm811_vm0, %v6260_v45, 0.0  ;;  %7927 = vmatprep.subr.bf16.mxu1 %v7926_v7 }
0x217a   : > { %6271 = vadd.xlane.f32.xlu0 %v6270_v17  ;;  %v6267_v49 = vsel %vm811_vm0, %v6259_v47, 0.0  ;;  %7929 = vmatpush3.bf16.msra.mxu1 %v7926_v7 }
0x217b   : > { %6268 = vadd.xlane.f32.xlu1 %v6267_v49 }
0x2202   : > { %v6266_v50 = vpop.xlane.xlu0 %6265 }
0x2203   : > { %v6274_v46 = vmul.f32 0.03125, %v6266_v50  ;;  %v6263_v23 = vpop.xlane.xlu1 %6262 }
0x2204   : > { %v6273_v54 = vmul.f32 0.03125, %v6263_v23 }
0x2205   : > { %v6278_v25 = vadd.f32 1e-05, %v6274_v46 }
0x2206   : > { %v6277_v31 = vadd.f32 1e-05, %v6273_v54 }
0x2207   : > { %8343 = vrsqrt.f32 %v6278_v25  ;;  %v6272_v55 = vpop.xlane.xlu0 %6271 }
0x2208   : > { %8345 = vrsqrt.f32 %v6277_v31  ;;  %v6276_v59 = vmul.f32 0.03125, %v6272_v55  ;;  %v6269_v36 = vpop.xlane.xlu1 %6268 }
0x2209   : > { %v6275_v51 = vmul.f32 0.03125, %v6269_v36 }
0x220a   : > { %v6280_v60 = vadd.f32 1e-05, %v6276_v59 }
0x220b   : > { %v6279_v34 = vadd.f32 1e-05, %v6275_v51  ;;  %v6852_v51 = vld [vmem:[%s9779_s20] ss:$0 sm:$0xff] }
0x220c   : > { %8347 = vrsqrt.f32 %v6280_v60 }
0x220d   : > { %8349 = vrsqrt.f32 %v6279_v34 }
0x2211   : > { %v8344_v52 = vpop.eup %8343 }
0x2212   : > { %v8346_v53 = vpop.eup %8345  ;;  %v6286_v63 = vmul.f32 %v8344_v52, %v6254_v37 }
0x2213   : > { %v6285_v1 = vmul.f32 %v8346_v53, %v6253_v12 }
0x2214   : > { %v6296_v3 = vmul.f32 %v6850_v61, %v6286_v63 }
0x2215   : > { %v6295_v5 = vmul.f32 %v6850_v61, %v6285_v1 }
0x2216   : > { %v8348_v6 = vpop.eup %8347  ;;  %v6306_v8 = vadd.f32 %v6851_v0, %v6296_v3 }
0x2217   : > { %v8350_v9 = vpop.eup %8349  ;;  %v6305_v30 = vadd.f32 %v6851_v0, %v6295_v5  ;;  %v6288_v10 = vmul.f32 %v8348_v6, %v6256_v41  ;;  %v6385_v41 = vld [vmem:[%s9781_s22 + $0x10] sm:$0xff] }
0x2218   : > { %v6314_v15 = vsel %vm811_vm0, %v6306_v8, 0.0  ;;  %v6287_v48 = vmul.f32 %v8350_v9, %v6255_v44  ;;  %v7930_v44 = vpack.c.bf16 %v6386_v42, %v6385_v41 }
0x2219   : > { %6315 = vadd.xlane.f32.xlu0 %v6314_v15  ;;  %v6311_v11 = vsel %vm811_vm0, %v6305_v30, 0.0  ;;  %v6298_v13 = vmul.f32 %v6850_v61, %v6288_v10 }
0x221a   : > { %6312 = vadd.xlane.f32.xlu1 %v6311_v11  ;;  %v6297_v16 = vmul.f32 %v6850_v61, %v6287_v48  ;;  %7931 = vmatprep.subr.bf16.mxu1 %v7930_v44  ;;  %v6853_v61 = vld [vmem:[%s9860_s8] ss:$0 sm:$0xff] }
0x221b   : > { %v6308_v18 = vadd.f32 %v6851_v0, %v6298_v13  ;;  %7933 = vmatpush3.bf16.msra.mxu1 %v7930_v44  ;;  %v6854_v48 = vld [vmem:[%s9862_s25] ss:$0 sm:$0xff]  ;;  %s8475_s25 = sshll.u32 %s8558_s6, 4  ;;  %s8476_s25 = int_to_ptr.vmem [resolvable:$false] %s8475_s25 }
0x221c   : > { %v6307_v19 = vadd.f32 %v6851_v0, %v6297_v16  ;;  %s8477_s0 = scalar_lea.vmem %s8476_s25, 1024  ;;  %p8478_p8 = scmp.lt.s32.totalorder %s9711_s28, %s8476_s25 }
0x221d   : > { %v6320_v21 = vsel %vm811_vm0, %v6308_v18, 0.0  ;;  %p8479_p11 = scmp.lt.s32.totalorder %s8477_s0, %s8471_s4 }
0x221e   : > { %6321 = vadd.xlane.f32.xlu0 %v6320_v21  ;;  %v6317_v22 = vsel %vm811_vm0, %v6307_v19, 0.0 }
0x221f   : > { %6318 = vadd.xlane.f32.xlu1 %v6317_v22  ;;  %p8480_p13 = por %p8479_p11, %p8478_p8 }
0x2221   : > { %p8481_p0 = pnand %p8480_p13, %p8474_p7 }
0x22a6   : > { %v6316_v56 = vpop.xlane.xlu0 %6315 }
0x22a7   : > { %v6324_v58 = vmul.f32 0.03125, %v6316_v56  ;;  %v6313_v26 = vpop.xlane.xlu1 %6312 }
0x22a8   : > { %v6323_v38 = vmul.f32 0.03125, %v6313_v26 }
0x22a9   : > { %v6328_v24 = vsub.f32 %v6306_v8, %v6324_v58 }
0x22aa   : > { %v6327_v32 = vsub.f32 %v6305_v30, %v6323_v38 }
0x22ab   : > { %v6322_v27 = vpop.xlane.xlu0 %6321  ;;  %v6332_v62 = vmul.f32 %v6328_v24, %v6328_v24 }
0x22ac   : > { %v6326_v39 = vmul.f32 0.03125, %v6322_v27  ;;  %v6319_v2 = vpop.xlane.xlu1 %6318  ;;  %v6331_v28 = vmul.f32 %v6327_v32, %v6327_v32 }
0x22ad   : > { %v6325_v14 = vmul.f32 0.03125, %v6319_v2  ;;  %v6338_v20 = vsel %vm811_vm0, %v6332_v62, 0.0 }
0x22ae   : > { %v6330_v57 = vsub.f32 %v6308_v18, %v6326_v39  ;;  %6339 = vadd.xlane.f32.xlu0 %v6338_v20  ;;  %v6335_v37 = vsel %vm811_vm0, %v6331_v28, 0.0 }
0x22af   : > { %v6329_v12 = vsub.f32 %v6307_v19, %v6325_v14  ;;  %6336 = vadd.xlane.f32.xlu1 %v6335_v37 }
0x22b0   : > { %v6334_v33 = vmul.f32 %v6330_v57, %v6330_v57 }
0x22b1   : > { %v6333_v40 = vmul.f32 %v6329_v12, %v6329_v12 }
0x22b2   : > { %v6344_v29 = vsel %vm811_vm0, %v6334_v33, 0.0 }
0x22b3   : > { %6345 = vadd.xlane.f32.xlu0 %v6344_v29  ;;  %v6341_v35 = vsel %vm811_vm0, %v6333_v40, 0.0 }
0x22b4   : > { %6342 = vadd.xlane.f32.xlu1 %v6341_v35 }
0x233b   : > { %v6340_v45 = vpop.xlane.xlu0 %6339 }
0x233c   : > { %v6348_v47 = vmul.f32 0.03125, %v6340_v45  ;;  %v6337_v17 = vpop.xlane.xlu1 %6336 }
0x233d   : > { %v6347_v49 = vmul.f32 0.03125, %v6337_v17 }
0x233e   : > { %v6352_v50 = vadd.f32 1e-05, %v6348_v47 }
0x233f   : > { %v6351_v46 = vadd.f32 1e-05, %v6347_v49 }
0x2340   : > { %8351 = vrsqrt.f32 %v6352_v50  ;;  %v6346_v23 = vpop.xlane.xlu0 %6345 }
0x2341   : > { %8353 = vrsqrt.f32 %v6351_v46  ;;  %v6350_v54 = vmul.f32 0.03125, %v6346_v23  ;;  %v6343_v25 = vpop.xlane.xlu1 %6342 }
0x2342   : > { %v6349_v31 = vmul.f32 0.03125, %v6343_v25 }
0x2343   : > { %v6354_v55 = vadd.f32 1e-05, %v6350_v54 }
0x2344   : > { %v6353_v59 = vadd.f32 1e-05, %v6349_v31 }
0x2345   : > { %8355 = vrsqrt.f32 %v6354_v55 }
0x2346   : > { %8357 = vrsqrt.f32 %v6353_v59 }
0x234a   : > { %v8352_v36 = vpop.eup %8351 }
0x234b   : > { %v8354_v60 = vpop.eup %8353  ;;  %v6360_v34 = vmul.f32 %v8352_v36, %v6328_v24 }
0x234c   : > { %v6359_v52 = vmul.f32 %v8354_v60, %v6327_v32 }
0x234d   : > { %v6370_v53 = vmul.f32 %v6852_v51, %v6360_v34 }
0x234e   : > { %v6369_v63 = vmul.f32 %v6852_v51, %v6359_v52 }
0x234f   : > { %v8356_v0 = vpop.eup %8355  ;;  %v6380_v6 = vadd.f32 %v6853_v61, %v6370_v53 }
0x2350   : > { %v8358_v1 = vpop.eup %8357  ;;  %v6379_v3 = vadd.f32 %v6853_v61, %v6369_v63  ;;  %v6362_v5 = vmul.f32 %v8356_v0, %v6330_v57 }
0x2351   : > { %v6361_v8 = vmul.f32 %v8358_v1, %v6329_v12 }
0x2352   : > { %7632 = vmatprep.mubr.msk.f32.mxu1 %vm811_vm0, %v6379_v3  ;;  %v6372_v9 = vmul.f32 %v6852_v51, %v6362_v5 }
0x2353   : > { %7633 = vmatmul.mubr.msk.f32.vlgmr.msra.gmra.mrb[70].mxu1 %vm811_vm0, %v6380_v6  ;;  %v6371_v30 = vmul.f32 %v6852_v51, %v6361_v8 }
0x2354   : > { %v6382_v15 = vadd.f32 %v6853_v61, %v6372_v9 }
0x2355   : > { %v6381_v10 = vadd.f32 %v6853_v61, %v6371_v30 }
0x2357   : > { %7635 = vmatprep.mubr.msk.f32.mxu1 %vm811_vm0, %v6381_v10 }
0x2358   : > { %7636 = vmatmul.mubr.msk.f32.gmra.mrb[72].mxu1 %vm811_vm0, %v6382_v15 }
0x2426   : > { %v7634_v11 = vpop.f32.mrb[70].mxu1 }
0x2427   : > { %v6478_v13 = vadd.f32 %v7634_v11, %v6854_v48  ;;  %v6472_v16 = vpop.f32.mrb[71].mxu1 }
0x2428   : > { %v6473_v18 = vadd.f32 %v6854_v48, %v6472_v16 }
0x2429   : > { %6492 = vst [vmem:[%s790_s24 + $0x8] sm:$0xff] %v6478_v13 }
0x242a   : > { %6491 = vst [vmem:[%s790_s24] sm:$0xff] %v6473_v18 }
0x242b   : > { %v7637_v19 = vpop.f32.mrb[72].mxu1 }
0x242c   : > { %v6488_v21 = vadd.f32 %v7637_v19, %v6854_v48  ;;  %v6482_v22 = vpop.f32.mrb[73].mxu1 }
0x242d   : > { %v6483_v56 = vadd.f32 %v6854_v48, %v6482_v22 }
0x242e   : > { %6494 = vst [vmem:[%s790_s24 + $0x18] sm:$0xff] %v6488_v21 }
0x242f   : > { %6493 = vst [vmem:[%s790_s24 + $0x10] sm:$0xff] %v6483_v56 }
0x2430   : > { %8484 = shalt.err (!%p8481_p0)
}
0x2431   : > { %s8485_s2 = scalar_lea.hbm %s9716_s23, 512  ;;  %s8489_s27 = scalar_lea.hbm %s9864_s7, 1024 }
0x2432   : > { %p8486_p1 = scmp.ne.s32.totalorder %s9716_s23, %s8485_s2  ;;  %p8490_p9 = scmp.lt.u32.totalorder %s9716_s23, %s9864_s7 }
0x2433   : > { %p8491_p12 = scmp.lt.u32.totalorder %s8489_s27, %s8485_s2  ;;  %p8493_p2 = scmp.lt.u32.totalorder %s8485_s2, %s9716_s23 }
0x2434   : > { %p8487_p6 = pnand %p8486_p1, %p9865_p3 }
0x2435   : > { %p8492_p10 = por %p8491_p12, %p8490_p9 }
0x2436   : > { %p8488_p5 = pneg %p8487_p6 }
0x2437   : > { %p8494_p4 = por %p8493_p2, %p8492_p10 }
0x2439   : > { %p8495_p7 = pnand %p8494_p4, %p8488_p5 }
0x243b   : > { %8498 = shalt.err (!%p8495_p7)
}
0x243c   : > { %s8559_s0 = smov 128   ;;  %s8560_s4 = smov 8  }
0x243d   : > { %7974 = dma.vmem_to_hbm [thread:$0]  (%p9865_p3), %s9711_s28, 512, %s9716_s23, %s9718_s3, %s8559_s0, %s8559_s0, %s8560_s4  }
0x243e PF: > { %s9866_s25 = sld [smem:[#allocation18_spill]]  ;;  %s9867_s24 = sld [smem:[#allocation15_spill]] }
0x243f   : > { %s9868_s26 = sld [smem:[#allocation22_spill]] }
0x2444   : > { %p8001_p8 = scmp.ge.s32.totalorder %s9866_s25, 2  ;;  %s6525_s8 = sand.u32 1, %s9867_s24  }
0x2445   : > { %p9869_p11 = scmp.ne.s32.totalorder %s9868_s26, 0  ;;  %s6526_s2 = scalar_lea.sflag [#allocation4], %s6525_s8 }
0x2447   : > { %p7990_p13 = pnand %p8001_p8, %p9869_p11 }
0x2449   : > { %8528 = dma.done.wait (!%p7990_p13), %s6526_s2, 512  }
0x244a   : > { %8530 = vsyncadd (!%p7990_p13), %s6526_s2, 4294966784  ;;  %s9870_s28 = sld [smem:[#allocation19_spill]]  ;;  %s9871_s5 = sld [smem:[#allocation16_spill]] }
0x244b   : > { %s9872_s26 = sld [smem:[#allocation17_spill]]  ;;  %s9873_s27 = sld [smem:[#allocation20_spill]] }
0x2450   : > { %p37_p0 = scmp.ge.s32.totalorder %s9870_s28, 4  }
0x2452   :  { %39 = sbr.rel (!%p37_p0) target bundleno = 19 (0x13), region = 184 }
0x2459   :  { %6531 = vsyncpa [#allocation3], 1 }
0x245a   :  { %6533 = vsyncpa [#allocation3 + $0x1], 1 }
0x245b   :  { %6534 = vsyncpa [#allocation6], 1 }
0x245c   :  { %6535 = vsyncpa [#allocation9], 1 }
0x245d   :  { %6536 = vsyncpa [#allocation4], 1 }
0x245e   :  { %6538 = vsyncpa [#allocation4 + $0x1], 1 }

</bundles_post_ra>
